<compile_context>
chip_gen: v7x
topology: tpu7x:2x2x1
jax: 0.10.0
libtpu: 0.0.40
codegen_flags: <defaults>
</compile_context>

<pallas_src>
import math

import jax
import jax.numpy as jnp
from jax.experimental import pallas as pl
from jax.experimental.pallas import tpu as pltpu

VMEM = pltpu.MemorySpace.VMEM
F32 = jnp.float32


def _vspecs(n):
    return [pl.BlockSpec(memory_space=VMEM) for _ in range(n)]


def _round_up(x, m):
    return (x + m - 1) // m * m


def _sigmoid(x):
    # exp -> EUP, reciprocal -> EUP recip slot; keeps the divide off the VALU path.
    return pl.reciprocal(1.0 + jnp.exp(-x), approx=True)


# --------------------------------------------------------------------------
# In-kernel GVP block (operates on values already loaded from VMEM refs).
# Vector features are three (rows, v) x/y/z component planes; the wh / wv
# projections are issued once on a row-stacked (3*rows, v) block.
# --------------------------------------------------------------------------
def _gvp(s, vx, vy, vz, p, *, scalar_act, vector_act, vector_gate):
    n = s.shape[0]
    v_stack = jnp.concatenate([vx, vy, vz], axis=0)               # (3n, vi)
    vh = jnp.dot(v_stack, p['wh'], preferred_element_type=F32)    # (3n, h)
    vhx, vhy, vhz = vh[:n], vh[n:2 * n], vh[2 * n:3 * n]
    # _norm_no_nan over the xyz axis (clamp-then-sqrt, eps=1e-8)
    vn = jnp.sqrt(jnp.maximum(vhx * vhx + vhy * vhy + vhz * vhz, 1e-8))
    s_lin = (jnp.dot(s, p['ws_s'], preferred_element_type=F32)
             + jnp.dot(vn, p['ws_vn'], preferred_element_type=F32)
             + p['ws_b'])

    v_out = None
    if 'wv' in p:
        vo = jnp.dot(vh, p['wv'], preferred_element_type=F32)     # (3n, vo)
        vox, voy, voz = vo[:n], vo[n:2 * n], vo[2 * n:3 * n]
        if vector_gate:
            g_in = _sigmoid(s_lin) if vector_act else s_lin
            gate = _sigmoid(jnp.dot(g_in, p['wsv_w'],
                                    preferred_element_type=F32) + p['wsv_b'])
            vox, voy, voz = vox * gate, voy * gate, voz * gate
        elif vector_act:
            vno = jnp.sqrt(jnp.maximum(vox * vox + voy * voy + voz * voz, 1e-8))
            sc = _sigmoid(vno)
            vox, voy, voz = vox * sc, voy * sc, voz * sc
        v_out = (vox, voy, voz)

    if scalar_act:
        s_lin = jnp.maximum(s_lin, 0.0)
    return s_lin, v_out


# --------------------------------------------------------------------------
# Parameter flattening helpers (fixed ref order shared by kernels & wrappers).
# --------------------------------------------------------------------------
_GVP_NREF = {'scalar': 4, 'plain': 5, 'gated': 7}


def _load_gvp(refs, mode):
    k = _GVP_NREF[mode]
    r, rest = refs[:k], refs[k:]
    p = {'wh': r[0][...], 'ws_s': r[1][...], 'ws_vn': r[2][...], 'ws_b': r[3][...]}
    if mode != 'scalar':
        p['wv'] = r[4][...]
    if mode == 'gated':
        p['wsv_w'] = r[5][...]
        p['wsv_b'] = r[6][...]
    return p, rest


def _gvp_flat(p):
    flat = [p['wh'], p['ws_s'], p['ws_vn'], p['ws_b']]
    if 'wv' in p:
        flat.append(p['wv'])
    if 'wsv_w' in p:
        flat += [p['wsv_w'], p['wsv_b']]
    return flat


def _split_slab(x, sdim, vdim):
    return (x[:, :sdim],
            x[:, sdim:sdim + vdim],
            x[:, sdim + vdim:sdim + 2 * vdim],
            x[:, sdim + 2 * vdim:sdim + 3 * vdim])


def _pack_slab(s, vx, vy, vz):
    return jnp.concatenate([s, vx, vy, vz], axis=1)


def _residual_ln(xs, xvx, xvy, xvz, ds, dvx, dvy, dvz, g, b):
    """Residual add + GVP LayerNorm (scalar LayerNorm + vector RMS normalization)."""
    s = xs + ds
    vx, vy, vz = xvx + dvx, xvy + dvy, xvz + dvz
    mu = jnp.mean(s, axis=-1, keepdims=True)
    var = jnp.mean(jnp.square(s - mu), axis=-1, keepdims=True)
    s = (s - mu) * jax.lax.rsqrt(var + 1e-5) * g + b
    vn2 = jnp.maximum(vx * vx + vy * vy + vz * vz, 1e-8)
    inv = jax.lax.rsqrt(jnp.mean(vn2, axis=-1, keepdims=True))
    return s, vx * inv, vy * inv, vz * inv


# --------------------------------------------------------------------------
# Kernel 1: input embeddings W_v (nodes) + W_e (edges) fused into one call.
# --------------------------------------------------------------------------
def make_embed_kernel(node_in, edge_in):
    sn_i, vn_i = node_in
    se_i, ve_i = edge_in

    def kernel(*refs):
        nv_ref, ne_ref = refs[0], refs[1]
        rest = refs[2:]
        pv, rest = _load_gvp(rest, 'plain')
        pe, rest = _load_gvp(rest, 'plain')
        hv_out, he_out = rest

        s, vx, vy, vz = _split_slab(nv_ref[...], sn_i, vn_i)
        so, v = _gvp(s, vx, vy, vz, pv,
                     scalar_act=False, vector_act=False, vector_gate=False)
        hv_out[...] = _pack_slab(so, *v)

        s, vx, vy, vz = _split_slab(ne_ref[...], se_i, ve_i)
        so, v = _gvp(s, vx, vy, vz, pe,
                     scalar_act=False, vector_act=False, vector_gate=False)
        he_out[...] = _pack_slab(so, *v)

    return kernel


# --------------------------------------------------------------------------
# Kernel 2: one fully-fused GVPConvLayer.
# --------------------------------------------------------------------------
def make_layer_kernel(ns, nv, se, ve):
    def kernel(*refs):
        hv_ref, he_ref, gsrc_ref, gdst_ref, amean_ref = refs[:5]
        rest = refs[5:]
        p_msg0, rest = _load_gvp(rest, 'gated')
        p_msg1, rest = _load_gvp(rest, 'gated')
        p_msg2, rest = _load_gvp(rest, 'gated')
        p_ff0, rest = _load_gvp(rest, 'gated')
        p_ff1, rest = _load_gvp(rest, 'gated')
        g0, b0, g1, b1 = rest[0][...], rest[1][...], rest[2][...], rest[3][...]
        out_ref = rest[4]

        hv = hv_ref[...]                                        # (Np, ns+3nv)
        he = he_ref[...]                                        # (Ep, se+3ve)

        # gather source / target node slabs with one matmul each
        hv_j = jnp.dot(gsrc_ref[...], hv, preferred_element_type=F32)   # (Ep, Dn)
        hv_i = jnp.dot(gdst_ref[...], hv, preferred_element_type=F32)   # (Ep, Dn)

        sj, vjx, vjy, vjz = _split_slab(hv_j, ns, nv)
        si, vix, viy, viz = _split_slab(hv_i, ns, nv)
        es, evx, evy, evz = _split_slab(he, se, ve)

        # message input: cat((s_j, v_j), edge_attr, (s_i, v_i))
        ms = jnp.concatenate([sj, es, si], axis=1)
        mvx = jnp.concatenate([vjx, evx, vix], axis=1)
        mvy = jnp.concatenate([vjy, evy, viy], axis=1)
        mvz = jnp.concatenate([vjz, evz, viz], axis=1)

        m_s, m_v = _gvp(ms, mvx, mvy, mvz, p_msg0,
                        scalar_act=True, vector_act=True, vector_gate=True)
        m_s, m_v = _gvp(m_s, *m_v, p_msg1,
                        scalar_act=True, vector_act=True, vector_gate=True)
        m_s, m_v = _gvp(m_s, *m_v, p_msg2,
                        scalar_act=False, vector_act=False, vector_gate=True)

        # mean aggregation over incoming edges: ONE matmul on the packed message slab
        dh = jnp.dot(amean_ref[...], _pack_slab(m_s, *m_v),
                     preferred_element_type=F32)                # (Np, Dn)

        # residual + LayerNorm   (TODO(synk): dropout = identity, eval mode)
        x_s, x_vx, x_vy, x_vz = _split_slab(hv, ns, nv)
        d_s, d_vx, d_vy, d_vz = _split_slab(dh, ns, nv)
        s, vx, vy, vz = _residual_ln(x_s, x_vx, x_vy, x_vz,
                                     d_s, d_vx, d_vy, d_vz, g0, b0)

        # feed-forward: 2 GVPs per node
        f_s, f_v = _gvp(s, vx, vy, vz, p_ff0,
                        scalar_act=True, vector_act=True, vector_gate=True)
        f_s, f_v = _gvp(f_s, *f_v, p_ff1,
                        scalar_act=False, vector_act=False, vector_gate=True)

        s, vx, vy, vz = _residual_ln(s, vx, vy, vz, f_s, *f_v, g1, b1)
        out_ref[...] = _pack_slab(s, vx, vy, vz)

    return kernel


# --------------------------------------------------------------------------
# Kernel 3: W_out GVP + global mean pool (matmul) + dense head, fused.
# --------------------------------------------------------------------------
def make_head_kernel(ns, nv):
    def kernel(*refs):
        hv_ref, pool_ref = refs[0], refs[1]
        rest = refs[2:]
        p_out, rest = _load_gvp(rest, 'scalar')
        w1, b1, w2, b2 = rest[0][...], rest[1][...], rest[2][...], rest[3][...]
        out_ref = rest[4]

        s, vx, vy, vz = _split_slab(hv_ref[...], ns, nv)
        so, _ = _gvp(s, vx, vy, vz, p_out,
                     scalar_act=True, vector_act=True, vector_gate=True)
        pooled = jnp.dot(pool_ref[...], so, preferred_element_type=F32)
        h = jnp.dot(pooled, w1, preferred_element_type=F32) + b1
        h = h * _sigmoid(h)                                     # SiLU
        out_ref[...] = jnp.dot(h, w2, preferred_element_type=F32) + b2

    return kernel


# --------------------------------------------------------------------------
# Full forward pass
# --------------------------------------------------------------------------
def gvp_gnn_forward(params, hV_s, hV_v3, hE_s, hE_v3, edge_index, batch, num_graphs):
    n, sn_i = hV_s.shape
    vn_i = hV_v3.shape[1]
    e, se_i = hE_s.shape
    ve_i = hE_v3.shape[1]
    ns = params['W_v']['ws_b'].shape[1]
    nv = params['W_v']['wv'].shape[1]
    se = params['W_e']['ws_b'].shape[1]
    ve = params['W_e']['wv'].shape[1]

    n_pad = _round_up(n, 8)
    e_pad = _round_up(e, 8)

    def pack3(s, v3):   # (rows, sdim), (rows, vdim, 3) -> (rows, sdim + 3*vdim)
        return jnp.concatenate([s, v3[..., 0], v3[..., 1], v3[..., 2]], axis=1)

    def pad_rows(x, rows):
        return jnp.pad(x, ((0, rows - x.shape[0]), (0, 0)))

    node_in = pad_rows(pack3(hV_s, hV_v3), n_pad)
    edge_in = pad_rows(pack3(hE_s, hE_v3), e_pad)

    src, dst = edge_index[0], edge_index[1]
    # one-hot gather / mean-aggregation / pooling matrices (tiny; matmul form on purpose)
    g_src = jnp.pad(jax.nn.one_hot(src, n_pad, dtype=F32), ((0, e_pad - e), (0, 0)))
    g_dst = jnp.pad(jax.nn.one_hot(dst, n_pad, dtype=F32), ((0, e_pad - e), (0, 0)))
    deg = jnp.maximum(jnp.sum(g_dst, axis=0), 1.0)               # (Np,)
    a_mean = g_dst.T / deg[:, None]                              # (Np, Ep)
    pool = jax.nn.one_hot(batch, num_graphs, dtype=F32).T        # (B, N)
    pool = pool / jnp.maximum(jnp.sum(pool, axis=1, keepdims=True), 1.0)
    pool = jnp.pad(pool, ((0, 0), (0, n_pad - n)))               # (B, Np)

    # --- input embeddings: W_v and W_e in one fused call ---------------------
    embed_inputs = ([node_in, edge_in]
                    + _gvp_flat(params['W_v']) + _gvp_flat(params['W_e']))
    hv, he = pl.pallas_call(
        make_embed_kernel((sn_i, vn_i), (se_i, ve_i)),
        out_shape=(jax.ShapeDtypeStruct((n_pad, ns + 3 * nv), F32),
                   jax.ShapeDtypeStruct((e_pad, se + 3 * ve), F32)),
        in_specs=_vspecs(len(embed_inputs)),
        out_specs=tuple(_vspecs(2)),
    )(*embed_inputs)

    # --- GVPConvLayers: one fused pallas_call per layer -----------------------
    layer_kernel = make_layer_kernel(ns, nv, se, ve)
    for lp in params['layers']:
        layer_inputs = [hv, he, g_src, g_dst, a_mean]
        for p in lp['msg']:
            layer_inputs += _gvp_flat(p)
        for p in lp['ff']:
            layer_inputs += _gvp_flat(p)
        layer_inputs += [lp['norm0']['g'], lp['norm0']['b'],
                         lp['norm1']['g'], lp['norm1']['b']]
        hv = pl.pallas_call(
            layer_kernel,
            out_shape=jax.ShapeDtypeStruct((n_pad, ns + 3 * nv), F32),
            in_specs=_vspecs(len(layer_inputs)),
            out_specs=pl.BlockSpec(memory_space=VMEM),
        )(*layer_inputs)

    # --- W_out GVP + global mean pool + dense head in one fused call ----------
    d = params['dense']
    head_inputs = ([hv, pool] + _gvp_flat(params['W_out'])
                   + [d['w1'], d['b1'], d['w2'], d['b2']])
    out = pl.pallas_call(
        make_head_kernel(ns, nv),
        out_shape=jax.ShapeDtypeStruct((num_graphs, 1), F32),
        in_specs=_vspecs(len(head_inputs)),
        out_specs=pl.BlockSpec(memory_space=VMEM),
    )(*head_inputs)
    return out


forward = jax.jit(gvp_gnn_forward, static_argnames=('num_graphs',))


# --------------------------------------------------------------------------
# Deterministic parameter initialization (shapes follow the PyTorch module).
# --------------------------------------------------------------------------
def _uniform(key, shape, fan_in):
    bound = 1.0 / math.sqrt(fan_in)
    return jax.random.uniform(key, shape, F32, -bound, bound)


def init_gvp(key, in_dims, out_dims, vector_gate):
    si, vi = in_dims
    so, vo = out_dims
    h = max(vi, vo)  # library default h_dim
    k = jax.random.split(key, 7)
    p = {
        'wh':    _uniform(k[0], (vi, h), vi),          # Linear(vi, h, bias=False).T
        'ws_s':  _uniform(k[1], (si, so), si + h),     # Linear(si+h, so) split: s part
        'ws_vn': _uniform(k[2], (h, so), si + h),      #                      : vn part
        'ws_b':  _uniform(k[3], (1, so), si + h),
    }
    if vo > 0:
        p['wv'] = _uniform(k[4], (h, vo), h)           # Linear(h, vo, bias=False).T
        if vector_gate:
            p['wsv_w'] = _uniform(k[5], (so, vo), so)  # Linear(so, vo).T
            p['wsv_b'] = _uniform(k[6], (1, vo), so)
    return p


def init_params(key, node_in_dim, node_h_dim, edge_in_dim, edge_h_dim, num_layers):
    ns, nv = node_h_dim
    se, ve = edge_h_dim
    keys = iter(jax.random.split(key, 8 + 8 * num_layers))
    params = {
        'W_v': init_gvp(next(keys), node_in_dim, node_h_dim, vector_gate=False),
        'W_e': init_gvp(next(keys), edge_in_dim, edge_h_dim, vector_gate=False),
    }
    msg_in = (2 * ns + se, 2 * nv + ve)
    hid = (4 * ns, 2 * nv)
    layers = []
    for _ in range(num_layers):
        layers.append({
            'msg': [init_gvp(next(keys), msg_in, node_h_dim, True),
                    init_gvp(next(keys), node_h_dim, node_h_dim, True),
                    init_gvp(next(keys), node_h_dim, node_h_dim, True)],
            'ff':  [init_gvp(next(keys), node_h_dim, hid, True),
                    init_gvp(next(keys), hid, node_h_dim, True)],
            'norm0': {'g': jnp.ones((1, ns), F32), 'b': jnp.zeros((1, ns), F32)},
            'norm1': {'g': jnp.ones((1, ns), F32), 'b': jnp.zeros((1, ns), F32)},
        })
    params['layers'] = layers
    params['W_out'] = init_gvp(next(keys), node_h_dim, (ns, 0), True)
    k1, k2, k3, k4 = jax.random.split(next(keys), 4)
    params['dense'] = {'w1': _uniform(k1, (ns, ns), ns), 'b1': _uniform(k2, (1, ns), ns),
                       'w2': _uniform(k3, (ns, 1), ns), 'b2': _uniform(k4, (1, 1), ns)}
    return params


if __name__ == "__main__":
    key = jax.random.PRNGKey(0)
    node_in_dim = (6, 3)   # (scalar, vector) channels of input node features
    node_h_dim = (16, 4)
    edge_in_dim = (8, 1)
    edge_h_dim = (16, 2)
    num_layers = 3
    N, E, B = 12, 36, 2    # nodes, edges, graphs in the batch

    kp, kd = jax.random.split(key)
    params = init_params(kp, node_in_dim, node_h_dim, edge_in_dim, edge_h_dim, num_layers)

    ks = jax.random.split(kd, 6)
    hV_s = jax.random.normal(ks[0], (N, node_in_dim[0]), F32)
    hV_v = jax.random.normal(ks[1], (N, node_in_dim[1], 3), F32)
    hE_s = jax.random.normal(ks[2], (E, edge_in_dim[0]), F32)
    hE_v = jax.random.normal(ks[3], (E, edge_in_dim[1], 3), F32)

    # two graphs of 6 nodes each; edges stay inside their own graph
    half = E // 2
    src0 = jax.random.randint(ks[4], (half,), 0, N // 2)
    dst0 = jax.random.randint(ks[5], (half,), 0, N // 2)
    edge_index = jnp.stack([jnp.concatenate([src0, src0 + N // 2]),
                            jnp.concatenate([dst0, dst0 + N // 2])]).astype(jnp.int32)
    batch = jnp.concatenate([jnp.zeros(N // 2, jnp.int32),
                             jnp.ones(N // 2, jnp.int32)])
    # embedding=(1, 0) -> pembedding is unused by the reference forward

    out = forward(params, hV_s, hV_v, hE_s, hE_v, edge_index, batch, num_graphs=B)
    jax.block_until_ready(out)
    assert out.shape == (B, 1) and out.dtype == F32
    assert bool(jnp.all(jnp.isfinite(out)))
    print("KERNEL_OK")
</pallas_src>

<mosaic_0001>
module attributes {stable_mosaic.version = 11 : i64} {
  func.func @kernel(%arg0: memref<16x15xf32, #tpu.memory_space<vmem>>, %arg1: memref<40x11xf32, #tpu.memory_space<vmem>>, %arg2: memref<3x4xf32, #tpu.memory_space<vmem>>, %arg3: memref<6x16xf32, #tpu.memory_space<vmem>>, %arg4: memref<4x16xf32, #tpu.memory_space<vmem>>, %arg5: memref<1x16xf32, #tpu.memory_space<vmem>>, %arg6: memref<4x4xf32, #tpu.memory_space<vmem>>, %arg7: memref<1x2xf32, #tpu.memory_space<vmem>>, %arg8: memref<8x16xf32, #tpu.memory_space<vmem>>, %arg9: memref<2x16xf32, #tpu.memory_space<vmem>>, %arg10: memref<1x16xf32, #tpu.memory_space<vmem>>, %arg11: memref<2x2xf32, #tpu.memory_space<vmem>>, %arg12: memref<16x28xf32, #tpu.memory_space<vmem>>, %arg13: memref<40x22xf32, #tpu.memory_space<vmem>>) attributes {dimension_semantics = [], scalar_prefetch = 0 : i64, scratch_operands = 0 : i64, tpu.core_type = #tpu.core_type<tc>} {
    %c0 = arith.constant 0 : index
    %c0_0 = arith.constant 0 : index
    %0 = vector.load %arg2[%c0, %c0_0] : memref<3x4xf32, #tpu.memory_space<vmem>>, vector<3x4xf32>
    %c0_1 = arith.constant 0 : index
    %c0_2 = arith.constant 0 : index
    %1 = vector.load %arg3[%c0_1, %c0_2] : memref<6x16xf32, #tpu.memory_space<vmem>>, vector<6x16xf32>
    %c0_3 = arith.constant 0 : index
    %c0_4 = arith.constant 0 : index
    %2 = vector.load %arg4[%c0_3, %c0_4] : memref<4x16xf32, #tpu.memory_space<vmem>>, vector<4x16xf32>
    %c0_5 = arith.constant 0 : index
    %c0_6 = arith.constant 0 : index
    %3 = vector.load %arg5[%c0_5, %c0_6] : memref<1x16xf32, #tpu.memory_space<vmem>>, vector<1x16xf32>
    %c0_7 = arith.constant 0 : index
    %c0_8 = arith.constant 0 : index
    %4 = vector.load %arg6[%c0_7, %c0_8] : memref<4x4xf32, #tpu.memory_space<vmem>>, vector<4x4xf32>
    %c0_9 = arith.constant 0 : index
    %c0_10 = arith.constant 0 : index
    %5 = vector.load %arg7[%c0_9, %c0_10] : memref<1x2xf32, #tpu.memory_space<vmem>>, vector<1x2xf32>
    %c0_11 = arith.constant 0 : index
    %c0_12 = arith.constant 0 : index
    %6 = vector.load %arg8[%c0_11, %c0_12] : memref<8x16xf32, #tpu.memory_space<vmem>>, vector<8x16xf32>
    %c0_13 = arith.constant 0 : index
    %c0_14 = arith.constant 0 : index
    %7 = vector.load %arg9[%c0_13, %c0_14] : memref<2x16xf32, #tpu.memory_space<vmem>>, vector<2x16xf32>
    %c0_15 = arith.constant 0 : index
    %c0_16 = arith.constant 0 : index
    %8 = vector.load %arg10[%c0_15, %c0_16] : memref<1x16xf32, #tpu.memory_space<vmem>>, vector<1x16xf32>
    %c0_17 = arith.constant 0 : index
    %c0_18 = arith.constant 0 : index
    %9 = vector.load %arg11[%c0_17, %c0_18] : memref<2x2xf32, #tpu.memory_space<vmem>>, vector<2x2xf32>
    %c0_19 = arith.constant 0 : index
    %c0_20 = arith.constant 0 : index
    %10 = vector.load %arg0[%c0_19, %c0_20] : memref<16x15xf32, #tpu.memory_space<vmem>>, vector<16x15xf32>
    %11 = vector.extract_strided_slice %10 {offsets = [0, 0], sizes = [16, 6], strides = [1, 1]} : vector<16x15xf32> to vector<16x6xf32>
    %12 = vector.extract_strided_slice %10 {offsets = [0, 6], sizes = [16, 3], strides = [1, 1]} : vector<16x15xf32> to vector<16x3xf32>
    %13 = vector.extract_strided_slice %10 {offsets = [0, 9], sizes = [16, 3], strides = [1, 1]} : vector<16x15xf32> to vector<16x3xf32>
    %14 = vector.extract_strided_slice %10 {offsets = [0, 12], sizes = [16, 3], strides = [1, 1]} : vector<16x15xf32> to vector<16x3xf32>
    %15 = tpu.concatenate %12, %13, %14 in 0 : vector<16x3xf32>, vector<16x3xf32>, vector<16x3xf32> -> vector<48x3xf32>
    %cst = arith.constant dense<0.000000e+00> : vector<48x4xf32>
    %16 = tpu.matmul %15, %0, %cst {dimension_numbers = #tpu.dot_dimension_numbers<[1], [0], [0], [1], [0, 0, 1, 1], [], []>} : vector<48x3xf32>, vector<3x4xf32>, vector<48x4xf32> -> vector<48x4xf32>
    %17 = vector.extract_strided_slice %16 {offsets = [0, 0], sizes = [16, 4], strides = [1, 1]} : vector<48x4xf32> to vector<16x4xf32>
    %18 = vector.extract_strided_slice %16 {offsets = [16, 0], sizes = [16, 4], strides = [1, 1]} : vector<48x4xf32> to vector<16x4xf32>
    %19 = vector.extract_strided_slice %16 {offsets = [32, 0], sizes = [16, 4], strides = [1, 1]} : vector<48x4xf32> to vector<16x4xf32>
    %20 = arith.mulf %17, %17 : vector<16x4xf32>
    %21 = arith.mulf %18, %18 : vector<16x4xf32>
    %22 = arith.addf %20, %21 : vector<16x4xf32>
    %23 = arith.mulf %19, %19 : vector<16x4xf32>
    %24 = arith.addf %22, %23 : vector<16x4xf32>
    %cst_21 = arith.constant 9.99999993E-9 : f32
    %25 = vector.broadcast %cst_21 : f32 to vector<16x4xf32>
    %26 = arith.maximumf %24, %25 : vector<16x4xf32>
    %27 = math.sqrt %26 : vector<16x4xf32>
    %cst_22 = arith.constant dense<0.000000e+00> : vector<16x16xf32>
    %28 = tpu.matmul %11, %1, %cst_22 {dimension_numbers = #tpu.dot_dimension_numbers<[1], [0], [0], [1], [0, 0, 1, 1], [], []>} : vector<16x6xf32>, vector<6x16xf32>, vector<16x16xf32> -> vector<16x16xf32>
    %cst_23 = arith.constant dense<0.000000e+00> : vector<16x16xf32>
    %29 = tpu.matmul %27, %2, %cst_23 {dimension_numbers = #tpu.dot_dimension_numbers<[1], [0], [0], [1], [0, 0, 1, 1], [], []>} : vector<16x4xf32>, vector<4x16xf32>, vector<16x16xf32> -> vector<16x16xf32>
    %30 = arith.addf %28, %29 : vector<16x16xf32>
    %31 = vector.broadcast %3 : vector<1x16xf32> to vector<16x16xf32>
    %32 = arith.addf %30, %31 : vector<16x16xf32>
    %cst_24 = arith.constant dense<0.000000e+00> : vector<48x4xf32>
    %33 = tpu.matmul %16, %4, %cst_24 {dimension_numbers = #tpu.dot_dimension_numbers<[1], [0], [0], [1], [0, 0, 1, 1], [], []>} : vector<48x4xf32>, vector<4x4xf32>, vector<48x4xf32> -> vector<48x4xf32>
    %34 = vector.extract_strided_slice %33 {offsets = [0, 0], sizes = [16, 4], strides = [1, 1]} : vector<48x4xf32> to vector<16x4xf32>
    %35 = vector.extract_strided_slice %33 {offsets = [16, 0], sizes = [16, 4], strides = [1, 1]} : vector<48x4xf32> to vector<16x4xf32>
    %36 = vector.extract_strided_slice %33 {offsets = [32, 0], sizes = [16, 4], strides = [1, 1]} : vector<48x4xf32> to vector<16x4xf32>
    %37 = tpu.concatenate %32, %34, %35, %36 in 1 : vector<16x16xf32>, vector<16x4xf32>, vector<16x4xf32>, vector<16x4xf32> -> vector<16x28xf32>
    %c0_25 = arith.constant 0 : index
    %c0_26 = arith.constant 0 : index
    %38 = vector.load %arg12[%c0_25, %c0_26] : memref<16x28xf32, #tpu.memory_space<vmem>>, vector<16x28xf32>
    tpu.vector_store %arg12[%c0_25, %c0_26], %37 {strides = array<i32>} : memref<16x28xf32, #tpu.memory_space<vmem>>, vector<16x28xf32>,
    %c0_27 = arith.constant 0 : index
    %c0_28 = arith.constant 0 : index
    %39 = vector.load %arg1[%c0_27, %c0_28] : memref<40x11xf32, #tpu.memory_space<vmem>>, vector<40x11xf32>
    %40 = vector.extract_strided_slice %39 {offsets = [0, 0], sizes = [40, 8], strides = [1, 1]} : vector<40x11xf32> to vector<40x8xf32>
    %41 = vector.extract_strided_slice %39 {offsets = [0, 8], sizes = [40, 1], strides = [1, 1]} : vector<40x11xf32> to vector<40x1xf32>
    %42 = vector.extract_strided_slice %39 {offsets = [0, 9], sizes = [40, 1], strides = [1, 1]} : vector<40x11xf32> to vector<40x1xf32>
    %43 = vector.extract_strided_slice %39 {offsets = [0, 10], sizes = [40, 1], strides = [1, 1]} : vector<40x11xf32> to vector<40x1xf32>
    %44 = tpu.concatenate %41, %42, %43 in 0 : vector<40x1xf32>, vector<40x1xf32>, vector<40x1xf32> -> vector<120x1xf32>
    %cst_29 = arith.constant dense<0.000000e+00> : vector<120x2xf32>
    %45 = tpu.matmul %44, %5, %cst_29 {dimension_numbers = #tpu.dot_dimension_numbers<[1], [0], [0], [1], [0, 0, 1, 1], [], []>} : vector<120x1xf32>, vector<1x2xf32>, vector<120x2xf32> -> vector<120x2xf32>
    %46 = vector.extract_strided_slice %45 {offsets = [0, 0], sizes = [40, 2], strides = [1, 1]} : vector<120x2xf32> to vector<40x2xf32>
    %47 = vector.extract_strided_slice %45 {offsets = [40, 0], sizes = [40, 2], strides = [1, 1]} : vector<120x2xf32> to vector<40x2xf32>
    %48 = vector.extract_strided_slice %45 {offsets = [80, 0], sizes = [40, 2], strides = [1, 1]} : vector<120x2xf32> to vector<40x2xf32>
    %49 = arith.mulf %46, %46 : vector<40x2xf32>
    %50 = arith.mulf %47, %47 : vector<40x2xf32>
    %51 = arith.addf %49, %50 : vector<40x2xf32>
    %52 = arith.mulf %48, %48 : vector<40x2xf32>
    %53 = arith.addf %51, %52 : vector<40x2xf32>
    %cst_30 = arith.constant 9.99999993E-9 : f32
    %54 = vector.broadcast %cst_30 : f32 to vector<40x2xf32>
    %55 = arith.maximumf %53, %54 : vector<40x2xf32>
    %56 = math.sqrt %55 : vector<40x2xf32>
    %cst_31 = arith.constant dense<0.000000e+00> : vector<40x16xf32>
    %57 = tpu.matmul %40, %6, %cst_31 {dimension_numbers = #tpu.dot_dimension_numbers<[1], [0], [0], [1], [0, 0, 1, 1], [], []>} : vector<40x8xf32>, vector<8x16xf32>, vector<40x16xf32> -> vector<40x16xf32>
    %cst_32 = arith.constant dense<0.000000e+00> : vector<40x16xf32>
    %58 = tpu.matmul %56, %7, %cst_32 {dimension_numbers = #tpu.dot_dimension_numbers<[1], [0], [0], [1], [0, 0, 1, 1], [], []>} : vector<40x2xf32>, vector<2x16xf32>, vector<40x16xf32> -> vector<40x16xf32>
    %59 = arith.addf %57, %58 : vector<40x16xf32>
    %60 = vector.broadcast %8 : vector<1x16xf32> to vector<40x16xf32>
    %61 = arith.addf %59, %60 : vector<40x16xf32>
    %cst_33 = arith.constant dense<0.000000e+00> : vector<120x2xf32>
    %62 = tpu.matmul %45, %9, %cst_33 {dimension_numbers = #tpu.dot_dimension_numbers<[1], [0], [0], [1], [0, 0, 1, 1], [], []>} : vector<120x2xf32>, vector<2x2xf32>, vector<120x2xf32> -> vector<120x2xf32>
    %63 = vector.extract_strided_slice %62 {offsets = [0, 0], sizes = [40, 2], strides = [1, 1]} : vector<120x2xf32> to vector<40x2xf32>
    %64 = vector.extract_strided_slice %62 {offsets = [40, 0], sizes = [40, 2], strides = [1, 1]} : vector<120x2xf32> to vector<40x2xf32>
    %65 = vector.extract_strided_slice %62 {offsets = [80, 0], sizes = [40, 2], strides = [1, 1]} : vector<120x2xf32> to vector<40x2xf32>
    %66 = tpu.concatenate %61, %63, %64, %65 in 1 : vector<40x16xf32>, vector<40x2xf32>, vector<40x2xf32>, vector<40x2xf32> -> vector<40x22xf32>
    %c0_34 = arith.constant 0 : index
    %c0_35 = arith.constant 0 : index
    %67 = vector.load %arg13[%c0_34, %c0_35] : memref<40x22xf32, #tpu.memory_space<vmem>>, vector<40x22xf32>
    tpu.vector_store %arg13[%c0_34, %c0_35], %66 {strides = array<i32>} : memref<40x22xf32, #tpu.memory_space<vmem>>, vector<40x22xf32>,
    return
  }
}

module attributes {stable_mosaic.version = 11 : i64} {
  func.func @kernel(%arg0: memref<16x28xf32, #tpu.memory_space<vmem>>, %arg1: memref<40x22xf32, #tpu.memory_space<vmem>>, %arg2: memref<40x16xf32, #tpu.memory_space<vmem>>, %arg3: memref<40x16xf32, #tpu.memory_space<vmem>>, %arg4: memref<16x40xf32, #tpu.memory_space<vmem>>, %arg5: memref<10x10xf32, #tpu.memory_space<vmem>>, %arg6: memref<48x16xf32, #tpu.memory_space<vmem>>, %arg7: memref<10x16xf32, #tpu.memory_space<vmem>>, %arg8: memref<1x16xf32, #tpu.memory_space<vmem>>, %arg9: memref<10x4xf32, #tpu.memory_space<vmem>>, %arg10: memref<16x4xf32, #tpu.memory_space<vmem>>, %arg11: memref<1x4xf32, #tpu.memory_space<vmem>>, %arg12: memref<4x4xf32, #tpu.memory_space<vmem>>, %arg13: memref<16x16xf32, #tpu.memory_space<vmem>>, %arg14: memref<4x16xf32, #tpu.memory_space<vmem>>, %arg15: memref<1x16xf32, #tpu.memory_space<vmem>>, %arg16: memref<4x4xf32, #tpu.memory_space<vmem>>, %arg17: memref<16x4xf32, #tpu.memory_space<vmem>>, %arg18: memref<1x4xf32, #tpu.memory_space<vmem>>, %arg19: memref<4x4xf32, #tpu.memory_space<vmem>>, %arg20: memref<16x16xf32, #tpu.memory_space<vmem>>, %arg21: memref<4x16xf32, #tpu.memory_space<vmem>>, %arg22: memref<1x16xf32, #tpu.memory_space<vmem>>, %arg23: memref<4x4xf32, #tpu.memory_space<vmem>>, %arg24: memref<16x4xf32, #tpu.memory_space<vmem>>, %arg25: memref<1x4xf32, #tpu.memory_space<vmem>>, %arg26: memref<4x8xf32, #tpu.memory_space<vmem>>, %arg27: memref<16x64xf32, #tpu.memory_space<vmem>>, %arg28: memref<8x64xf32, #tpu.memory_space<vmem>>, %arg29: memref<1x64xf32, #tpu.memory_space<vmem>>, %arg30: memref<8x8xf32, #tpu.memory_space<vmem>>, %arg31: memref<64x8xf32, #tpu.memory_space<vmem>>, %arg32: memref<1x8xf32, #tpu.memory_space<vmem>>, %arg33: memref<8x8xf32, #tpu.memory_space<vmem>>, %arg34: memref<64x16xf32, #tpu.memory_space<vmem>>, %arg35: memref<8x16xf32, #tpu.memory_space<vmem>>, %arg36: memref<1x16xf32, #tpu.memory_space<vmem>>, %arg37: memref<8x4xf32, #tpu.memory_space<vmem>>, %arg38: memref<16x4xf32, #tpu.memory_space<vmem>>, %arg39: memref<1x4xf32, #tpu.memory_space<vmem>>, %arg40: memref<1x16xf32, #tpu.memory_space<vmem>>, %arg41: memref<1x16xf32, #tpu.memory_space<vmem>>, %arg42: memref<1x16xf32, #tpu.memory_space<vmem>>, %arg43: memref<1x16xf32, #tpu.memory_space<vmem>>, %arg44: memref<16x28xf32, #tpu.memory_space<vmem>>) attributes {dimension_semantics = [], scalar_prefetch = 0 : i64, scratch_operands = 0 : i64, tpu.core_type = #tpu.core_type<tc>} {
    %c0 = arith.constant 0 : index
    %c0_0 = arith.constant 0 : index
    %0 = vector.load %arg5[%c0, %c0_0] : memref<10x10xf32, #tpu.memory_space<vmem>>, vector<10x10xf32>
    %c0_1 = arith.constant 0 : index
    %c0_2 = arith.constant 0 : index
    %1 = vector.load %arg6[%c0_1, %c0_2] : memref<48x16xf32, #tpu.memory_space<vmem>>, vector<48x16xf32>
    %c0_3 = arith.constant 0 : index
    %c0_4 = arith.constant 0 : index
    %2 = vector.load %arg7[%c0_3, %c0_4] : memref<10x16xf32, #tpu.memory_space<vmem>>, vector<10x16xf32>
    %c0_5 = arith.constant 0 : index
    %c0_6 = arith.constant 0 : index
    %3 = vector.load %arg8[%c0_5, %c0_6] : memref<1x16xf32, #tpu.memory_space<vmem>>, vector<1x16xf32>
    %c0_7 = arith.constant 0 : index
    %c0_8 = arith.constant 0 : index
    %4 = vector.load %arg9[%c0_7, %c0_8] : memref<10x4xf32, #tpu.memory_space<vmem>>, vector<10x4xf32>
    %c0_9 = arith.constant 0 : index
    %c0_10 = arith.constant 0 : index
    %5 = vector.load %arg10[%c0_9, %c0_10] : memref<16x4xf32, #tpu.memory_space<vmem>>, vector<16x4xf32>
    %c0_11 = arith.constant 0 : index
    %c0_12 = arith.constant 0 : index
    %6 = vector.load %arg11[%c0_11, %c0_12] : memref<1x4xf32, #tpu.memory_space<vmem>>, vector<1x4xf32>
    %c0_13 = arith.constant 0 : index
    %c0_14 = arith.constant 0 : index
    %7 = vector.load %arg12[%c0_13, %c0_14] : memref<4x4xf32, #tpu.memory_space<vmem>>, vector<4x4xf32>
    %c0_15 = arith.constant 0 : index
    %c0_16 = arith.constant 0 : index
    %8 = vector.load %arg13[%c0_15, %c0_16] : memref<16x16xf32, #tpu.memory_space<vmem>>, vector<16x16xf32>
    %c0_17 = arith.constant 0 : index
    %c0_18 = arith.constant 0 : index
    %9 = vector.load %arg14[%c0_17, %c0_18] : memref<4x16xf32, #tpu.memory_space<vmem>>, vector<4x16xf32>
    %c0_19 = arith.constant 0 : index
    %c0_20 = arith.constant 0 : index
    %10 = vector.load %arg15[%c0_19, %c0_20] : memref<1x16xf32, #tpu.memory_space<vmem>>, vector<1x16xf32>
    %c0_21 = arith.constant 0 : index
    %c0_22 = arith.constant 0 : index
    %11 = vector.load %arg16[%c0_21, %c0_22] : memref<4x4xf32, #tpu.memory_space<vmem>>, vector<4x4xf32>
    %c0_23 = arith.constant 0 : index
    %c0_24 = arith.constant 0 : index
    %12 = vector.load %arg17[%c0_23, %c0_24] : memref<16x4xf32, #tpu.memory_space<vmem>>, vector<16x4xf32>
    %c0_25 = arith.constant 0 : index
    %c0_26 = arith.constant 0 : index
    %13 = vector.load %arg18[%c0_25, %c0_26] : memref<1x4xf32, #tpu.memory_space<vmem>>, vector<1x4xf32>
    %c0_27 = arith.constant 0 : index
    %c0_28 = arith.constant 0 : index
    %14 = vector.load %arg19[%c0_27, %c0_28] : memref<4x4xf32, #tpu.memory_space<vmem>>, vector<4x4xf32>
    %c0_29 = arith.constant 0 : index
    %c0_30 = arith.constant 0 : index
    %15 = vector.load %arg20[%c0_29, %c0_30] : memref<16x16xf32, #tpu.memory_space<vmem>>, vector<16x16xf32>
    %c0_31 = arith.constant 0 : index
    %c0_32 = arith.constant 0 : index
    %16 = vector.load %arg21[%c0_31, %c0_32] : memref<4x16xf32, #tpu.memory_space<vmem>>, vector<4x16xf32>
    %c0_33 = arith.constant 0 : index
    %c0_34 = arith.constant 0 : index
    %17 = vector.load %arg22[%c0_33, %c0_34] : memref<1x16xf32, #tpu.memory_space<vmem>>, vector<1x16xf32>
    %c0_35 = arith.constant 0 : index
    %c0_36 = arith.constant 0 : index
    %18 = vector.load %arg23[%c0_35, %c0_36] : memref<4x4xf32, #tpu.memory_space<vmem>>, vector<4x4xf32>
    %c0_37 = arith.constant 0 : index
    %c0_38 = arith.constant 0 : index
    %19 = vector.load %arg24[%c0_37, %c0_38] : memref<16x4xf32, #tpu.memory_space<vmem>>, vector<16x4xf32>
    %c0_39 = arith.constant 0 : index
    %c0_40 = arith.constant 0 : index
    %20 = vector.load %arg25[%c0_39, %c0_40] : memref<1x4xf32, #tpu.memory_space<vmem>>, vector<1x4xf32>
    %c0_41 = arith.constant 0 : index
    %c0_42 = arith.constant 0 : index
    %21 = vector.load %arg26[%c0_41, %c0_42] : memref<4x8xf32, #tpu.memory_space<vmem>>, vector<4x8xf32>
    %c0_43 = arith.constant 0 : index
    %c0_44 = arith.constant 0 : index
    %22 = vector.load %arg27[%c0_43, %c0_44] : memref<16x64xf32, #tpu.memory_space<vmem>>, vector<16x64xf32>
    %c0_45 = arith.constant 0 : index
    %c0_46 = arith.constant 0 : index
    %23 = vector.load %arg28[%c0_45, %c0_46] : memref<8x64xf32, #tpu.memory_space<vmem>>, vector<8x64xf32>
    %c0_47 = arith.constant 0 : index
    %c0_48 = arith.constant 0 : index
    %24 = vector.load %arg29[%c0_47, %c0_48] : memref<1x64xf32, #tpu.memory_space<vmem>>, vector<1x64xf32>
    %c0_49 = arith.constant 0 : index
    %c0_50 = arith.constant 0 : index
    %25 = vector.load %arg30[%c0_49, %c0_50] : memref<8x8xf32, #tpu.memory_space<vmem>>, vector<8x8xf32>
    %c0_51 = arith.constant 0 : index
    %c0_52 = arith.constant 0 : index
    %26 = vector.load %arg31[%c0_51, %c0_52] : memref<64x8xf32, #tpu.memory_space<vmem>>, vector<64x8xf32>
    %c0_53 = arith.constant 0 : index
    %c0_54 = arith.constant 0 : index
    %27 = vector.load %arg32[%c0_53, %c0_54] : memref<1x8xf32, #tpu.memory_space<vmem>>, vector<1x8xf32>
    %c0_55 = arith.constant 0 : index
    %c0_56 = arith.constant 0 : index
    %28 = vector.load %arg33[%c0_55, %c0_56] : memref<8x8xf32, #tpu.memory_space<vmem>>, vector<8x8xf32>
    %c0_57 = arith.constant 0 : index
    %c0_58 = arith.constant 0 : index
    %29 = vector.load %arg34[%c0_57, %c0_58] : memref<64x16xf32, #tpu.memory_space<vmem>>, vector<64x16xf32>
    %c0_59 = arith.constant 0 : index
    %c0_60 = arith.constant 0 : index
    %30 = vector.load %arg35[%c0_59, %c0_60] : memref<8x16xf32, #tpu.memory_space<vmem>>, vector<8x16xf32>
    %c0_61 = arith.constant 0 : index
    %c0_62 = arith.constant 0 : index
    %31 = vector.load %arg36[%c0_61, %c0_62] : memref<1x16xf32, #tpu.memory_space<vmem>>, vector<1x16xf32>
    %c0_63 = arith.constant 0 : index
    %c0_64 = arith.constant 0 : index
    %32 = vector.load %arg37[%c0_63, %c0_64] : memref<8x4xf32, #tpu.memory_space<vmem>>, vector<8x4xf32>
    %c0_65 = arith.constant 0 : index
    %c0_66 = arith.constant 0 : index
    %33 = vector.load %arg38[%c0_65, %c0_66] : memref<16x4xf32, #tpu.memory_space<vmem>>, vector<16x4xf32>
    %c0_67 = arith.constant 0 : index
    %c0_68 = arith.constant 0 : index
    %34 = vector.load %arg39[%c0_67, %c0_68] : memref<1x4xf32, #tpu.memory_space<vmem>>, vector<1x4xf32>
    %c0_69 = arith.constant 0 : index
    %c0_70 = arith.constant 0 : index
    %35 = vector.load %arg40[%c0_69, %c0_70] : memref<1x16xf32, #tpu.memory_space<vmem>>, vector<1x16xf32>
    %c0_71 = arith.constant 0 : index
    %c0_72 = arith.constant 0 : index
    %36 = vector.load %arg41[%c0_71, %c0_72] : memref<1x16xf32, #tpu.memory_space<vmem>>, vector<1x16xf32>
    %c0_73 = arith.constant 0 : index
    %c0_74 = arith.constant 0 : index
    %37 = vector.load %arg42[%c0_73, %c0_74] : memref<1x16xf32, #tpu.memory_space<vmem>>, vector<1x16xf32>
    %c0_75 = arith.constant 0 : index
    %c0_76 = arith.constant 0 : index
    %38 = vector.load %arg43[%c0_75, %c0_76] : memref<1x16xf32, #tpu.memory_space<vmem>>, vector<1x16xf32>
    %c0_77 = arith.constant 0 : index
    %c0_78 = arith.constant 0 : index
    %39 = vector.load %arg0[%c0_77, %c0_78] : memref<16x28xf32, #tpu.memory_space<vmem>>, vector<16x28xf32>
    %c0_79 = arith.constant 0 : index
    %c0_80 = arith.constant 0 : index
    %40 = vector.load %arg1[%c0_79, %c0_80] : memref<40x22xf32, #tpu.memory_space<vmem>>, vector<40x22xf32>
    %c0_81 = arith.constant 0 : index
    %c0_82 = arith.constant 0 : index
    %41 = vector.load %arg2[%c0_81, %c0_82] : memref<40x16xf32, #tpu.memory_space<vmem>>, vector<40x16xf32>
    %cst = arith.constant dense<0.000000e+00> : vector<40x28xf32>
    %42 = tpu.matmul %41, %39, %cst {dimension_numbers = #tpu.dot_dimension_numbers<[1], [0], [0], [1], [0, 0, 1, 1], [], []>} : vector<40x16xf32>, vector<16x28xf32>, vector<40x28xf32> -> vector<40x28xf32>
    %c0_83 = arith.constant 0 : index
    %c0_84 = arith.constant 0 : index
    %43 = vector.load %arg3[%c0_83, %c0_84] : memref<40x16xf32, #tpu.memory_space<vmem>>, vector<40x16xf32>
    %cst_85 = arith.constant dense<0.000000e+00> : vector<40x28xf32>
    %44 = tpu.matmul %43, %39, %cst_85 {dimension_numbers = #tpu.dot_dimension_numbers<[1], [0], [0], [1], [0, 0, 1, 1], [], []>} : vector<40x16xf32>, vector<16x28xf32>, vector<40x28xf32> -> vector<40x28xf32>
    %45 = vector.extract_strided_slice %42 {offsets = [0, 0], sizes = [40, 16], strides = [1, 1]} : vector<40x28xf32> to vector<40x16xf32>
    %46 = vector.extract_strided_slice %42 {offsets = [0, 16], sizes = [40, 4], strides = [1, 1]} : vector<40x28xf32> to vector<40x4xf32>
    %47 = vector.extract_strided_slice %42 {offsets = [0, 20], sizes = [40, 4], strides = [1, 1]} : vector<40x28xf32> to vector<40x4xf32>
    %48 = vector.extract_strided_slice %42 {offsets = [0, 24], sizes = [40, 4], strides = [1, 1]} : vector<40x28xf32> to vector<40x4xf32>
    %49 = vector.extract_strided_slice %44 {offsets = [0, 0], sizes = [40, 16], strides = [1, 1]} : vector<40x28xf32> to vector<40x16xf32>
    %50 = vector.extract_strided_slice %44 {offsets = [0, 16], sizes = [40, 4], strides = [1, 1]} : vector<40x28xf32> to vector<40x4xf32>
    %51 = vector.extract_strided_slice %44 {offsets = [0, 20], sizes = [40, 4], strides = [1, 1]} : vector<40x28xf32> to vector<40x4xf32>
    %52 = vector.extract_strided_slice %44 {offsets = [0, 24], sizes = [40, 4], strides = [1, 1]} : vector<40x28xf32> to vector<40x4xf32>
    %53 = vector.extract_strided_slice %40 {offsets = [0, 0], sizes = [40, 16], strides = [1, 1]} : vector<40x22xf32> to vector<40x16xf32>
    %54 = vector.extract_strided_slice %40 {offsets = [0, 16], sizes = [40, 2], strides = [1, 1]} : vector<40x22xf32> to vector<40x2xf32>
    %55 = vector.extract_strided_slice %40 {offsets = [0, 18], sizes = [40, 2], strides = [1, 1]} : vector<40x22xf32> to vector<40x2xf32>
    %56 = vector.extract_strided_slice %40 {offsets = [0, 20], sizes = [40, 2], strides = [1, 1]} : vector<40x22xf32> to vector<40x2xf32>
    %57 = tpu.concatenate %45, %53, %49 in 1 : vector<40x16xf32>, vector<40x16xf32>, vector<40x16xf32> -> vector<40x48xf32>
    %58 = tpu.concatenate %46, %54, %50 in 1 : vector<40x4xf32>, vector<40x2xf32>, vector<40x4xf32> -> vector<40x10xf32>
    %59 = tpu.concatenate %47, %55, %51 in 1 : vector<40x4xf32>, vector<40x2xf32>, vector<40x4xf32> -> vector<40x10xf32>
    %60 = tpu.concatenate %48, %56, %52 in 1 : vector<40x4xf32>, vector<40x2xf32>, vector<40x4xf32> -> vector<40x10xf32>
    %61 = tpu.concatenate %58, %59, %60 in 0 : vector<40x10xf32>, vector<40x10xf32>, vector<40x10xf32> -> vector<120x10xf32>
    %cst_86 = arith.constant dense<0.000000e+00> : vector<120x10xf32>
    %62 = tpu.matmul %61, %0, %cst_86 {dimension_numbers = #tpu.dot_dimension_numbers<[1], [0], [0], [1], [0, 0, 1, 1], [], []>} : vector<120x10xf32>, vector<10x10xf32>, vector<120x10xf32> -> vector<120x10xf32>
    %63 = vector.extract_strided_slice %62 {offsets = [0, 0], sizes = [40, 10], strides = [1, 1]} : vector<120x10xf32> to vector<40x10xf32>
    %64 = vector.extract_strided_slice %62 {offsets = [40, 0], sizes = [40, 10], strides = [1, 1]} : vector<120x10xf32> to vector<40x10xf32>
    %65 = vector.extract_strided_slice %62 {offsets = [80, 0], sizes = [40, 10], strides = [1, 1]} : vector<120x10xf32> to vector<40x10xf32>
    %66 = arith.mulf %63, %63 : vector<40x10xf32>
    %67 = arith.mulf %64, %64 : vector<40x10xf32>
    %68 = arith.addf %66, %67 : vector<40x10xf32>
    %69 = arith.mulf %65, %65 : vector<40x10xf32>
    %70 = arith.addf %68, %69 : vector<40x10xf32>
    %cst_87 = arith.constant 9.99999993E-9 : f32
    %71 = vector.broadcast %cst_87 : f32 to vector<40x10xf32>
    %72 = arith.maximumf %70, %71 : vector<40x10xf32>
    %73 = math.sqrt %72 : vector<40x10xf32>
    %cst_88 = arith.constant dense<0.000000e+00> : vector<40x16xf32>
    %74 = tpu.matmul %57, %1, %cst_88 {dimension_numbers = #tpu.dot_dimension_numbers<[1], [0], [0], [1], [0, 0, 1, 1], [], []>} : vector<40x48xf32>, vector<48x16xf32>, vector<40x16xf32> -> vector<40x16xf32>
    %cst_89 = arith.constant dense<0.000000e+00> : vector<40x16xf32>
    %75 = tpu.matmul %73, %2, %cst_89 {dimension_numbers = #tpu.dot_dimension_numbers<[1], [0], [0], [1], [0, 0, 1, 1], [], []>} : vector<40x10xf32>, vector<10x16xf32>, vector<40x16xf32> -> vector<40x16xf32>
    %76 = arith.addf %74, %75 : vector<40x16xf32>
    %77 = vector.broadcast %3 : vector<1x16xf32> to vector<40x16xf32>
    %78 = arith.addf %76, %77 : vector<40x16xf32>
    %cst_90 = arith.constant dense<0.000000e+00> : vector<120x4xf32>
    %79 = tpu.matmul %62, %4, %cst_90 {dimension_numbers = #tpu.dot_dimension_numbers<[1], [0], [0], [1], [0, 0, 1, 1], [], []>} : vector<120x10xf32>, vector<10x4xf32>, vector<120x4xf32> -> vector<120x4xf32>
    %80 = vector.extract_strided_slice %79 {offsets = [0, 0], sizes = [40, 4], strides = [1, 1]} : vector<120x4xf32> to vector<40x4xf32>
    %81 = vector.extract_strided_slice %79 {offsets = [40, 0], sizes = [40, 4], strides = [1, 1]} : vector<120x4xf32> to vector<40x4xf32>
    %82 = vector.extract_strided_slice %79 {offsets = [80, 0], sizes = [40, 4], strides = [1, 1]} : vector<120x4xf32> to vector<40x4xf32>
    %cst_91 = arith.constant 0.000000e+00 : f32
    %83 = vector.broadcast %cst_91 : f32 to vector<40x16xf32>
    %84 = arith.subf %83, %78 : vector<40x16xf32>
    %85 = math.exp %84 : vector<40x16xf32>
    %cst_92 = arith.constant 1.000000e+00 : f32
    %86 = vector.broadcast %cst_92 : f32 to vector<40x16xf32>
    %87 = arith.addf %86, %85 : vector<40x16xf32>
    %88 = tpu.reciprocal %87 {approx = true} : vector<40x16xf32> -> vector<40x16xf32>
    %cst_93 = arith.constant dense<0.000000e+00> : vector<40x4xf32>
    %89 = tpu.matmul %88, %5, %cst_93 {dimension_numbers = #tpu.dot_dimension_numbers<[1], [0], [0], [1], [0, 0, 1, 1], [], []>} : vector<40x16xf32>, vector<16x4xf32>, vector<40x4xf32> -> vector<40x4xf32>
    %90 = vector.broadcast %6 : vector<1x4xf32> to vector<40x4xf32>
    %91 = arith.addf %89, %90 : vector<40x4xf32>
    %cst_94 = arith.constant 0.000000e+00 : f32
    %92 = vector.broadcast %cst_94 : f32 to vector<40x4xf32>
    %93 = arith.subf %92, %91 : vector<40x4xf32>
    %94 = math.exp %93 : vector<40x4xf32>
    %cst_95 = arith.constant 1.000000e+00 : f32
    %95 = vector.broadcast %cst_95 : f32 to vector<40x4xf32>
    %96 = arith.addf %95, %94 : vector<40x4xf32>
    %97 = tpu.reciprocal %96 {approx = true} : vector<40x4xf32> -> vector<40x4xf32>
    %98 = arith.mulf %80, %97 : vector<40x4xf32>
    %99 = arith.mulf %81, %97 : vector<40x4xf32>
    %100 = arith.mulf %82, %97 : vector<40x4xf32>
    %cst_96 = arith.constant 0.000000e+00 : f32
    %101 = vector.broadcast %cst_96 : f32 to vector<40x16xf32>
    %102 = arith.maximumf %78, %101 : vector<40x16xf32>
    %103 = tpu.concatenate %98, %99, %100 in 0 : vector<40x4xf32>, vector<40x4xf32>, vector<40x4xf32> -> vector<120x4xf32>
    %cst_97 = arith.constant dense<0.000000e+00> : vector<120x4xf32>
    %104 = tpu.matmul %103, %7, %cst_97 {dimension_numbers = #tpu.dot_dimension_numbers<[1], [0], [0], [1], [0, 0, 1, 1], [], []>} : vector<120x4xf32>, vector<4x4xf32>, vector<120x4xf32> -> vector<120x4xf32>
    %105 = vector.extract_strided_slice %104 {offsets = [0, 0], sizes = [40, 4], strides = [1, 1]} : vector<120x4xf32> to vector<40x4xf32>
    %106 = vector.extract_strided_slice %104 {offsets = [40, 0], sizes = [40, 4], strides = [1, 1]} : vector<120x4xf32> to vector<40x4xf32>
    %107 = vector.extract_strided_slice %104 {offsets = [80, 0], sizes = [40, 4], strides = [1, 1]} : vector<120x4xf32> to vector<40x4xf32>
    %108 = arith.mulf %105, %105 : vector<40x4xf32>
    %109 = arith.mulf %106, %106 : vector<40x4xf32>
    %110 = arith.addf %108, %109 : vector<40x4xf32>
    %111 = arith.mulf %107, %107 : vector<40x4xf32>
    %112 = arith.addf %110, %111 : vector<40x4xf32>
    %cst_98 = arith.constant 9.99999993E-9 : f32
    %113 = vector.broadcast %cst_98 : f32 to vector<40x4xf32>
    %114 = arith.maximumf %112, %113 : vector<40x4xf32>
    %115 = math.sqrt %114 : vector<40x4xf32>
    %cst_99 = arith.constant dense<0.000000e+00> : vector<40x16xf32>
    %116 = tpu.matmul %102, %8, %cst_99 {dimension_numbers = #tpu.dot_dimension_numbers<[1], [0], [0], [1], [0, 0, 1, 1], [], []>} : vector<40x16xf32>, vector<16x16xf32>, vector<40x16xf32> -> vector<40x16xf32>
    %cst_100 = arith.constant dense<0.000000e+00> : vector<40x16xf32>
    %117 = tpu.matmul %115, %9, %cst_100 {dimension_numbers = #tpu.dot_dimension_numbers<[1], [0], [0], [1], [0, 0, 1, 1], [], []>} : vector<40x4xf32>, vector<4x16xf32>, vector<40x16xf32> -> vector<40x16xf32>
    %118 = arith.addf %116, %117 : vector<40x16xf32>
    %119 = vector.broadcast %10 : vector<1x16xf32> to vector<40x16xf32>
    %120 = arith.addf %118, %119 : vector<40x16xf32>
    %cst_101 = arith.constant dense<0.000000e+00> : vector<120x4xf32>
    %121 = tpu.matmul %104, %11, %cst_101 {dimension_numbers = #tpu.dot_dimension_numbers<[1], [0], [0], [1], [0, 0, 1, 1], [], []>} : vector<120x4xf32>, vector<4x4xf32>, vector<120x4xf32> -> vector<120x4xf32>
    %122 = vector.extract_strided_slice %121 {offsets = [0, 0], sizes = [40, 4], strides = [1, 1]} : vector<120x4xf32> to vector<40x4xf32>
    %123 = vector.extract_strided_slice %121 {offsets = [40, 0], sizes = [40, 4], strides = [1, 1]} : vector<120x4xf32> to vector<40x4xf32>
    %124 = vector.extract_strided_slice %121 {offsets = [80, 0], sizes = [40, 4], strides = [1, 1]} : vector<120x4xf32> to vector<40x4xf32>
    %cst_102 = arith.constant 0.000000e+00 : f32
    %125 = vector.broadcast %cst_102 : f32 to vector<40x16xf32>
    %126 = arith.subf %125, %120 : vector<40x16xf32>
    %127 = math.exp %126 : vector<40x16xf32>
    %cst_103 = arith.constant 1.000000e+00 : f32
    %128 = vector.broadcast %cst_103 : f32 to vector<40x16xf32>
    %129 = arith.addf %128, %127 : vector<40x16xf32>
    %130 = tpu.reciprocal %129 {approx = true} : vector<40x16xf32> -> vector<40x16xf32>
    %cst_104 = arith.constant dense<0.000000e+00> : vector<40x4xf32>
    %131 = tpu.matmul %130, %12, %cst_104 {dimension_numbers = #tpu.dot_dimension_numbers<[1], [0], [0], [1], [0, 0, 1, 1], [], []>} : vector<40x16xf32>, vector<16x4xf32>, vector<40x4xf32> -> vector<40x4xf32>
    %132 = vector.broadcast %13 : vector<1x4xf32> to vector<40x4xf32>
    %133 = arith.addf %131, %132 : vector<40x4xf32>
    %cst_105 = arith.constant 0.000000e+00 : f32
    %134 = vector.broadcast %cst_105 : f32 to vector<40x4xf32>
    %135 = arith.subf %134, %133 : vector<40x4xf32>
    %136 = math.exp %135 : vector<40x4xf32>
    %cst_106 = arith.constant 1.000000e+00 : f32
    %137 = vector.broadcast %cst_106 : f32 to vector<40x4xf32>
    %138 = arith.addf %137, %136 : vector<40x4xf32>
    %139 = tpu.reciprocal %138 {approx = true} : vector<40x4xf32> -> vector<40x4xf32>
    %140 = arith.mulf %122, %139 : vector<40x4xf32>
    %141 = arith.mulf %123, %139 : vector<40x4xf32>
    %142 = arith.mulf %124, %139 : vector<40x4xf32>
    %cst_107 = arith.constant 0.000000e+00 : f32
    %143 = vector.broadcast %cst_107 : f32 to vector<40x16xf32>
    %144 = arith.maximumf %120, %143 : vector<40x16xf32>
    %145 = tpu.concatenate %140, %141, %142 in 0 : vector<40x4xf32>, vector<40x4xf32>, vector<40x4xf32> -> vector<120x4xf32>
    %cst_108 = arith.constant dense<0.000000e+00> : vector<120x4xf32>
    %146 = tpu.matmul %145, %14, %cst_108 {dimension_numbers = #tpu.dot_dimension_numbers<[1], [0], [0], [1], [0, 0, 1, 1], [], []>} : vector<120x4xf32>, vector<4x4xf32>, vector<120x4xf32> -> vector<120x4xf32>
    %147 = vector.extract_strided_slice %146 {offsets = [0, 0], sizes = [40, 4], strides = [1, 1]} : vector<120x4xf32> to vector<40x4xf32>
    %148 = vector.extract_strided_slice %146 {offsets = [40, 0], sizes = [40, 4], strides = [1, 1]} : vector<120x4xf32> to vector<40x4xf32>
    %149 = vector.extract_strided_slice %146 {offsets = [80, 0], sizes = [40, 4], strides = [1, 1]} : vector<120x4xf32> to vector<40x4xf32>
    %150 = arith.mulf %147, %147 : vector<40x4xf32>
    %151 = arith.mulf %148, %148 : vector<40x4xf32>
    %152 = arith.addf %150, %151 : vector<40x4xf32>
    %153 = arith.mulf %149, %149 : vector<40x4xf32>
    %154 = arith.addf %152, %153 : vector<40x4xf32>
    %cst_109 = arith.constant 9.99999993E-9 : f32
    %155 = vector.broadcast %cst_109 : f32 to vector<40x4xf32>
    %156 = arith.maximumf %154, %155 : vector<40x4xf32>
    %157 = math.sqrt %156 : vector<40x4xf32>
    %cst_110 = arith.constant dense<0.000000e+00> : vector<40x16xf32>
    %158 = tpu.matmul %144, %15, %cst_110 {dimension_numbers = #tpu.dot_dimension_numbers<[1], [0], [0], [1], [0, 0, 1, 1], [], []>} : vector<40x16xf32>, vector<16x16xf32>, vector<40x16xf32> -> vector<40x16xf32>
    %cst_111 = arith.constant dense<0.000000e+00> : vector<40x16xf32>
    %159 = tpu.matmul %157, %16, %cst_111 {dimension_numbers = #tpu.dot_dimension_numbers<[1], [0], [0], [1], [0, 0, 1, 1], [], []>} : vector<40x4xf32>, vector<4x16xf32>, vector<40x16xf32> -> vector<40x16xf32>
    %160 = arith.addf %158, %159 : vector<40x16xf32>
    %161 = vector.broadcast %17 : vector<1x16xf32> to vector<40x16xf32>
    %162 = arith.addf %160, %161 : vector<40x16xf32>
    %cst_112 = arith.constant dense<0.000000e+00> : vector<120x4xf32>
    %163 = tpu.matmul %146, %18, %cst_112 {dimension_numbers = #tpu.dot_dimension_numbers<[1], [0], [0], [1], [0, 0, 1, 1], [], []>} : vector<120x4xf32>, vector<4x4xf32>, vector<120x4xf32> -> vector<120x4xf32>
    %164 = vector.extract_strided_slice %163 {offsets = [0, 0], sizes = [40, 4], strides = [1, 1]} : vector<120x4xf32> to vector<40x4xf32>
    %165 = vector.extract_strided_slice %163 {offsets = [40, 0], sizes = [40, 4], strides = [1, 1]} : vector<120x4xf32> to vector<40x4xf32>
    %166 = vector.extract_strided_slice %163 {offsets = [80, 0], sizes = [40, 4], strides = [1, 1]} : vector<120x4xf32> to vector<40x4xf32>
    %cst_113 = arith.constant dense<0.000000e+00> : vector<40x4xf32>
    %167 = tpu.matmul %162, %19, %cst_113 {dimension_numbers = #tpu.dot_dimension_numbers<[1], [0], [0], [1], [0, 0, 1, 1], [], []>} : vector<40x16xf32>, vector<16x4xf32>, vector<40x4xf32> -> vector<40x4xf32>
    %168 = vector.broadcast %20 : vector<1x4xf32> to vector<40x4xf32>
    %169 = arith.addf %167, %168 : vector<40x4xf32>
    %cst_114 = arith.constant 0.000000e+00 : f32
    %170 = vector.broadcast %cst_114 : f32 to vector<40x4xf32>
    %171 = arith.subf %170, %169 : vector<40x4xf32>
    %172 = math.exp %171 : vector<40x4xf32>
    %cst_115 = arith.constant 1.000000e+00 : f32
    %173 = vector.broadcast %cst_115 : f32 to vector<40x4xf32>
    %174 = arith.addf %173, %172 : vector<40x4xf32>
    %175 = tpu.reciprocal %174 {approx = true} : vector<40x4xf32> -> vector<40x4xf32>
    %176 = arith.mulf %164, %175 : vector<40x4xf32>
    %177 = arith.mulf %165, %175 : vector<40x4xf32>
    %178 = arith.mulf %166, %175 : vector<40x4xf32>
    %c0_116 = arith.constant 0 : index
    %c0_117 = arith.constant 0 : index
    %179 = vector.load %arg4[%c0_116, %c0_117] : memref<16x40xf32, #tpu.memory_space<vmem>>, vector<16x40xf32>
    %180 = tpu.concatenate %162, %176, %177, %178 in 1 : vector<40x16xf32>, vector<40x4xf32>, vector<40x4xf32>, vector<40x4xf32> -> vector<40x28xf32>
    %cst_118 = arith.constant dense<0.000000e+00> : vector<16x28xf32>
    %181 = tpu.matmul %179, %180, %cst_118 {dimension_numbers = #tpu.dot_dimension_numbers<[1], [0], [0], [1], [0, 0, 1, 1], [], []>} : vector<16x40xf32>, vector<40x28xf32>, vector<16x28xf32> -> vector<16x28xf32>
    %182 = vector.extract_strided_slice %39 {offsets = [0, 0], sizes = [16, 16], strides = [1, 1]} : vector<16x28xf32> to vector<16x16xf32>
    %183 = vector.extract_strided_slice %39 {offsets = [0, 16], sizes = [16, 4], strides = [1, 1]} : vector<16x28xf32> to vector<16x4xf32>
    %184 = vector.extract_strided_slice %39 {offsets = [0, 20], sizes = [16, 4], strides = [1, 1]} : vector<16x28xf32> to vector<16x4xf32>
    %185 = vector.extract_strided_slice %39 {offsets = [0, 24], sizes = [16, 4], strides = [1, 1]} : vector<16x28xf32> to vector<16x4xf32>
    %186 = vector.extract_strided_slice %181 {offsets = [0, 0], sizes = [16, 16], strides = [1, 1]} : vector<16x28xf32> to vector<16x16xf32>
    %187 = vector.extract_strided_slice %181 {offsets = [0, 16], sizes = [16, 4], strides = [1, 1]} : vector<16x28xf32> to vector<16x4xf32>
    %188 = vector.extract_strided_slice %181 {offsets = [0, 20], sizes = [16, 4], strides = [1, 1]} : vector<16x28xf32> to vector<16x4xf32>
    %189 = vector.extract_strided_slice %181 {offsets = [0, 24], sizes = [16, 4], strides = [1, 1]} : vector<16x28xf32> to vector<16x4xf32>
    %190 = arith.addf %182, %186 : vector<16x16xf32>
    %191 = arith.addf %183, %187 : vector<16x4xf32>
    %192 = arith.addf %184, %188 : vector<16x4xf32>
    %193 = arith.addf %185, %189 : vector<16x4xf32>
    %cst_119 = arith.constant dense<0.000000e+00> : vector<16xf32>
    %194 = vector.multi_reduction <add>, %190, %cst_119 [1] : vector<16x16xf32> to vector<16xf32>
    %195 = vector.shape_cast %194 : vector<16xf32> to vector<16x1xf32>
    %cst_120 = arith.constant 1.600000e+01 : f32
    %196 = vector.broadcast %cst_120 : f32 to vector<16x1xf32>
    %197 = arith.divf %195, %196 : vector<16x1xf32>
    %198 = vector.broadcast %197 : vector<16x1xf32> to vector<16x16xf32>
    %199 = arith.subf %190, %198 : vector<16x16xf32>
    %200 = arith.mulf %199, %199 : vector<16x16xf32>
    %cst_121 = arith.constant dense<0.000000e+00> : vector<16xf32>
    %201 = vector.multi_reduction <add>, %200, %cst_121 [1] : vector<16x16xf32> to vector<16xf32>
    %202 = vector.shape_cast %201 : vector<16xf32> to vector<16x1xf32>
    %cst_122 = arith.constant 1.600000e+01 : f32
    %203 = vector.broadcast %cst_122 : f32 to vector<16x1xf32>
    %204 = arith.divf %202, %203 : vector<16x1xf32>
    %205 = vector.broadcast %197 : vector<16x1xf32> to vector<16x16xf32>
    %206 = arith.subf %190, %205 : vector<16x16xf32>
    %cst_123 = arith.constant 9.99999974E-6 : f32
    %207 = vector.broadcast %cst_123 : f32 to vector<16x1xf32>
    %208 = arith.addf %204, %207 : vector<16x1xf32>
    %209 = math.rsqrt %208 : vector<16x1xf32>
    %210 = vector.broadcast %209 : vector<16x1xf32> to vector<16x16xf32>
    %211 = arith.mulf %206, %210 : vector<16x16xf32>
    %212 = vector.broadcast %35 : vector<1x16xf32> to vector<16x16xf32>
    %213 = arith.mulf %211, %212 : vector<16x16xf32>
    %214 = vector.broadcast %36 : vector<1x16xf32> to vector<16x16xf32>
    %215 = arith.addf %213, %214 : vector<16x16xf32>
    %216 = arith.mulf %191, %191 : vector<16x4xf32>
    %217 = arith.mulf %192, %192 : vector<16x4xf32>
    %218 = arith.addf %216, %217 : vector<16x4xf32>
    %219 = arith.mulf %193, %193 : vector<16x4xf32>
    %220 = arith.addf %218, %219 : vector<16x4xf32>
    %cst_124 = arith.constant 9.99999993E-9 : f32
    %221 = vector.broadcast %cst_124 : f32 to vector<16x4xf32>
    %222 = arith.maximumf %220, %221 : vector<16x4xf32>
    %cst_125 = arith.constant dense<0.000000e+00> : vector<16xf32>
    %223 = vector.multi_reduction <add>, %222, %cst_125 [1] : vector<16x4xf32> to vector<16xf32>
    %224 = vector.shape_cast %223 : vector<16xf32> to vector<16x1xf32>
    %cst_126 = arith.constant 4.000000e+00 : f32
    %225 = vector.broadcast %cst_126 : f32 to vector<16x1xf32>
    %226 = arith.divf %224, %225 : vector<16x1xf32>
    %227 = math.rsqrt %226 : vector<16x1xf32>
    %228 = vector.broadcast %227 : vector<16x1xf32> to vector<16x4xf32>
    %229 = arith.mulf %191, %228 : vector<16x4xf32>
    %230 = vector.broadcast %227 : vector<16x1xf32> to vector<16x4xf32>
    %231 = arith.mulf %192, %230 : vector<16x4xf32>
    %232 = vector.broadcast %227 : vector<16x1xf32> to vector<16x4xf32>
    %233 = arith.mulf %193, %232 : vector<16x4xf32>
    %234 = tpu.concatenate %229, %231, %233 in 0 : vector<16x4xf32>, vector<16x4xf32>, vector<16x4xf32> -> vector<48x4xf32>
    %cst_127 = arith.constant dense<0.000000e+00> : vector<48x8xf32>
    %235 = tpu.matmul %234, %21, %cst_127 {dimension_numbers = #tpu.dot_dimension_numbers<[1], [0], [0], [1], [0, 0, 1, 1], [], []>} : vector<48x4xf32>, vector<4x8xf32>, vector<48x8xf32> -> vector<48x8xf32>
    %236 = vector.extract_strided_slice %235 {offsets = [0, 0], sizes = [16, 8], strides = [1, 1]} : vector<48x8xf32> to vector<16x8xf32>
    %237 = vector.extract_strided_slice %235 {offsets = [16, 0], sizes = [16, 8], strides = [1, 1]} : vector<48x8xf32> to vector<16x8xf32>
    %238 = vector.extract_strided_slice %235 {offsets = [32, 0], sizes = [16, 8], strides = [1, 1]} : vector<48x8xf32> to vector<16x8xf32>
    %239 = arith.mulf %236, %236 : vector<16x8xf32>
    %240 = arith.mulf %237, %237 : vector<16x8xf32>
    %241 = arith.addf %239, %240 : vector<16x8xf32>
    %242 = arith.mulf %238, %238 : vector<16x8xf32>
    %243 = arith.addf %241, %242 : vector<16x8xf32>
    %cst_128 = arith.constant 9.99999993E-9 : f32
    %244 = vector.broadcast %cst_128 : f32 to vector<16x8xf32>
    %245 = arith.maximumf %243, %244 : vector<16x8xf32>
    %246 = math.sqrt %245 : vector<16x8xf32>
    %cst_129 = arith.constant dense<0.000000e+00> : vector<16x64xf32>
    %247 = tpu.matmul %215, %22, %cst_129 {dimension_numbers = #tpu.dot_dimension_numbers<[1], [0], [0], [1], [0, 0, 1, 1], [], []>} : vector<16x16xf32>, vector<16x64xf32>, vector<16x64xf32> -> vector<16x64xf32>
    %cst_130 = arith.constant dense<0.000000e+00> : vector<16x64xf32>
    %248 = tpu.matmul %246, %23, %cst_130 {dimension_numbers = #tpu.dot_dimension_numbers<[1], [0], [0], [1], [0, 0, 1, 1], [], []>} : vector<16x8xf32>, vector<8x64xf32>, vector<16x64xf32> -> vector<16x64xf32>
    %249 = arith.addf %247, %248 : vector<16x64xf32>
    %250 = vector.broadcast %24 : vector<1x64xf32> to vector<16x64xf32>
    %251 = arith.addf %249, %250 : vector<16x64xf32>
    %cst_131 = arith.constant dense<0.000000e+00> : vector<48x8xf32>
    %252 = tpu.matmul %235, %25, %cst_131 {dimension_numbers = #tpu.dot_dimension_numbers<[1], [0], [0], [1], [0, 0, 1, 1], [], []>} : vector<48x8xf32>, vector<8x8xf32>, vector<48x8xf32> -> vector<48x8xf32>
    %253 = vector.extract_strided_slice %252 {offsets = [0, 0], sizes = [16, 8], strides = [1, 1]} : vector<48x8xf32> to vector<16x8xf32>
    %254 = vector.extract_strided_slice %252 {offsets = [16, 0], sizes = [16, 8], strides = [1, 1]} : vector<48x8xf32> to vector<16x8xf32>
    %255 = vector.extract_strided_slice %252 {offsets = [32, 0], sizes = [16, 8], strides = [1, 1]} : vector<48x8xf32> to vector<16x8xf32>
    %cst_132 = arith.constant 0.000000e+00 : f32
    %256 = vector.broadcast %cst_132 : f32 to vector<16x64xf32>
    %257 = arith.subf %256, %251 : vector<16x64xf32>
    %258 = math.exp %257 : vector<16x64xf32>
    %cst_133 = arith.constant 1.000000e+00 : f32
    %259 = vector.broadcast %cst_133 : f32 to vector<16x64xf32>
    %260 = arith.addf %259, %258 : vector<16x64xf32>
    %261 = tpu.reciprocal %260 {approx = true} : vector<16x64xf32> -> vector<16x64xf32>
    %cst_134 = arith.constant dense<0.000000e+00> : vector<16x8xf32>
    %262 = tpu.matmul %261, %26, %cst_134 {dimension_numbers = #tpu.dot_dimension_numbers<[1], [0], [0], [1], [0, 0, 1, 1], [], []>} : vector<16x64xf32>, vector<64x8xf32>, vector<16x8xf32> -> vector<16x8xf32>
    %263 = vector.broadcast %27 : vector<1x8xf32> to vector<16x8xf32>
    %264 = arith.addf %262, %263 : vector<16x8xf32>
    %cst_135 = arith.constant 0.000000e+00 : f32
    %265 = vector.broadcast %cst_135 : f32 to vector<16x8xf32>
    %266 = arith.subf %265, %264 : vector<16x8xf32>
    %267 = math.exp %266 : vector<16x8xf32>
    %cst_136 = arith.constant 1.000000e+00 : f32
    %268 = vector.broadcast %cst_136 : f32 to vector<16x8xf32>
    %269 = arith.addf %268, %267 : vector<16x8xf32>
    %270 = tpu.reciprocal %269 {approx = true} : vector<16x8xf32> -> vector<16x8xf32>
    %271 = arith.mulf %253, %270 : vector<16x8xf32>
    %272 = arith.mulf %254, %270 : vector<16x8xf32>
    %273 = arith.mulf %255, %270 : vector<16x8xf32>
    %cst_137 = arith.constant 0.000000e+00 : f32
    %274 = vector.broadcast %cst_137 : f32 to vector<16x64xf32>
    %275 = arith.maximumf %251, %274 : vector<16x64xf32>
    %276 = tpu.concatenate %271, %272, %273 in 0 : vector<16x8xf32>, vector<16x8xf32>, vector<16x8xf32> -> vector<48x8xf32>
    %cst_138 = arith.constant dense<0.000000e+00> : vector<48x8xf32>
    %277 = tpu.matmul %276, %28, %cst_138 {dimension_numbers = #tpu.dot_dimension_numbers<[1], [0], [0], [1], [0, 0, 1, 1], [], []>} : vector<48x8xf32>, vector<8x8xf32>, vector<48x8xf32> -> vector<48x8xf32>
    %278 = vector.extract_strided_slice %277 {offsets = [0, 0], sizes = [16, 8], strides = [1, 1]} : vector<48x8xf32> to vector<16x8xf32>
    %279 = vector.extract_strided_slice %277 {offsets = [16, 0], sizes = [16, 8], strides = [1, 1]} : vector<48x8xf32> to vector<16x8xf32>
    %280 = vector.extract_strided_slice %277 {offsets = [32, 0], sizes = [16, 8], strides = [1, 1]} : vector<48x8xf32> to vector<16x8xf32>
    %281 = arith.mulf %278, %278 : vector<16x8xf32>
    %282 = arith.mulf %279, %279 : vector<16x8xf32>
    %283 = arith.addf %281, %282 : vector<16x8xf32>
    %284 = arith.mulf %280, %280 : vector<16x8xf32>
    %285 = arith.addf %283, %284 : vector<16x8xf32>
    %cst_139 = arith.constant 9.99999993E-9 : f32
    %286 = vector.broadcast %cst_139 : f32 to vector<16x8xf32>
    %287 = arith.maximumf %285, %286 : vector<16x8xf32>
    %288 = math.sqrt %287 : vector<16x8xf32>
    %cst_140 = arith.constant dense<0.000000e+00> : vector<16x16xf32>
    %289 = tpu.matmul %275, %29, %cst_140 {dimension_numbers = #tpu.dot_dimension_numbers<[1], [0], [0], [1], [0, 0, 1, 1], [], []>} : vector<16x64xf32>, vector<64x16xf32>, vector<16x16xf32> -> vector<16x16xf32>
    %cst_141 = arith.constant dense<0.000000e+00> : vector<16x16xf32>
    %290 = tpu.matmul %288, %30, %cst_141 {dimension_numbers = #tpu.dot_dimension_numbers<[1], [0], [0], [1], [0, 0, 1, 1], [], []>} : vector<16x8xf32>, vector<8x16xf32>, vector<16x16xf32> -> vector<16x16xf32>
    %291 = arith.addf %289, %290 : vector<16x16xf32>
    %292 = vector.broadcast %31 : vector<1x16xf32> to vector<16x16xf32>
    %293 = arith.addf %291, %292 : vector<16x16xf32>
    %cst_142 = arith.constant dense<0.000000e+00> : vector<48x4xf32>
    %294 = tpu.matmul %277, %32, %cst_142 {dimension_numbers = #tpu.dot_dimension_numbers<[1], [0], [0], [1], [0, 0, 1, 1], [], []>} : vector<48x8xf32>, vector<8x4xf32>, vector<48x4xf32> -> vector<48x4xf32>
    %295 = vector.extract_strided_slice %294 {offsets = [0, 0], sizes = [16, 4], strides = [1, 1]} : vector<48x4xf32> to vector<16x4xf32>
    %296 = vector.extract_strided_slice %294 {offsets = [16, 0], sizes = [16, 4], strides = [1, 1]} : vector<48x4xf32> to vector<16x4xf32>
    %297 = vector.extract_strided_slice %294 {offsets = [32, 0], sizes = [16, 4], strides = [1, 1]} : vector<48x4xf32> to vector<16x4xf32>
    %cst_143 = arith.constant dense<0.000000e+00> : vector<16x4xf32>
    %298 = tpu.matmul %293, %33, %cst_143 {dimension_numbers = #tpu.dot_dimension_numbers<[1], [0], [0], [1], [0, 0, 1, 1], [], []>} : vector<16x16xf32>, vector<16x4xf32>, vector<16x4xf32> -> vector<16x4xf32>
    %299 = vector.broadcast %34 : vector<1x4xf32> to vector<16x4xf32>
    %300 = arith.addf %298, %299 : vector<16x4xf32>
    %cst_144 = arith.constant 0.000000e+00 : f32
    %301 = vector.broadcast %cst_144 : f32 to vector<16x4xf32>
    %302 = arith.subf %301, %300 : vector<16x4xf32>
    %303 = math.exp %302 : vector<16x4xf32>
    %cst_145 = arith.constant 1.000000e+00 : f32
    %304 = vector.broadcast %cst_145 : f32 to vector<16x4xf32>
    %305 = arith.addf %304, %303 : vector<16x4xf32>
    %306 = tpu.reciprocal %305 {approx = true} : vector<16x4xf32> -> vector<16x4xf32>
    %307 = arith.mulf %295, %306 : vector<16x4xf32>
    %308 = arith.mulf %296, %306 : vector<16x4xf32>
    %309 = arith.mulf %297, %306 : vector<16x4xf32>
    %310 = arith.addf %215, %293 : vector<16x16xf32>
    %311 = arith.addf %229, %307 : vector<16x4xf32>
    %312 = arith.addf %231, %308 : vector<16x4xf32>
    %313 = arith.addf %233, %309 : vector<16x4xf32>
    %cst_146 = arith.constant dense<0.000000e+00> : vector<16xf32>
    %314 = vector.multi_reduction <add>, %310, %cst_146 [1] : vector<16x16xf32> to vector<16xf32>
    %315 = vector.shape_cast %314 : vector<16xf32> to vector<16x1xf32>
    %cst_147 = arith.constant 1.600000e+01 : f32
    %316 = vector.broadcast %cst_147 : f32 to vector<16x1xf32>
    %317 = arith.divf %315, %316 : vector<16x1xf32>
    %318 = vector.broadcast %317 : vector<16x1xf32> to vector<16x16xf32>
    %319 = arith.subf %310, %318 : vector<16x16xf32>
    %320 = arith.mulf %319, %319 : vector<16x16xf32>
    %cst_148 = arith.constant dense<0.000000e+00> : vector<16xf32>
    %321 = vector.multi_reduction <add>, %320, %cst_148 [1] : vector<16x16xf32> to vector<16xf32>
    %322 = vector.shape_cast %321 : vector<16xf32> to vector<16x1xf32>
    %cst_149 = arith.constant 1.600000e+01 : f32
    %323 = vector.broadcast %cst_149 : f32 to vector<16x1xf32>
    %324 = arith.divf %322, %323 : vector<16x1xf32>
    %325 = vector.broadcast %317 : vector<16x1xf32> to vector<16x16xf32>
    %326 = arith.subf %310, %325 : vector<16x16xf32>
    %cst_150 = arith.constant 9.99999974E-6 : f32
    %327 = vector.broadcast %cst_150 : f32 to vector<16x1xf32>
    %328 = arith.addf %324, %327 : vector<16x1xf32>
    %329 = math.rsqrt %328 : vector<16x1xf32>
    %330 = vector.broadcast %329 : vector<16x1xf32> to vector<16x16xf32>
    %331 = arith.mulf %326, %330 : vector<16x16xf32>
    %332 = vector.broadcast %37 : vector<1x16xf32> to vector<16x16xf32>
    %333 = arith.mulf %331, %332 : vector<16x16xf32>
    %334 = vector.broadcast %38 : vector<1x16xf32> to vector<16x16xf32>
    %335 = arith.addf %333, %334 : vector<16x16xf32>
    %336 = arith.mulf %311, %311 : vector<16x4xf32>
    %337 = arith.mulf %312, %312 : vector<16x4xf32>
    %338 = arith.addf %336, %337 : vector<16x4xf32>
    %339 = arith.mulf %313, %313 : vector<16x4xf32>
    %340 = arith.addf %338, %339 : vector<16x4xf32>
    %cst_151 = arith.constant 9.99999993E-9 : f32
    %341 = vector.broadcast %cst_151 : f32 to vector<16x4xf32>
    %342 = arith.maximumf %340, %341 : vector<16x4xf32>
    %cst_152 = arith.constant dense<0.000000e+00> : vector<16xf32>
    %343 = vector.multi_reduction <add>, %342, %cst_152 [1] : vector<16x4xf32> to vector<16xf32>
    %344 = vector.shape_cast %343 : vector<16xf32> to vector<16x1xf32>
    %cst_153 = arith.constant 4.000000e+00 : f32
    %345 = vector.broadcast %cst_153 : f32 to vector<16x1xf32>
    %346 = arith.divf %344, %345 : vector<16x1xf32>
    %347 = math.rsqrt %346 : vector<16x1xf32>
    %348 = vector.broadcast %347 : vector<16x1xf32> to vector<16x4xf32>
    %349 = arith.mulf %311, %348 : vector<16x4xf32>
    %350 = vector.broadcast %347 : vector<16x1xf32> to vector<16x4xf32>
    %351 = arith.mulf %312, %350 : vector<16x4xf32>
    %352 = vector.broadcast %347 : vector<16x1xf32> to vector<16x4xf32>
    %353 = arith.mulf %313, %352 : vector<16x4xf32>
    %354 = tpu.concatenate %335, %349, %351, %353 in 1 : vector<16x16xf32>, vector<16x4xf32>, vector<16x4xf32>, vector<16x4xf32> -> vector<16x28xf32>
    %c0_154 = arith.constant 0 : index
    %c0_155 = arith.constant 0 : index
    %355 = vector.load %arg44[%c0_154, %c0_155] : memref<16x28xf32, #tpu.memory_space<vmem>>, vector<16x28xf32>
    tpu.vector_store %arg44[%c0_154, %c0_155], %354 {strides = array<i32>} : memref<16x28xf32, #tpu.memory_space<vmem>>, vector<16x28xf32>,
    return
  }
}

module attributes {stable_mosaic.version = 11 : i64} {
  func.func @kernel(%arg0: memref<16x28xf32, #tpu.memory_space<vmem>>, %arg1: memref<2x16xf32, #tpu.memory_space<vmem>>, %arg2: memref<4x4xf32, #tpu.memory_space<vmem>>, %arg3: memref<16x16xf32, #tpu.memory_space<vmem>>, %arg4: memref<4x16xf32, #tpu.memory_space<vmem>>, %arg5: memref<1x16xf32, #tpu.memory_space<vmem>>, %arg6: memref<16x16xf32, #tpu.memory_space<vmem>>, %arg7: memref<1x16xf32, #tpu.memory_space<vmem>>, %arg8: memref<16x1xf32, #tpu.memory_space<vmem>>, %arg9: memref<1x1xf32, #tpu.memory_space<vmem>>, %arg10: memref<2x1xf32, #tpu.memory_space<vmem>>) attributes {dimension_semantics = [], scalar_prefetch = 0 : i64, scratch_operands = 0 : i64, tpu.core_type = #tpu.core_type<tc>} {
    %c0 = arith.constant 0 : index
    %c0_0 = arith.constant 0 : index
    %0 = vector.load %arg2[%c0, %c0_0] : memref<4x4xf32, #tpu.memory_space<vmem>>, vector<4x4xf32>
    %c0_1 = arith.constant 0 : index
    %c0_2 = arith.constant 0 : index
    %1 = vector.load %arg3[%c0_1, %c0_2] : memref<16x16xf32, #tpu.memory_space<vmem>>, vector<16x16xf32>
    %c0_3 = arith.constant 0 : index
    %c0_4 = arith.constant 0 : index
    %2 = vector.load %arg4[%c0_3, %c0_4] : memref<4x16xf32, #tpu.memory_space<vmem>>, vector<4x16xf32>
    %c0_5 = arith.constant 0 : index
    %c0_6 = arith.constant 0 : index
    %3 = vector.load %arg5[%c0_5, %c0_6] : memref<1x16xf32, #tpu.memory_space<vmem>>, vector<1x16xf32>
    %c0_7 = arith.constant 0 : index
    %c0_8 = arith.constant 0 : index
    %4 = vector.load %arg6[%c0_7, %c0_8] : memref<16x16xf32, #tpu.memory_space<vmem>>, vector<16x16xf32>
    %c0_9 = arith.constant 0 : index
    %c0_10 = arith.constant 0 : index
    %5 = vector.load %arg7[%c0_9, %c0_10] : memref<1x16xf32, #tpu.memory_space<vmem>>, vector<1x16xf32>
    %c0_11 = arith.constant 0 : index
    %c0_12 = arith.constant 0 : index
    %6 = vector.load %arg8[%c0_11, %c0_12] : memref<16x1xf32, #tpu.memory_space<vmem>>, vector<16x1xf32>
    %c0_13 = arith.constant 0 : index
    %c0_14 = arith.constant 0 : index
    %7 = vector.load %arg9[%c0_13, %c0_14] : memref<1x1xf32, #tpu.memory_space<vmem>>, vector<1x1xf32>
    %c0_15 = arith.constant 0 : index
    %c0_16 = arith.constant 0 : index
    %8 = vector.load %arg0[%c0_15, %c0_16] : memref<16x28xf32, #tpu.memory_space<vmem>>, vector<16x28xf32>
    %9 = vector.extract_strided_slice %8 {offsets = [0, 0], sizes = [16, 16], strides = [1, 1]} : vector<16x28xf32> to vector<16x16xf32>
    %10 = vector.extract_strided_slice %8 {offsets = [0, 16], sizes = [16, 4], strides = [1, 1]} : vector<16x28xf32> to vector<16x4xf32>
    %11 = vector.extract_strided_slice %8 {offsets = [0, 20], sizes = [16, 4], strides = [1, 1]} : vector<16x28xf32> to vector<16x4xf32>
    %12 = vector.extract_strided_slice %8 {offsets = [0, 24], sizes = [16, 4], strides = [1, 1]} : vector<16x28xf32> to vector<16x4xf32>
    %13 = tpu.concatenate %10, %11, %12 in 0 : vector<16x4xf32>, vector<16x4xf32>, vector<16x4xf32> -> vector<48x4xf32>
    %cst = arith.constant dense<0.000000e+00> : vector<48x4xf32>
    %14 = tpu.matmul %13, %0, %cst {dimension_numbers = #tpu.dot_dimension_numbers<[1], [0], [0], [1], [0, 0, 1, 1], [], []>} : vector<48x4xf32>, vector<4x4xf32>, vector<48x4xf32> -> vector<48x4xf32>
    %15 = vector.extract_strided_slice %14 {offsets = [0, 0], sizes = [16, 4], strides = [1, 1]} : vector<48x4xf32> to vector<16x4xf32>
    %16 = vector.extract_strided_slice %14 {offsets = [16, 0], sizes = [16, 4], strides = [1, 1]} : vector<48x4xf32> to vector<16x4xf32>
    %17 = vector.extract_strided_slice %14 {offsets = [32, 0], sizes = [16, 4], strides = [1, 1]} : vector<48x4xf32> to vector<16x4xf32>
    %18 = arith.mulf %15, %15 : vector<16x4xf32>
    %19 = arith.mulf %16, %16 : vector<16x4xf32>
    %20 = arith.addf %18, %19 : vector<16x4xf32>
    %21 = arith.mulf %17, %17 : vector<16x4xf32>
    %22 = arith.addf %20, %21 : vector<16x4xf32>
    %cst_17 = arith.constant 9.99999993E-9 : f32
    %23 = vector.broadcast %cst_17 : f32 to vector<16x4xf32>
    %24 = arith.maximumf %22, %23 : vector<16x4xf32>
    %25 = math.sqrt %24 : vector<16x4xf32>
    %cst_18 = arith.constant dense<0.000000e+00> : vector<16x16xf32>
    %26 = tpu.matmul %9, %1, %cst_18 {dimension_numbers = #tpu.dot_dimension_numbers<[1], [0], [0], [1], [0, 0, 1, 1], [], []>} : vector<16x16xf32>, vector<16x16xf32>, vector<16x16xf32> -> vector<16x16xf32>
    %cst_19 = arith.constant dense<0.000000e+00> : vector<16x16xf32>
    %27 = tpu.matmul %25, %2, %cst_19 {dimension_numbers = #tpu.dot_dimension_numbers<[1], [0], [0], [1], [0, 0, 1, 1], [], []>} : vector<16x4xf32>, vector<4x16xf32>, vector<16x16xf32> -> vector<16x16xf32>
    %28 = arith.addf %26, %27 : vector<16x16xf32>
    %29 = vector.broadcast %3 : vector<1x16xf32> to vector<16x16xf32>
    %30 = arith.addf %28, %29 : vector<16x16xf32>
    %cst_20 = arith.constant 0.000000e+00 : f32
    %31 = vector.broadcast %cst_20 : f32 to vector<16x16xf32>
    %32 = arith.maximumf %30, %31 : vector<16x16xf32>
    %c0_21 = arith.constant 0 : index
    %c0_22 = arith.constant 0 : index
    %33 = vector.load %arg1[%c0_21, %c0_22] : memref<2x16xf32, #tpu.memory_space<vmem>>, vector<2x16xf32>
    %cst_23 = arith.constant dense<0.000000e+00> : vector<2x16xf32>
    %34 = tpu.matmul %33, %32, %cst_23 {dimension_numbers = #tpu.dot_dimension_numbers<[1], [0], [0], [1], [0, 0, 1, 1], [], []>} : vector<2x16xf32>, vector<16x16xf32>, vector<2x16xf32> -> vector<2x16xf32>
    %cst_24 = arith.constant dense<0.000000e+00> : vector<2x16xf32>
    %35 = tpu.matmul %34, %4, %cst_24 {dimension_numbers = #tpu.dot_dimension_numbers<[1], [0], [0], [1], [0, 0, 1, 1], [], []>} : vector<2x16xf32>, vector<16x16xf32>, vector<2x16xf32> -> vector<2x16xf32>
    %36 = vector.broadcast %5 : vector<1x16xf32> to vector<2x16xf32>
    %37 = arith.addf %35, %36 : vector<2x16xf32>
    %cst_25 = arith.constant 0.000000e+00 : f32
    %38 = vector.broadcast %cst_25 : f32 to vector<2x16xf32>
    %39 = arith.subf %38, %37 : vector<2x16xf32>
    %40 = math.exp %39 : vector<2x16xf32>
    %cst_26 = arith.constant 1.000000e+00 : f32
    %41 = vector.broadcast %cst_26 : f32 to vector<2x16xf32>
    %42 = arith.addf %41, %40 : vector<2x16xf32>
    %43 = tpu.reciprocal %42 {approx = true} : vector<2x16xf32> -> vector<2x16xf32>
    %44 = arith.mulf %37, %43 : vector<2x16xf32>
    %cst_27 = arith.constant dense<0.000000e+00> : vector<2x1xf32>
    %45 = tpu.matmul %44, %6, %cst_27 {dimension_numbers = #tpu.dot_dimension_numbers<[1], [0], [0], [1], [0, 0, 1, 1], [], []>} : vector<2x16xf32>, vector<16x1xf32>, vector<2x1xf32> -> vector<2x1xf32>
    %46 = vector.broadcast %7 : vector<1x1xf32> to vector<2x1xf32>
    %47 = arith.addf %45, %46 : vector<2x1xf32>
    %c0_28 = arith.constant 0 : index
    %c0_29 = arith.constant 0 : index
    %48 = vector.load %arg10[%c0_28, %c0_29] : memref<2x1xf32, #tpu.memory_space<vmem>>, vector<2x1xf32>
    tpu.vector_store %arg10[%c0_28, %c0_29], %47 {strides = array<i32>} : memref<2x1xf32, #tpu.memory_space<vmem>>, vector<2x1xf32>,
    return
  }
}

</mosaic_0001>

<bundles_post_ra>
// kernel: gvp_gnn_forward.5
= control target key start
LH: loop header
LB: loop body
LE: loop exit
PB: predicated region body
PF: predicated region fallthrough
CT: control target
= control target key end

     0   :  { %s1659_s27 = smov 125   ;;  %s1660_s28 = smov 122   ;;  %vm86_vm0 = vcmask 1042432   ;;  %vm73_vm1 = vcmask 23552   ;;  %v1663_v10 = vmov 0.0   ;;  %vm632_vm2 = vcmask 1040384   ;;  %s2141_s0 = inlined_call_operand.vmem [shape: f32[16,15], index: 0, kind: input, shape index: {}]   ;;  %s2142_s1 = inlined_call_operand.vmem [shape: f32[40,11], index: 1, kind: input, shape index: {}]   ;;  %s2143_s2 = inlined_call_operand.vmem [shape: f32[3,4], index: 2, kind: input, shape index: {}]   ;;  %s2144_s7 = inlined_call_operand.vmem [shape: f32[1,2], index: 7, kind: input, shape index: {}]   ;;  %s2145_s11 = inlined_call_operand.vmem [shape: f32[2,2], index: 11, kind: input, shape index: {}]   ;;  %s2146_s4 = inlined_call_operand.vmem [shape: f32[4,16], index: 4, kind: input, shape index: {}]   ;;  %s2147_s3 = inlined_call_operand.vmem [shape: f32[6,16], index: 3, kind: input, shape index: {}]   ;;  %s2148_s6 = inlined_call_operand.vmem [shape: f32[4,4], index: 6, kind: input, shape index: {}]   ;;  %s2149_s9 = inlined_call_operand.vmem [shape: f32[2,16], index: 9, kind: input, shape index: {}]   ;;  %s2150_s8 = inlined_call_operand.vmem [shape: f32[8,16], index: 8, kind: input, shape index: {}]   ;;  %s2151_s10 = inlined_call_operand.vmem [shape: f32[1,16], index: 10, kind: input, shape index: {}]   ;;  %s2152_s5 = inlined_call_operand.vmem [shape: f32[1,16], index: 5, kind: input, shape index: {}]   ;;  %s2153_s12 = inlined_call_operand.vmem [shape: f32[16,28], index: 12, kind: output, shape index: {0}]   ;;  %s2154_s13 = inlined_call_operand.vmem [shape: f32[40,22], index: 13, kind: output, shape index: {1}]  }
   0x1   :  { %v1743_v0 = vld [vmem:[%s2141_s0] sm:$0xff]  ;;  %v1751_v1 = vld [vmem:[%s2141_s0 + $0x8] sm:$0xff]  ;;  %s1661_s18 = smov 127   ;;  %v1771_v4 = vld [vmem:[%s2142_s1 + $0x10] sm:$0xff]  ;;  %s1662_s24 = smov 126   ;;  %vm1665_vm3 = vmmov 0  }
   0x2   :  { %57 = vrot.lane.b32.xlu0 %v1743_v0, %s1659_s27  ;;  %61 = vrot.lane.b32.xlu1 %v1743_v0, %s1660_s28  ;;  %v1759_v2 = vld [vmem:[%s2142_s1] sm:$0xff]  ;;  %v1764_v3 = vld [vmem:[%s2142_s1 + $0x8] sm:$0xff]  ;;  %vm601_vm4 = vcmask 7168   ;;  %vm857_vm5 = vcmask 1041408   ;;  %vm218_vm6 = vcmask 1043456   ;;  %vm302_vm7 = vcmask 1045504  }
   0x3   :  { %v1776_v5 = vld [vmem:[%s2142_s1 + $0x18] sm:$0xff]  ;;  %v1783_v6 = vld [vmem:[%s2142_s1 + $0x20] sm:$0xff]  ;;  %vm841_vm8 = vcmask 15360   ;;  %vm211_vm11 = vcmask 31744   ;;  %vm297_vm14 = vcmask 48128   ;;  %s1667_s17 = smov 18  }
   0x4   :  { %v43_v7 = vld [vmem:[%s2143_s2] sm:$0x7]  ;;  %s1664_s2 = smov 120   ;;  %s1669_s0 = smov 24  }
   0x5   :  { %1470 = vmatprep.subr.msk.mxu0 %vm86_vm0, %v43_v7  ;;  %v48_v12 = vld [vmem:[%s2144_s7] sm:$0x1] }
   0x6   :  { %59 = vrot.lane.b32.xlu0 %v1751_v1, %s1659_s27  ;;  %63 = vrot.lane.b32.xlu1 %v1751_v1, %s1660_s28  ;;  %v1873_v41 = vld [vmem:[%s2145_s11] sm:$0x3] }
   0x7   :  { %1471 = vmatpush3.msk.msra.mxu0 %vm86_vm0, %v43_v7  ;;  %v45_v44 = vld [vmem:[%s2146_s4] sm:$0xf] }
   0x8   :  { %1502 = vmatprep.subr.mxu0 %v1663_v10  ;;  %1481 = vmatprep.subr.msk.mxu1 %vm218_vm6, %v45_v44  ;;  %v1889_v45 = vld [vmem:[%s2147_s3] sm:$0x3f] }
   0x9   :  { %1482 = vmatpush3.msk.msra.mxu1 %vm218_vm6, %v45_v44 }
   0xa   :  { %551 = vrot.lane.b32.xlu0 %v1759_v2, %s1661_s18  ;;  %553 = vrot.lane.b32.xlu1 %v1764_v3, %s1661_s18 }
   0xb   :  { %1486 = vmatprep.subr.msk.mxu1 %vm302_vm7, %v1889_v45 }
   0xe   :  { %555 = vrot.lane.b32.xlu0 %v1771_v4, %s1661_s18  ;;  %557 = vrot.lane.b32.xlu1 %v1776_v5, %s1661_s18 }
  0x12   :  { %559 = vrot.lane.b32.xlu0 %v1783_v6, %s1661_s18  ;;  %561 = vrot.lane.b32.xlu1 %v1759_v2, %s1662_s24  ;;  %s1668_s18 = smov 20  }
  0x16   :  { %563 = vrot.lane.b32.xlu0 %v1764_v3, %s1662_s24  ;;  %565 = vrot.lane.b32.xlu1 %v1771_v4, %s1662_s24 }
  0x74   :  { %v58_v8 = vpop.permute.xlu0 %57  ;;  %v62_v9 = vpop.permute.xlu1 %61 }
  0x75   :  { %65 = vrot.lane.b32.xlu0 %v58_v8, %s1660_s28  ;;  %1472 = vmatprep.mubr.msk.f32.mxu0 %vm73_vm1, %v62_v9 }
  0x78   :  { %v60_v11 = vpop.permute.xlu0 %59  ;;  %v64_v13 = vpop.permute.xlu1 %63 }
  0x79   :  { %567 = vrot.lane.b32.xlu0 %v1776_v5, %s1662_s24  ;;  %67 = vrot.lane.b32.xlu1 %v60_v11, %s1660_s28 }
  0x7a   :  { %1473 = vmatmul.mubr.msk.f32.vlgmr.msra.gmra.mrb[0].mxu0 %vm73_vm1, %v64_v13 }
  0x7b   :  { %1503 = vmatpush3.msk.msra.mxu0 %vm632_vm2, %v48_v12 }
  0x7c   :  { %1583 = vmatprep.subr.mxu0 %v1663_v10  ;;  %v552_v14 = vpop.permute.xlu0 %551  ;;  %v554_v15 = vpop.permute.xlu1 %553 }
  0x7d   :  { %69 = vrot.lane.b32.xlu1 %v62_v9, %s1660_s28  ;;  %71 = vrot.lane.b32.xlu0 %v64_v13, %s1660_s28 }
  0x80   :  { %v556_v16 = vpop.permute.xlu0 %555  ;;  %v558_v17 = vpop.permute.xlu1 %557 }
  0x81   :  { %569 = vrot.lane.b32.xlu1 %v1783_v6, %s1662_s24  ;;  %571 = vrot.lane.b32.xlu0 %v1759_v2, %s1664_s2 }
  0x84   :  { %v560_v18 = vpop.permute.xlu0 %559  ;;  %v562_v19 = vpop.permute.xlu1 %561 }
  0x85   :  { %573 = vrot.lane.b32.xlu1 %v1764_v3, %s1664_s2  ;;  %575 = vrot.lane.b32.xlu0 %v1771_v4, %s1664_s2 }
  0x88   :  { %v564_v20 = vpop.permute.xlu0 %563  ;;  %v566_v21 = vpop.permute.xlu1 %565 }
  0x89   :  { %577 = vrot.lane.b32.xlu1 %v1776_v5, %s1664_s2  ;;  %579 = vrot.lane.b32.xlu0 %v1783_v6, %s1664_s2 }
  0x8d   :  { %581 = vrot.lane.b32.xlu1 %v552_v14, %s1664_s2  ;;  %583 = vrot.lane.b32.xlu0 %v554_v15, %s1664_s2 }
  0x91   :  { %585 = vrot.lane.b32.xlu1 %v556_v16, %s1664_s2  ;;  %587 = vrot.lane.b32.xlu0 %v558_v17, %s1664_s2 }
  0x95   :  { %589 = vrot.lane.b32.xlu1 %v560_v18, %s1664_s2  ;;  %591 = vrot.lane.b32.xlu0 %v562_v19, %s1664_s2 }
  0x99   :  { %593 = vrot.lane.b32.xlu1 %v564_v20, %s1664_s2  ;;  %595 = vrot.lane.b32.xlu0 %v566_v21, %s1664_s2 }
  0xe7   :  { %v66_v22 = vpop.permute.xlu0 %65 }
  0xe8   :  { %1475 = vmatprep.mubr.msk.f32.mxu0 %vm73_vm1, %v66_v22 }
  0xeb   :  { %v68_v23 = vpop.permute.xlu1 %67  ;;  %v568_v24 = vpop.permute.xlu0 %567 }
  0xec   :  { %1476 = vmatmul.mubr.msk.f32.gmra.mrb[2].mxu0 %vm73_vm1, %v68_v23  ;;  %597 = vrot.lane.b32.xlu1 %v568_v24, %s1664_s2 }
  0xef   :  { %v70_v25 = vpop.permute.xlu1 %69  ;;  %v72_v26 = vpop.permute.xlu0 %71 }
  0xf0   :  { %1478 = vmatprep.mubr.msk.f32.mxu0 %vm73_vm1, %v70_v25 }
  0xf1   :  { %1479 = vmatmul.mubr.msk.f32.gmra.mrb[4].mxu0 %vm73_vm1, %v72_v26 }
  0xf2   :  { %1504 = vmatprep.mubr.msk.f32.mxu0 %vm1665_vm3, %v1663_v10 }
  0xf3   :  { %v570_v27 = vpop.permute.xlu1 %569  ;;  %v572_v28 = vpop.permute.xlu0 %571 }
  0xf4   :  { %599 = vrot.lane.b32.xlu0 %v570_v27, %s1664_s2 }
  0xf5   :  { %1505 = vmatmul.mubr.msk.f32.vlgmr.msra.gmra.mrb[6].mxu0 %vm601_vm4, %v572_v28 }
  0xf6   :  { %1507 = vmatprep.mubr.msk.f32.mxu0 %vm1665_vm3, %v1663_v10  ;;  %1584 = vmatpush3.msk.msra.mxu0 %vm857_vm5, %v1873_v41 }
  0xf7   :  { %v574_v29 = vpop.permute.xlu1 %573  ;;  %v576_v30 = vpop.permute.xlu0 %575 }
  0xf9   :  { %1508 = vmatmul.mubr.msk.f32.gmra.mrb[8].mxu0 %vm601_vm4, %v574_v29  ;;  %v47_v29 = vld [vmem:[%s2148_s6] sm:$0xf] }
  0xfa   :  { %1510 = vmatprep.mubr.msk.f32.mxu0 %vm1665_vm3, %v1663_v10 }
  0xfb   :  { %v578_v31 = vpop.permute.xlu1 %577  ;;  %v580_v32 = vpop.permute.xlu0 %579 }
  0xfd   :  { %1511 = vmatmul.mubr.msk.f32.gmra.mrb[10].mxu0 %vm601_vm4, %v576_v30 }
  0xfe   :  { %1513 = vmatprep.mubr.msk.f32.mxu0 %vm1665_vm3, %v1663_v10 }
  0xff   :  { %v582_v33 = vpop.permute.xlu1 %581  ;;  %v584_v34 = vpop.permute.xlu0 %583 }
 0x101   :  { %1514 = vmatmul.mubr.msk.f32.gmra.mrb[12].mxu0 %vm601_vm4, %v578_v31 }
 0x102   :  { %1516 = vmatprep.mubr.msk.f32.mxu0 %vm1665_vm3, %v1663_v10 }
 0x103   :  { %v586_v35 = vpop.permute.xlu1 %585  ;;  %v588_v36 = vpop.permute.xlu0 %587 }
 0x105   :  { %1517 = vmatmul.mubr.msk.f32.gmra.mrb[14].mxu0 %vm601_vm4, %v580_v32 }
 0x106   :  { %1519 = vmatprep.mubr.msk.f32.mxu0 %vm1665_vm3, %v1663_v10 }
 0x107   :  { %v590_v37 = vpop.permute.xlu1 %589  ;;  %v592_v38 = vpop.permute.xlu0 %591 }
 0x109   :  { %1520 = vmatmul.mubr.msk.f32.gmra.mrb[16].mxu0 %vm601_vm4, %v582_v33 }
 0x10a   :  { %1522 = vmatprep.mubr.msk.f32.mxu0 %vm1665_vm3, %v1663_v10 }
 0x10b   :  { %v594_v39 = vpop.permute.xlu1 %593  ;;  %v596_v40 = vpop.permute.xlu0 %595 }
 0x10d   :  { %1523 = vmatmul.mubr.msk.f32.gmra.mrb[18].mxu0 %vm601_vm4, %v584_v34 }
 0x10e   :  { %1525 = vmatprep.mubr.msk.f32.mxu0 %vm1665_vm3, %v1663_v10 }
 0x111   :  { %1526 = vmatmul.mubr.msk.f32.gmra.mrb[20].mxu0 %vm601_vm4, %v586_v35 }
 0x112   :  { %1528 = vmatprep.mubr.msk.f32.mxu0 %vm1665_vm3, %v1663_v10 }
 0x115   :  { %1529 = vmatmul.mubr.msk.f32.gmra.mrb[22].mxu0 %vm601_vm4, %v588_v36 }
 0x116   :  { %1531 = vmatprep.mubr.msk.f32.mxu0 %vm1665_vm3, %v1663_v10 }
 0x119   :  { %1532 = vmatmul.mubr.msk.f32.gmra.mrb[24].mxu0 %vm601_vm4, %v590_v37 }
 0x11a   :  { %1534 = vmatprep.mubr.msk.f32.mxu0 %vm1665_vm3, %v1663_v10 }
 0x11d   :  { %1535 = vmatmul.mubr.msk.f32.gmra.mrb[26].mxu0 %vm601_vm4, %v592_v38 }
 0x11e   :  { %1537 = vmatprep.mubr.msk.f32.mxu0 %vm1665_vm3, %v1663_v10 }
 0x121   :  { %1538 = vmatmul.mubr.msk.f32.gmra.mrb[28].mxu0 %vm601_vm4, %v594_v39 }
 0x122   :  { %1540 = vmatprep.mubr.msk.f32.mxu0 %vm1665_vm3, %v1663_v10 }
 0x125   :  { %1541 = vmatmul.mubr.msk.f32.gmra.mrb[30].mxu0 %vm601_vm4, %v596_v40 }
 0x126   :  { %1543 = vmatprep.mubr.msk.f32.mxu0 %vm1665_vm3, %v1663_v10 }
 0x14d   :  { %v1877_v42 = vpop.f32.mrb[0].mxu0 }
 0x14e   :  { %v1879_v43 = vpop.f32.mrb[1].mxu0  ;;  %v186_v49 = vmul.f32 %v1877_v42, %v1877_v42 }
 0x14f   :  { %v185_v52 = vmul.f32 %v1879_v43, %v1879_v43 }
 0x15e   :  { %v598_v46 = vpop.permute.xlu1 %597 }
 0x15f   :  { %1544 = vmatmul.mubr.msk.f32.gmra.mrb[32].mxu0 %vm601_vm4, %v598_v46 }
 0x160   :  { %1546 = vmatprep.mubr.msk.f32.mxu0 %vm1665_vm3, %v1663_v10 }
 0x166   :  { %v600_v47 = vpop.permute.xlu0 %599 }
 0x167   :  { %1547 = vmatmul.mubr.msk.f32.gmra.mrb[34].mxu0 %vm601_vm4, %v600_v47 }
 0x168   :  { %1585 = vmatprep.mubr.msk.f32.mxu0 %vm1665_vm3, %v1663_v10 }
 0x1bf   :  { %v1899_v48 = vpop.f32.mrb[2].mxu0 }
 0x1c0   :  { %v188_v50 = vmul.f32 %v1899_v48, %v1899_v48  ;;  %v1905_v51 = vpop.f32.mrb[3].mxu0 }
 0x1c1   :  { %v187_v53 = vmul.f32 %v1905_v51, %v1905_v51 }
 0x1c2   :  { %v190_v54 = vadd.f32 %v188_v50, %v186_v49 }
 0x1c3   :  { %v189_v55 = vadd.f32 %v187_v53, %v185_v52 }
 0x1c4   :  { %v1911_v56 = vpop.f32.mrb[4].mxu0 }
 0x1c5   :  { %v192_v57 = vmul.f32 %v1911_v56, %v1911_v56  ;;  %v1915_v58 = vpop.f32.mrb[5].mxu0 }
 0x1c6   :  { %v191_v59 = vmul.f32 %v1915_v58, %v1915_v58 }
 0x1c7   :  { %v194_v60 = vadd.f32 %v192_v57, %v190_v54 }
 0x1c8   :  { %v193_v61 = vadd.f32 %v191_v59, %v189_v55  ;;  %v702_v62 = vpop.f32.mrb[6].mxu0 }
 0x1c9   :  { %v196_v63 = vmax.f32 %v194_v60, 1e-08  ;;  %1586 = vmatmul.mubr.msk.f32.vlgmr.msra.gmra.mrb[36].mxu0 %vm841_vm8, %v702_v62  ;;  %v1506_v7 = vpop.f32.mrb[7].mxu0  ;;  %v776_v27 = vmul.f32 %v702_v62, %v702_v62 }
 0x1ca   :  { %v195_v8 = vmax.f32 %v193_v61, 1e-08  ;;  %1588 = vmatprep.mubr.msk.f32.mxu0 %vm1665_vm3, %v1663_v10 }
 0x1cb   :  { %1645 = vrsqrt.f32 %v196_v63  ;;  %vm206_vm9 = vcmp.eq.f32.partialorder %v196_v63, inf  ;;  %v209_v24 = vand.u32 2147483648, %v196_v63  ;;  %vm208_vm13 = vcmp.eq.f32.partialorder %v196_v63, 0.0 }
 0x1cc   :  { %v707_v9 = vpop.f32.mrb[8].mxu0  ;;  %1647 = vrsqrt.f32 %v195_v8  ;;  %vm199_vm10 = vcmp.eq.f32.partialorder %v195_v8, inf  ;;  %v202_v20 = vand.u32 2147483648, %v195_v8  ;;  %vm201_vm12 = vcmp.eq.f32.partialorder %v195_v8, 0.0 }
 0x1cd   :  { %1589 = vmatmul.mubr.msk.f32.gmra.mrb[38].mxu0 %vm841_vm8, %v707_v9  ;;  %v1509_v11 = vpop.f32.mrb[9].mxu0  ;;  %v777_v33 = vmul.f32 %v707_v9, %v707_v9 }
 0x1ce   :  { %1591 = vmatprep.mubr.msk.f32.mxu0 %vm1665_vm3, %v1663_v10 }
 0x1d0   :  { %v712_v12 = vpop.f32.mrb[10].mxu0 }
 0x1d1   :  { %1592 = vmatmul.mubr.msk.f32.gmra.mrb[40].mxu0 %vm841_vm8, %v712_v12  ;;  %v1512_v13 = vpop.f32.mrb[11].mxu0  ;;  %v778_v38 = vmul.f32 %v712_v12, %v712_v12 }
 0x1d2   :  { %1594 = vmatprep.mubr.msk.f32.mxu0 %vm1665_vm3, %v1663_v10 }
 0x1d4   :  { %v717_v14 = vpop.f32.mrb[12].mxu0 }
 0x1d5   :  { %v1646_v15 = vpop.eup %1645  ;;  %1595 = vmatmul.mubr.msk.f32.gmra.mrb[42].mxu0 %vm841_vm8, %v717_v14  ;;  %v1515_v16 = vpop.f32.mrb[13].mxu0  ;;  %v779_v46 = vmul.f32 %v717_v14, %v717_v14 }
 0x1d6   :  { %v1648_v17 = vpop.eup %1647  ;;  %v205_v18 = vmul.f32 %v1646_v15, %v196_v63  ;;  %1597 = vmatprep.mubr.msk.f32.mxu0 %vm1665_vm3, %v1663_v10 }
 0x1d7   :  { %v198_v19 = vmul.f32 %v1648_v17, %v195_v8  ;;  %v49_v17 = vld [vmem:[%s2150_s8] sm:$0xff]  ;;  %s1666_s8 = smov 16  }
 0x1d8   :  { %v207_v21 = vsel %vm206_vm9, %v196_v63, %v205_v18  ;;  %v722_v22 = vpop.f32.mrb[14].mxu0 }
 0x1d9   :  { %v200_v23 = vsel %vm199_vm10, %v195_v8, %v198_v19  ;;  %1598 = vmatmul.mubr.msk.f32.gmra.mrb[44].mxu0 %vm841_vm8, %v722_v22  ;;  %v1518_v25 = vpop.f32.mrb[15].mxu0  ;;  %v210_v28 = vsel %vm208_vm13, %v209_v24, %v207_v21  ;;  %v780_v50 = vmul.f32 %v722_v22, %v722_v22  ;;  %vm535_vm13 = vcmask 195584  }
 0x1da   :  { %v203_v26 = vsel %vm201_vm12, %v202_v20, %v200_v23  ;;  %1600 = vmatprep.mubr.msk.f32.mxu0 %vm1665_vm3, %v1663_v10  ;;  %vm951_vm12 = vcmask 64512  }
 0x1db   :  { %1483 = vmatprep.mubr.msk.f32.mxu1 %vm211_vm11, %v203_v26 }
 0x1dc   :  { %1484 = vmatmul.mubr.msk.f32.vlgmr.msra.gmra.mrb[0].mxu1 %vm211_vm11, %v210_v28  ;;  %v727_v30 = vpop.f32.mrb[16].mxu0 }
 0x1dd   :  { %1487 = vmatpush3.msk.msra.mxu1 %vm302_vm7, %v1889_v45  ;;  %1488 = vmatprep.mubr.msk.f32.mxu1 %vm297_vm14, %v1743_v0  ;;  %v781_v31 = vmul.f32 %v727_v30, %v727_v30  ;;  %v1521_v32 = vpop.f32.mrb[17].mxu0  ;;  %v50_v45 = vld [vmem:[%s2149_s9] sm:$0x3] }
 0x1de   :  { %1601 = vmatmul.mubr.msk.f32.gmra.mrb[46].mxu0 %vm841_vm8, %v727_v30  ;;  %1491 = vmatprep.subr.msk.mxu1 %vm218_vm6, %v47_v29 }
 0x1df   :  { %v786_v34 = vadd.f32 %v781_v31, %v776_v27 }
 0x1e0   :  { %v1945_v35 = vpop.f32.mrb[18].mxu0 }
 0x1e1   :  { %v782_v36 = vmul.f32 %v1945_v35, %v1945_v35  ;;  %v1524_v37 = vpop.f32.mrb[19].mxu0 }
 0x1e3   :  { %v787_v39 = vadd.f32 %v782_v36, %v777_v33 }
 0x1e4   :  { %1489 = vmatmul.mubr.msk.f32.vlgmr.msra.gmra.mrb[0].mxu1 %vm297_vm14, %v1751_v1  ;;  %v1951_v0 = vpop.f32.mrb[20].mxu0  ;;  %vm538_vm14 = vcmask 228352  }
 0x1e5   :  { %1493 = vmatprep.mubr.msk.f32.mxu1 %vm211_vm11, %v1879_v43  ;;  %1492 = vmatpush3.msk.msra.mxu1 %vm218_vm6, %v47_v29  ;;  %v783_v40 = vmul.f32 %v1951_v0, %v1951_v0  ;;  %v1527_v44 = vpop.f32.mrb[21].mxu0 }
 0x1e6   :  { %1549 = vmatprep.subr.mxu1 %v1663_v10 }
 0x1e7   :  { %v788_v47 = vadd.f32 %v783_v40, %v778_v38 }
 0x1e8   :  { %1494 = vmatmul.mubr.msk.f32.vlgmr.msra.gmra.mrb[2].mxu1 %vm211_vm11, %v1877_v42  ;;  %v1964_v1 = vpop.f32.mrb[22].mxu0 }
 0x1e9   :  { %1496 = vmatprep.mubr.msk.f32.mxu1 %vm211_vm11, %v1905_v51  ;;  %v784_v43 = vmul.f32 %v1964_v1, %v1964_v1  ;;  %v1530_v49 = vpop.f32.mrb[23].mxu0  ;;  %1550 = vmatpush3.msk.msra.mxu1 %vm857_vm5, %v50_v45 }
 0x1ea   :  { %1566 = vmatprep.subr.mxu1 %v1663_v10 }
 0x1eb   :  { %v789_v52 = vadd.f32 %v784_v43, %v779_v46 }
 0x1ec   :  { %1497 = vmatmul.mubr.msk.f32.gmra.mrb[4].mxu1 %vm211_vm11, %v1899_v48  ;;  %v1974_v53 = vpop.f32.mrb[24].mxu0 }
 0x1ed   :  { %1499 = vmatprep.mubr.msk.f32.mxu1 %vm211_vm11, %v1915_v58  ;;  %v785_v42 = vmul.f32 %v1974_v53, %v1974_v53  ;;  %v1533_v51 = vpop.f32.mrb[25].mxu0 }
 0x1ef   :  { %v790_v54 = vadd.f32 %v785_v42, %v780_v50 }
 0x1f0   :  { %1500 = vmatmul.mubr.msk.f32.gmra.mrb[6].mxu1 %vm211_vm11, %v1911_v56  ;;  %v1982_v55 = vpop.f32.mrb[26].mxu0 }
 0x1f1   :  { %v791_v57 = vmul.f32 %v1982_v55, %v1982_v55  ;;  %v1536_v59 = vpop.f32.mrb[27].mxu0  ;;  %1551 = vmatprep.mubr.msk.f32.mxu1 %vm1665_vm3, %v1663_v10 }
 0x1f3   :  { %v796_v48 = vadd.f32 %v791_v57, %v786_v34 }
 0x1f4   :  { %v1988_v60 = vpop.f32.mrb[28].mxu0 }
 0x1f5   :  { %v801_v58 = vmax.f32 %v796_v48, 1e-08  ;;  %v792_v61 = vmul.f32 %v1988_v60, %v1988_v60  ;;  %v1539_v62 = vpop.f32.mrb[29].mxu0 }
 0x1f7   :  { %1649 = vrsqrt.f32 %v801_v58  ;;  %v797_v63 = vadd.f32 %v792_v61, %v787_v39  ;;  %vm808_vm15 = vcmp.eq.f32.partialorder %v801_v58, inf  ;;  %v811_v14 = vand.u32 2147483648, %v801_v58 }
 0x1f8   :  { %v1992_v56 = vpop.f32.mrb[30].mxu0  ;;  %vm810_vm0 = vcmp.eq.f32.partialorder %v801_v58, 0.0 }
 0x1f9   :  { %v802_v7 = vmax.f32 %v797_v63, 1e-08  ;;  %v793_v8 = vmul.f32 %v1992_v56, %v1992_v56  ;;  %v1542_v9 = vpop.f32.mrb[31].mxu0 }
 0x1fb   :  { %v798_v11 = vadd.f32 %v793_v8, %v788_v47  ;;  %1651 = vrsqrt.f32 %v802_v7  ;;  %vm815_vm1 = vcmp.eq.f32.partialorder %v802_v7, inf  ;;  %v818_v20 = vand.u32 2147483648, %v802_v7 }
 0x1fc   :  { %vm817_vm2 = vcmp.eq.f32.partialorder %v802_v7, 0.0 }
 0x1fd   :  { %v803_v12 = vmax.f32 %v798_v11, 1e-08 }
 0x1ff   :  { %1653 = vrsqrt.f32 %v803_v12  ;;  %vm822_vm4 = vcmp.eq.f32.partialorder %v803_v12, inf  ;;  %v825_v25 = vand.u32 2147483648, %v803_v12  ;;  %vm824_vm6 = vcmp.eq.f32.partialorder %v803_v12, 0.0 }
 0x201   :  { %v1650_v13 = vpop.eup %1649 }
 0x202   :  { %v807_v15 = vmul.f32 %v1650_v13, %v801_v58 }
 0x204   :  { %v809_v16 = vsel %vm808_vm15, %v801_v58, %v807_v15  ;;  %vm1327_vm15 = vcmask 179200  }
 0x205   :  { %v1652_v18 = vpop.eup %1651  ;;  %v812_v19 = vsel %vm810_vm0, %v811_v14, %v809_v16 }
 0x206   :  { %1552 = vmatmul.mubr.msk.f32.vlgmr.msra.gmra.mrb[8].mxu1 %vm841_vm8, %v812_v19  ;;  %v814_v21 = vmul.f32 %v1652_v18, %v802_v7  ;;  %v1389_v19 = vld [vmem:[%s2151_s10] ss:$0 sm:$0xff] }
 0x207   :  { %1554 = vmatprep.mubr.msk.f32.mxu1 %vm1665_vm3, %v1663_v10  ;;  %1567 = vmatpush3.msra.mxu1 %v49_v17 }
 0x208   :  { %v816_v22 = vsel %vm815_vm1, %v802_v7, %v814_v21  ;;  %1630 = vmatprep.subr.mxu1 %v1663_v10 }
 0x209   :  { %v1654_v23 = vpop.eup %1653  ;;  %v819_v24 = vsel %vm817_vm2, %v818_v20, %v816_v22 }
 0x20a   :  { %1555 = vmatmul.mubr.msk.f32.gmra.mrb[10].mxu1 %vm841_vm8, %v819_v24  ;;  %v821_v26 = vmul.f32 %v1654_v23, %v803_v12 }
 0x20b   :  { %1557 = vmatprep.mubr.msk.f32.mxu1 %vm1665_vm3, %v1663_v10 }
 0x20c   :  { %v823_v27 = vsel %vm822_vm4, %v803_v12, %v821_v26 }
 0x20d   :  { %v826_v28 = vsel %vm824_vm6, %v825_v25, %v823_v27 }
 0x20e   :  { %1558 = vmatmul.mubr.msk.f32.gmra.mrb[12].mxu1 %vm841_vm8, %v826_v28 }
 0x20f   :  { %1560 = vmatprep.mubr.msk.f32.mxu1 %vm1665_vm3, %v1663_v10 }
 0x232   :  { %v767_v29 = vpop.f32.mrb[32].mxu0 }
 0x233   :  { %v794_v30 = vmul.f32 %v767_v29, %v767_v29  ;;  %v1545_v31 = vpop.f32.mrb[33].mxu0 }
 0x235   :  { %v799_v32 = vadd.f32 %v794_v30, %v789_v52 }
 0x237   :  { %v804_v33 = vmax.f32 %v799_v32, 1e-08 }
 0x239   :  { %1655 = vrsqrt.f32 %v804_v33  ;;  %vm829_vm7 = vcmp.eq.f32.partialorder %v804_v33, inf  ;;  %v832_v45 = vand.u32 2147483648, %v804_v33  ;;  %vm831_vm9 = vcmp.eq.f32.partialorder %v804_v33, 0.0 }
 0x23a   :  { %v772_v34 = vpop.f32.mrb[34].mxu0 }
 0x23b   :  { %v795_v36 = vmul.f32 %v772_v34, %v772_v34  ;;  %v1548_v37 = vpop.f32.mrb[35].mxu0 }
 0x23d   :  { %v800_v38 = vadd.f32 %v795_v36, %v790_v54 }
 0x23f   :  { %v805_v39 = vmax.f32 %v800_v38, 1e-08 }
 0x241   :  { %1657 = vrsqrt.f32 %v805_v39  ;;  %vm836_vm10 = vcmp.eq.f32.partialorder %v805_v39, inf  ;;  %v839_v50 = vand.u32 2147483648, %v805_v39  ;;  %vm838_vm11 = vcmp.eq.f32.partialorder %v805_v39, 0.0 }
 0x243   :  { %v1656_v40 = vpop.eup %1655 }
 0x244   :  { %v828_v44 = vmul.f32 %v1656_v40, %v804_v33 }
 0x246   :  { %v830_v46 = vsel %vm829_vm7, %v804_v33, %v828_v44 }
 0x247   :  { %v833_v47 = vsel %vm831_vm9, %v832_v45, %v830_v46 }
 0x248   :  { %1561 = vmatmul.mubr.msk.f32.gmra.mrb[14].mxu1 %vm841_vm8, %v833_v47 }
 0x249   :  { %1563 = vmatprep.mubr.msk.f32.mxu1 %vm1665_vm3, %v1663_v10 }
 0x24b   :  { %v1658_v43 = vpop.eup %1657 }
 0x24c   :  { %v835_v49 = vmul.f32 %v1658_v43, %v805_v39 }
 0x24e   :  { %v837_v52 = vsel %vm836_vm10, %v805_v39, %v835_v49  ;;  %v1354_v39 = vld [vmem:[%s2152_s5] ss:$0 sm:$0xff] }
 0x24f   :  { %v840_v42 = vsel %vm838_vm11, %v839_v50, %v837_v52 }
 0x250   :  { %1564 = vmatmul.mubr.msk.f32.gmra.mrb[16].mxu1 %vm841_vm8, %v840_v42 }
 0x251   :  { %1568 = vmatprep.mubr.msk.f32.mxu1 %vm1665_vm3, %v1663_v10 }
 0x254   :  { %1569 = vmatmul.mubr.msk.f32.vlgmr.msra.gmra.mrb[18].mxu1 %vm951_vm12, %v1759_v2 }
 0x255   :  { %1631 = vmatpush3.msk.msra.mxu1 %vm857_vm5, %v1873_v41  ;;  %1571 = vmatprep.mubr.msk.f32.mxu1 %vm1665_vm3, %v1663_v10  ;;  %vm1316_vm5 = vcmask 146432  }
 0x258   :  { %1572 = vmatmul.mubr.msk.f32.gmra.mrb[20].mxu1 %vm951_vm12, %v1764_v3 }
 0x259   :  { %1574 = vmatprep.mubr.msk.f32.mxu1 %vm1665_vm3, %v1663_v10 }
 0x25c   :  { %1575 = vmatmul.mubr.msk.f32.gmra.mrb[22].mxu1 %vm951_vm12, %v1771_v4 }
 0x25d   :  { %1577 = vmatprep.mubr.msk.f32.mxu1 %vm1665_vm3, %v1663_v10 }
 0x260   :  { %1578 = vmatmul.mubr.msk.f32.gmra.mrb[24].mxu1 %vm951_vm12, %v1776_v5 }
 0x261   :  { %1580 = vmatprep.mubr.msk.f32.mxu1 %vm1665_vm3, %v1663_v10 }
 0x264   :  { %1581 = vmatmul.mubr.msk.f32.gmra.mrb[26].mxu1 %vm951_vm12, %v1783_v6 }
 0x265   :  { %1603 = vmatprep.mubr.msk.f32.mxu1 %vm1665_vm3, %v1663_v10 }
 0x268   :  { %1604 = vmatmul.mubr.msk.f32.vlgmr.msra.gmra.mrb[28].mxu1 %vm841_vm8, %v1945_v35 }
 0x269   :  { %1606 = vmatprep.mubr.msk.f32.mxu1 %vm1665_vm3, %v1663_v10 }
 0x26c   :  { %1607 = vmatmul.mubr.msk.f32.gmra.mrb[30].mxu1 %vm841_vm8, %v1951_v0 }
 0x26d   :  { %1609 = vmatprep.mubr.msk.f32.mxu1 %vm1665_vm3, %v1663_v10 }
 0x270   :  { %1610 = vmatmul.mubr.msk.f32.gmra.mrb[32].mxu1 %vm841_vm8, %v1964_v1 }
 0x271   :  { %1612 = vmatprep.mubr.msk.f32.mxu1 %vm1665_vm3, %v1663_v10 }
 0x274   :  { %1613 = vmatmul.mubr.msk.f32.gmra.mrb[34].mxu1 %vm841_vm8, %v1974_v53 }
 0x275   :  { %1615 = vmatprep.mubr.msk.f32.mxu1 %vm1665_vm3, %v1663_v10 }
 0x278   :  { %1616 = vmatmul.mubr.msk.f32.gmra.mrb[36].mxu1 %vm841_vm8, %v1982_v55 }
 0x279   :  { %1618 = vmatprep.mubr.msk.f32.mxu1 %vm1665_vm3, %v1663_v10 }
 0x27c   :  { %1619 = vmatmul.mubr.msk.f32.gmra.mrb[38].mxu1 %vm841_vm8, %v1988_v60 }
 0x27d   :  { %1621 = vmatprep.mubr.msk.f32.mxu1 %vm1665_vm3, %v1663_v10 }
 0x280   :  { %1622 = vmatmul.mubr.msk.f32.gmra.mrb[40].mxu1 %vm841_vm8, %v1992_v56 }
 0x281   :  { %1624 = vmatprep.mubr.msk.f32.mxu1 %vm1665_vm3, %v1663_v10 }
 0x284   :  { %1625 = vmatmul.mubr.msk.f32.gmra.mrb[42].mxu1 %vm841_vm8, %v767_v29 }
 0x285   :  { %1627 = vmatprep.mubr.msk.f32.mxu1 %vm1665_vm3, %v1663_v10  ;;  %vm529_vm3 = vcmask 130048  }
 0x288   :  { %1628 = vmatmul.mubr.msk.f32.gmra.mrb[44].mxu1 %vm841_vm8, %v772_v34  ;;  %vm532_vm8 = vcmask 162816  }
 0x29c   :  { %v1177_v2 = vpop.f32.mrb[36].mxu0 }
 0x29d   :  { %v1587_v3 = vpop.f32.mrb[37].mxu0  ;;  %1256 = vrot.lane.b32.xlu1 %v1177_v2, %s1666_s8 }
 0x2a0   :  { %v1182_v4 = vpop.f32.mrb[38].mxu0 }
 0x2a1   :  { %1258 = vrot.lane.b32.xlu0 %v1182_v4, %s1666_s8  ;;  %v1590_v5 = vpop.f32.mrb[39].mxu0 }
 0x2a4   :  { %v1187_v6 = vpop.f32.mrb[40].mxu0 }
 0x2a5   :  { %v1593_v41 = vpop.f32.mrb[41].mxu0  ;;  %1260 = vrot.lane.b32.xlu1 %v1187_v6, %s1666_s8 }
 0x2a8   :  { %v1192_v35 = vpop.f32.mrb[42].mxu0 }
 0x2a9   :  { %1262 = vrot.lane.b32.xlu0 %v1192_v35, %s1666_s8  ;;  %v1596_v0 = vpop.f32.mrb[43].mxu0 }
 0x2ac   :  { %v1197_v1 = vpop.f32.mrb[44].mxu0 }
 0x2ad   :  { %v1599_v53 = vpop.f32.mrb[45].mxu0  ;;  %1264 = vrot.lane.b32.xlu1 %v1197_v1, %s1666_s8 }
 0x2b1   :  { %v1202_v51 = vpop.f32.mrb[46].mxu0 }
 0x2b2   :  { %1276 = vrot.lane.b32.xlu0 %v1202_v51, %s1667_s17  ;;  %v1602_v10 = vpop.f32.mrb[47].mxu0 }
 0x2b7   :  { %v2065_v54 = vpop.f32.mrb[0].mxu1 }
 0x2b8   :  { %v372_v55 = vpop.f32.mrb[1].mxu1  ;;  %v388_v52 = vadd.f32 %v2065_v54, %v1354_v39 }
 0x2b9   :  { %v387_v46 = vadd.f32 %v1354_v39, %v372_v55 }
 0x2bb   :  { %v1495_v57 = vpop.f32.mrb[2].mxu1 }
 0x2bc   :  { %v476_v59 = vpop.f32.mrb[3].mxu1  ;;  %509 = vrot.lane.b32.xlu0 %v1495_v57, %s1666_s8 }
 0x2bd   :  { %507 = vrot.lane.b32.xlu1 %v476_v59, %s1666_s8 }
 0x2bf   :  { %v1498_v48 = vpop.f32.mrb[4].mxu1 }
 0x2c0   :  { %v486_v60 = vpop.f32.mrb[5].mxu1 }
 0x2c1   :  { %517 = vrot.lane.b32.xlu1 %v1498_v48, %s1668_s18  ;;  %515 = vrot.lane.b32.xlu0 %v486_v60, %s1668_s18 }
 0x2c3   :  { %v1501_v58 = vpop.f32.mrb[6].mxu1 }
 0x2c4   :  { %v496_v61 = vpop.f32.mrb[7].mxu1 }
 0x2c5   :  { %523 = vrot.lane.b32.xlu1 %v496_v61, %s1669_s0  ;;  %525 = vrot.lane.b32.xlu0 %v1501_v58, %s1669_s0 }
 0x2d9   :  { %v927_v62 = vpop.f32.mrb[8].mxu1 }
 0x2da   :  { %v1553_v63 = vpop.f32.mrb[9].mxu1 }
 0x2dd   :  { %v932_v56 = vpop.f32.mrb[10].mxu1 }
 0x2de   :  { %v1556_v7 = vpop.f32.mrb[11].mxu1 }
 0x2e1   :  { %v937_v8 = vpop.f32.mrb[12].mxu1 }
 0x2e2   :  { %v1559_v9 = vpop.f32.mrb[13].mxu1 }
 0x30f   :  { %v1257_v14 = vpop.permute.xlu1 %1256 }
 0x313   :  { %v1259_v13 = vpop.permute.xlu0 %1258 }
 0x317   :  { %v1261_v17 = vpop.permute.xlu1 %1260 }
 0x31b   :  { %v942_v11 = vpop.f32.mrb[14].mxu1  ;;  %v1263_v15 = vpop.permute.xlu0 %1262 }
 0x31c   :  { %v1562_v12 = vpop.f32.mrb[15].mxu1 }
 0x31f   :  { %v1265_v24 = vpop.permute.xlu1 %1264 }
 0x323   :  { %v947_v16 = vpop.f32.mrb[16].mxu1 }
 0x324   :  { %v1565_v18 = vpop.f32.mrb[17].mxu1  ;;  %v1277_v23 = vpop.permute.xlu0 %1276 }
 0x327   :  { %v1028_v20 = vpop.f32.mrb[18].mxu1 }
 0x328   :  { %v1029_v21 = vadd.f32 %v1028_v20, %v927_v62  ;;  %v1570_v22 = vpop.f32.mrb[19].mxu1 }
 0x32a   :  { %v1058_v25 = vadd.f32 %v1389_v19, %v1029_v21 }
 0x32b   :  { %v1033_v26 = vpop.f32.mrb[20].mxu1 }
 0x32c   :  { %v1311_v27 = vsel %vm529_vm3, %v1058_v25, %v1257_v14  ;;  %v1034_v28 = vadd.f32 %v1033_v26, %v932_v56  ;;  %v1573_v29 = vpop.f32.mrb[21].mxu1 }
 0x32d   :  { %v2074_v30 = vsel %vm1316_vm5, %v1311_v27, %v1277_v23 }
 0x32e   :  { %v1059_v31 = vadd.f32 %v1389_v19, %v1034_v28  ;;  %v510_v32 = vpop.permute.xlu0 %509 }
 0x32f   :  { %v1038_v33 = vpop.f32.mrb[22].mxu1  ;;  %v508_v34 = vpop.permute.xlu1 %507  ;;  %v531_v3 = vsel %vm529_vm3, %v388_v52, %v510_v32 }
 0x330   :  { %v1039_v36 = vadd.f32 %v1038_v33, %v937_v8  ;;  %v1576_v37 = vpop.f32.mrb[23].mxu1  ;;  %v2077_v38 = vsel %vm529_vm3, %v1059_v31, %v1259_v13  ;;  %v530_v42 = vsel %vm529_vm3, %v387_v46, %v508_v34 }
 0x332   :  { %v1060_v40 = vadd.f32 %v1389_v19, %v1039_v36 }
 0x333   :  { %v1043_v44 = vpop.f32.mrb[24].mxu1  ;;  %v518_v45 = vpop.permute.xlu1 %517 }
 0x334   :  { %v1044_v47 = vadd.f32 %v1043_v44, %v942_v11  ;;  %v516_v43 = vpop.permute.xlu0 %515  ;;  %v1579_v49 = vpop.f32.mrb[25].mxu1  ;;  %v2083_v50 = vsel %vm529_vm3, %v1060_v40, %v1261_v17  ;;  %v534_v41 = vsel %vm532_vm8, %v531_v3, %v518_v45 }
 0x335   :  { %v533_v4 = vsel %vm532_vm8, %v530_v42, %v516_v43 }
 0x336   :  { %v1061_v2 = vadd.f32 %v1389_v19, %v1044_v47 }
 0x337   :  { %v1048_v5 = vpop.f32.mrb[26].mxu1  ;;  %v524_v6 = vpop.permute.xlu1 %523 }
 0x338   :  { %v1049_v35 = vadd.f32 %v1048_v5, %v947_v16  ;;  %v536_v0 = vsel %vm535_vm13, %v533_v4, %v524_v6  ;;  %v526_v1 = vpop.permute.xlu0 %525  ;;  %v1582_v53 = vpop.f32.mrb[27].mxu1  ;;  %v1314_v51 = vsel %vm529_vm3, %v1061_v2, %v1263_v15 }
 0x339   :  { %539 = vst.msk [vmem:[%s2153_s12] sm:$0xff] %vm538_vm14, %v536_v0  ;;  %v537_v10 = vsel %vm535_vm13, %v534_v41, %v526_v1 }
 0x33a   :  { %v1062_v54 = vadd.f32 %v1389_v19, %v1049_v35  ;;  %540 = vst.msk [vmem:[%s2153_s12 + $0x8] sm:$0xff] %vm538_vm14, %v537_v10 }
 0x33b   :  { %v1207_v55 = vpop.f32.mrb[28].mxu1 }
 0x33c   :  { %v1605_v57 = vpop.f32.mrb[29].mxu1  ;;  %1278 = vrot.lane.b32.xlu1 %v1207_v55, %s1667_s17  ;;  %v1315_v59 = vsel %vm529_vm3, %v1062_v54, %v1265_v24 }
 0x33f   :  { %v1212_v48 = vpop.f32.mrb[30].mxu1 }
 0x340   :  { %v1608_v60 = vpop.f32.mrb[31].mxu1  ;;  %1280 = vrot.lane.b32.xlu0 %v1212_v48, %s1667_s17 }
 0x343   :  { %v1217_v58 = vpop.f32.mrb[32].mxu1 }
 0x344   :  { %v1611_v61 = vpop.f32.mrb[33].mxu1  ;;  %1282 = vrot.lane.b32.xlu1 %v1217_v58, %s1667_s17 }
 0x347   :  { %v1222_v62 = vpop.f32.mrb[34].mxu1 }
 0x348   :  { %v1614_v63 = vpop.f32.mrb[35].mxu1  ;;  %1284 = vrot.lane.b32.xlu0 %v1222_v62, %s1667_s17 }
 0x34b   :  { %v1227_v56 = vpop.f32.mrb[36].mxu1 }
 0x34c   :  { %v1617_v7 = vpop.f32.mrb[37].mxu1  ;;  %1296 = vrot.lane.b32.xlu1 %v1227_v56, %s1668_s18 }
 0x34f   :  { %v1232_v8 = vpop.f32.mrb[38].mxu1 }
 0x350   :  { %v1620_v9 = vpop.f32.mrb[39].mxu1  ;;  %1298 = vrot.lane.b32.xlu0 %v1232_v8, %s1668_s18 }
 0x353   :  { %v1237_v11 = vpop.f32.mrb[40].mxu1 }
 0x354   :  { %v1623_v12 = vpop.f32.mrb[41].mxu1  ;;  %1300 = vrot.lane.b32.xlu1 %v1237_v11, %s1668_s18 }
 0x357   :  { %v1242_v13 = vpop.f32.mrb[42].mxu1 }
 0x358   :  { %v1626_v14 = vpop.f32.mrb[43].mxu1  ;;  %1302 = vrot.lane.b32.xlu0 %v1242_v13, %s1668_s18 }
 0x35b   :  { %v1247_v15 = vpop.f32.mrb[44].mxu1 }
 0x35c   :  { %v1629_v16 = vpop.f32.mrb[45].mxu1  ;;  %1304 = vrot.lane.b32.xlu1 %v1247_v15, %s1668_s18 }
 0x3ae   :  { %v1279_v17 = vpop.permute.xlu1 %1278 }
 0x3af   :  { %v1318_v23 = vsel %vm1316_vm5, %v2077_v38, %v1279_v17 }
 0x3b2   :  { %v1281_v18 = vpop.permute.xlu0 %1280 }
 0x3b3   :  { %v1319_v26 = vsel %vm1316_vm5, %v2083_v50, %v1281_v18 }
 0x3b6   :  { %v1283_v19 = vpop.permute.xlu1 %1282 }
 0x3b7   :  { %v1320_v29 = vsel %vm1316_vm5, %v1314_v51, %v1283_v19 }
 0x3ba   :  { %v1285_v20 = vpop.permute.xlu0 %1284 }
 0x3bb   :  { %v1321_v32 = vsel %vm1316_vm5, %v1315_v59, %v1285_v20 }
 0x3be   :  { %v1297_v21 = vpop.permute.xlu1 %1296 }
 0x3bf   :  { %v1322_v22 = vsel %vm532_vm8, %v2074_v30, %v1297_v21 }
 0x3c0   :  { %1328 = vst.msk [vmem:[%s2154_s13] sm:$0xff] %vm1327_vm15, %v1322_v22 }
 0x3c2   :  { %v1299_v24 = vpop.permute.xlu0 %1298 }
 0x3c3   :  { %v1323_v25 = vsel %vm532_vm8, %v1318_v23, %v1299_v24 }
 0x3c4   :  { %1329 = vst.msk [vmem:[%s2154_s13 + $0x8] sm:$0xff] %vm1327_vm15, %v1323_v25 }
 0x3c6   :  { %v1301_v27 = vpop.permute.xlu1 %1300 }
 0x3c7   :  { %v1324_v28 = vsel %vm532_vm8, %v1319_v26, %v1301_v27 }
 0x3c8   :  { %1330 = vst.msk [vmem:[%s2154_s13 + $0x10] sm:$0xff] %vm1327_vm15, %v1324_v28 }
 0x3ca   :  { %v1303_v30 = vpop.permute.xlu0 %1302 }
 0x3cb   :  { %v1325_v31 = vsel %vm532_vm8, %v1320_v29, %v1303_v30 }
 0x3cc   :  { %1331 = vst.msk [vmem:[%s2154_s13 + $0x18] sm:$0xff] %vm1327_vm15, %v1325_v31 }
 0x3ce   :  { %v1305_v33 = vpop.permute.xlu1 %1304 }
 0x3cf   :  { %v1326_v34 = vsel %vm532_vm8, %v1321_v32, %v1305_v33 }
 0x3d0   :  { %1332 = vst.msk [vmem:[%s2154_s13 + $0x20] sm:$0xff] %vm1327_vm15, %v1326_v34 }

// kernel: gvp_gnn_forward.9
= control target key start
LH: loop header
LB: loop body
LE: loop exit
PB: predicated region body
PF: predicated region fallthrough
CT: control target
= control target key end

     0   :  { %vm85_vm0 = vcmask 1043456   ;;  %s742_s17 = smov 124   ;;  %s743_s18 = smov 120   ;;  %vm72_vm1 = vcmask 31744   ;;  %vm294_vm6 = vcmask 130048   ;;  %v745_v45 = vmov 0.0|0.0   ;;  %s880_s0 = inlined_call_operand.vmem [shape: f32[16,28], index: 0, kind: input, shape index: {}]   ;;  %s881_s2 = inlined_call_operand.vmem [shape: f32[4,4], index: 2, kind: input, shape index: {}]   ;;  %s882_s4 = inlined_call_operand.vmem [shape: f32[4,16], index: 4, kind: input, shape index: {}]   ;;  %s883_s3 = inlined_call_operand.vmem [shape: f32[16,16], index: 3, kind: input, shape index: {}]   ;;  %s884_s6 = inlined_call_operand.vmem [shape: f32[16,16], index: 6, kind: input, shape index: {}]   ;;  %s885_s5 = inlined_call_operand.vmem [shape: f32[1,16], index: 5, kind: input, shape index: {}]   ;;  %s886_s1 = inlined_call_operand.vmem [shape: f32[2,16], index: 1, kind: input, shape index: {}]   ;;  %s887_s8 = inlined_call_operand.vmem [shape: f32[16,1], index: 8, kind: input, shape index: {}]   ;;  %s888_s9 = inlined_call_operand.<no memory space> [shape: f32[1,1], index: 9, kind: input, shape index: {}]   ;;  %s889_s7 = inlined_call_operand.vmem [shape: f32[1,16], index: 7, kind: input, shape index: {}]   ;;  %s890_s10 = inlined_call_operand.vmem [shape: f32[2,1], index: 10, kind: output, shape index: {}]  }
   0x1   :  { %v806_v0 = vld [vmem:[%s880_s0] sm:$0xff]  ;;  %v816_v2 = vld [vmem:[%s880_s0 + $0x8] sm:$0xff]  ;;  %vm746_vm7 = vmmov 0   ;;  %v747_v46 = vmov 0.0   ;;  %vm622_vm8 = vcmask 1024  }
   0x2   :  { %v37_v1 = vld [vmem:[%s881_s2] sm:$0xf]  ;;  %52 = vrot.lane.b32.xlu0 %v806_v0, %s742_s17  ;;  %56 = vrot.lane.b32.xlu1 %v806_v0, %s743_s18  ;;  %s744_s2 = smov 112   ;;  %v39_v17 = vld [vmem:[%s883_s3 + $0x8] sm:$0xff] }
   0x3   :  { %669 = vmatprep.subr.msk.mxu0 %vm85_vm0, %v37_v1  ;;  %v40_v13 = vld [vmem:[%s882_s4] sm:$0xf]  ;;  %v43_v48 = vld [vmem:[%s884_s6 + $0x8] sm:$0xff] }
   0x4   :  { %670 = vmatpush3.msk.msra.mxu0 %vm85_vm0, %v37_v1  ;;  %680 = vmatprep.subr.msk.mxu1 %vm85_vm0, %v40_v13  ;;  %v38_v16 = vld [vmem:[%s883_s3] sm:$0xff]  ;;  %v46_v62 = vld [vmem:[%s887_s8 + $0x8] sm:$0xff] }
   0x5   :  { %681 = vmatpush3.msk.msra.mxu1 %vm85_vm0, %v40_v13  ;;  %v713_v18 = vpack.c.bf16 %v39_v17, %v38_v16  ;;  %720 = vmatprep.subr.bf16.mxu0 %v745_v45  ;;  %v42_v47 = vld [vmem:[%s884_s6] sm:$0xff] }
   0x6   :  { %54 = vrot.lane.b32.xlu0 %v816_v2, %s742_s17  ;;  %58 = vrot.lane.b32.xlu1 %v816_v2, %s743_s18  ;;  %v721_v49 = vpack.c.bf16 %v43_v48, %v42_v47  ;;  %v640_v50 = vld [vmem:[%s885_s5] ss:$0 sm:$0xff] }
   0x7   :  { %714 = vmatprep.subr.bf16.mxu1 %v713_v18  ;;  %v384_v58 = vld [vmem:[%s886_s1] sm:$0x3] }
   0x8   :  { %v45_v61 = vld [vmem:[%s887_s8] sm:$0xff] }
   0x9   :  { %v724_v63 = vpack.c.bf16 %v46_v62, %v45_v61  ;;  %v642_v1 = vld [vmem:[%s889_s7] ss:$0 sm:$0xff] }
   0xa   :  { %60 = vrot.lane.b32.xlu0 %v806_v0, %s744_s2  ;;  %62 = vrot.lane.b32.xlu1 %v816_v2, %s744_s2 }
  0x74   :  { %v53_v3 = vpop.permute.xlu0 %52  ;;  %v57_v4 = vpop.permute.xlu1 %56 }
  0x75   :  { %64 = vrot.lane.b32.xlu0 %v53_v3, %s744_s2 }
  0x78   :  { %v55_v5 = vpop.permute.xlu0 %54  ;;  %v59_v6 = vpop.permute.xlu1 %58 }
  0x79   :  { %68 = vrot.lane.b32.xlu0 %v57_v4, %s744_s2  ;;  %66 = vrot.lane.b32.xlu1 %v55_v5, %s744_s2 }
  0x7c   :  { %v61_v7 = vpop.permute.xlu0 %60  ;;  %v63_v8 = vpop.permute.xlu1 %62 }
  0x7d   :  { %70 = vrot.lane.b32.xlu1 %v59_v6, %s744_s2  ;;  %671 = vmatprep.mubr.msk.f32.mxu0 %vm72_vm1, %v61_v7 }
  0x7e   :  { %672 = vmatmul.mubr.msk.f32.vlgmr.msra.gmra.mrb[0].mxu0 %vm72_vm1, %v63_v8 }
  0x7f   :  { %722 = vmatpush3.bf16.msra.mxu0 %v721_v49 }
  0xe7   :  { %v65_v9 = vpop.permute.xlu0 %64 }
  0xe8   :  { %674 = vmatprep.mubr.msk.f32.mxu0 %vm72_vm1, %v65_v9 }
  0xeb   :  { %v67_v10 = vpop.permute.xlu1 %66  ;;  %v69_v11 = vpop.permute.xlu0 %68 }
  0xec   :  { %675 = vmatmul.mubr.msk.f32.gmra.mrb[2].mxu0 %vm72_vm1, %v67_v10 }
  0xed   :  { %677 = vmatprep.mubr.msk.f32.mxu0 %vm72_vm1, %v69_v11 }
  0xef   :  { %v71_v12 = vpop.permute.xlu1 %70 }
  0xf0   :  { %678 = vmatmul.mubr.msk.f32.gmra.mrb[4].mxu0 %vm72_vm1, %v71_v12 }
  0xf1   :  { %703 = vmatprep.mubr.msk.f32.mxu0 %vm746_vm7, %v747_v46 }
 0x151   :  { %v673_v14 = vpop.f32.mrb[0].mxu0 }
 0x152   :  { %v155_v15 = vpop.f32.mrb[1].mxu0  ;;  %v185_v20 = vmul.f32 %v673_v14, %v673_v14 }
 0x153   :  { %v184_v23 = vmul.f32 %v155_v15, %v155_v15 }
 0x1bf   :  { %v676_v19 = vpop.f32.mrb[2].mxu0 }
 0x1c0   :  { %v187_v21 = vmul.f32 %v676_v19, %v676_v19  ;;  %v165_v22 = vpop.f32.mrb[3].mxu0 }
 0x1c1   :  { %v186_v24 = vmul.f32 %v165_v22, %v165_v22 }
 0x1c2   :  { %v189_v25 = vadd.f32 %v187_v21, %v185_v20 }
 0x1c3   :  { %v188_v26 = vadd.f32 %v186_v24, %v184_v23  ;;  %v679_v27 = vpop.f32.mrb[4].mxu0 }
 0x1c4   :  { %v191_v28 = vmul.f32 %v679_v27, %v679_v27  ;;  %v175_v29 = vpop.f32.mrb[5].mxu0 }
 0x1c5   :  { %v190_v30 = vmul.f32 %v175_v29, %v175_v29 }
 0x1c6   :  { %v193_v31 = vadd.f32 %v191_v28, %v189_v25 }
 0x1c7   :  { %v192_v32 = vadd.f32 %v190_v30, %v188_v26 }
 0x1c8   :  { %v195_v33 = vmax.f32 %v193_v31, 1e-08 }
 0x1c9   :  { %v194_v34 = vmax.f32 %v192_v32, 1e-08 }
 0x1ca   :  { %734 = vrsqrt.f32 %v195_v33  ;;  %vm205_vm2 = vcmp.eq.f32.partialorder %v195_v33, inf  ;;  %v208_v42 = vand.u32 2147483648, %v195_v33  ;;  %vm207_vm5 = vcmp.eq.f32.partialorder %v195_v33, 0.0 }
 0x1cb   :  { %736 = vrsqrt.f32 %v194_v34  ;;  %vm198_vm3 = vcmp.eq.f32.partialorder %v194_v34, inf  ;;  %v201_v39 = vand.u32 2147483648, %v194_v34  ;;  %vm200_vm4 = vcmp.eq.f32.partialorder %v194_v34, 0.0 }
 0x1d4   :  { %v735_v35 = vpop.eup %734 }
 0x1d5   :  { %v737_v36 = vpop.eup %736  ;;  %v204_v37 = vmul.f32 %v735_v35, %v195_v33 }
 0x1d6   :  { %v197_v38 = vmul.f32 %v737_v36, %v194_v34 }
 0x1d7   :  { %v206_v40 = vsel %vm205_vm2, %v195_v33, %v204_v37 }
 0x1d8   :  { %v199_v41 = vsel %vm198_vm3, %v194_v34, %v197_v38  ;;  %v209_v44 = vsel %vm207_vm5, %v208_v42, %v206_v40 }
 0x1d9   :  { %v202_v43 = vsel %vm200_vm4, %v201_v39, %v199_v41 }
 0x1da   :  { %682 = vmatprep.mubr.msk.f32.mxu1 %vm72_vm1, %v202_v43 }
 0x1db   :  { %683 = vmatmul.mubr.msk.f32.vlgmr.msra.gmra.mrb[0].mxu1 %vm72_vm1, %v209_v44 }
 0x1dc   :  { %716 = vmatpush3.bf16.msra.mxu1 %v713_v18  ;;  %689 = vmatprep.mubr.msk.f32.mxu1 %vm294_vm6, %v806_v0  ;;  %v15_v0 = vstv %s888_s9 }
 0x1dd   :  { %717 = vmatprep.subr.bf16.mxu1 %v745_v45  ;;  %16 = vst [vmem:[#allocation2] sm:$0x1] %v15_v0 }
 0x1e3   :  { %690 = vmatmul.mubr.msk.f32.vlgmr.msra.gmra.mrb[0].mxu1 %vm294_vm6, %v816_v2 }
 0x1e4   :  { %696 = vmatprep.mubr.msk.f32.mxu1 %vm746_vm7, %v747_v46  ;;  %v644_v11 = vld [vmem:[#allocation2] ss:$0 sm:$0xff] }
 0x2b6   :  { %v691_v51 = vpop.f32.mrb[0].mxu1 }
 0x2b7   :  { %v381_v52 = vadd.f32 %v691_v51, %v640_v50  ;;  %v365_v53 = vpop.f32.mrb[1].mxu1 }
 0x2b8   :  { %v380_v54 = vadd.f32 %v640_v50, %v365_v53 }
 0x2b9   :  { %v383_v55 = vmax.f32 %v381_v52, 0.0 }
 0x2ba   :  { %v382_v56 = vmax.f32 %v380_v54, 0.0 }
 0x2bc   :  { %v718_v57 = vpack.c.bf16 %v383_v55, %v382_v56 }
 0x2be   :  { %719 = vmatpush3.bf16.msra.mxu1 %v718_v57 }
 0x2bf   :  { %723 = vmatprep.subr.bf16.mxu1 %v745_v45 }
 0x2c1   :  { %697 = vmatmul.mubr.msk.f32.vlgmr.msra.gmra.mrb[2].mxu1 %vm294_vm6, %v384_v58 }
 0x2c2   :  { %710 = vmatprep.mubr.msk.f32.mxu1 %vm746_vm7, %v747_v46  ;;  %725 = vmatpush3.bf16.msra.mxu1 %v724_v63 }
 0x394   :  { %v454_v59 = vpop.f32.mrb[2].mxu1 }
 0x395   :  { %v698_v60 = vpop.f32.mrb[3].mxu1  ;;  %704 = vmatmul.mubr.msk.f32.vlgmr.msra.gmra.mrb[6].mxu0 %vm294_vm6, %v454_v59 }
 0x468   :  { %v533_v2 = vpop.f32.mrb[6].mxu0 }
 0x469   :  { %v534_v3 = vadd.f32 %v642_v1, %v533_v2  ;;  %v705_v4 = vpop.f32.mrb[7].mxu0 }
 0x46b   :  { %v537_v5 = vsub.f32 0.0, %v534_v3 }
 0x46d   :  { %v538_v6 = vmul.f32 1.442695, %v537_v5 }
 0x46f   :  { %738 = vpow2.f32 %v538_v6 }
 0x479   :  { %v739_v7 = vpop.eup %738 }
 0x47a   :  { %v540_v8 = vadd.f32 1.0, %v739_v7 }
 0x47c   :  { %740 = vrcp.f32 %v540_v8 }
 0x486   :  { %v741_v9 = vpop.eup %740 }
 0x487   :  { %v542_v10 = vmul.f32 %v741_v9, %v534_v3 }
 0x489   :  { %711 = vmatmul.mubr.msk.f32.vlgmr.msra.gmra.mrb[4].mxu1 %vm294_vm6, %v542_v10 }
 0x55c   :  { %v618_v12 = vpop.f32.mrb[4].mxu1 }
 0x55d   :  { %v619_v13 = vadd.f32 %v644_v11, %v618_v12  ;;  %v712_v14 = vpop.f32.mrb[5].mxu1 }
 0x55f   :  { %623 = vst.msk [vmem:[%s890_s10] sm:$0x3] %vm622_vm8, %v619_v13 }

// kernel: gvp_gnn_forward.6
= control target key start
LH: loop header
LB: loop body
LE: loop exit
PB: predicated region body
PF: predicated region fallthrough
CT: control target
= control target key end

     0   :  { %v6160_v0 = vmov 0.0|0.0   ;;  %s6161_s6 = smov 2   ;;  %vm6162_vm0 = vmmov 0   ;;  %v6163_v1 = vmov 0.0   ;;  %s6164_s10 = smov 3   ;;  %vm262_vm1 = vcmask 130048   ;;  %s7480_s0 = inlined_call_operand.smem [shape: u32[45], index: -1, kind: input, shape index: {}] }
   0x1   :  { %5799 = vmatprep.subr.bf16.mxu0 %v6160_v0  ;;  %5802 = vmatprep.subr.bf16.mxu1 %v6160_v0  ;;  %s6227_s5 = sld [smem:[%s7480_s0]]   ;;  %s6165_s14 = smov 1   ;;  %vm747_vm2 = vcmask 1041408   ;;  %vm6169_vm3 = vmmov 1   ;;  %vm579_vm5 = vcmask 31744   ;;  %vm585_vm6 = vcmask 48128  }
   0x2   :  { %s6232_s9 = sld [smem:[%s7480_s0 + %s6161_s6]]   ;;  %5185 = vmatprep.mubr.msk.f32.mxu0 %vm6162_vm0, %v6163_v1  ;;  %5204 = vmatprep.mubr.msk.f32.mxu1 %vm6162_vm0, %v6163_v1  ;;  %s6166_s18 = smov 116   ;;  %vm6314_vm4 = vmpackc.low %vm747_vm2, %vm6169_vm3  ;;  %vm701_vm7 = vcmask 80896  }
   0x3   :  { %s6241_s13 = sld [smem:[%s7480_s0 + %s6164_s10]]   ;;  %s6167_s19 = smov 114  }
   0x4   :  { %s4684_s17 = sld [smem:[%s7480_s0 + %s6165_s14]]   ;;  %s6168_s20 = smov 5  }
   0x5   :  { %s4688_s23 = sld [smem:[%s7480_s0 + %s6168_s20]]   ;;  %s6170_s24 = smov 118  }
   0x6   :  { %s6171_s25 = smov 112   ;;  %s6172_s26 = smov 108  }
   0x7   :  { %v250_v2 = vld [vmem:[%s6227_s5] sm:$0xff]  ;;  %v251_v3 = vld [vmem:[%s6227_s5 + $0x8] sm:$0xff]  ;;  %s6173_s27 = smov 104   ;;  %s6174_s28 = smov 110  }
   0x8   :  { %v5800_v4 = vpack.c.bf16 %v251_v3, %v250_v2  ;;  %v257_v5 = vld [vmem:[%s6232_s9] sm:$0xff]  ;;  %v258_v11 = vld [vmem:[%s6232_s9 + $0x8] sm:$0xff]  ;;  %v259_v14 = vld [vmem:[%s6232_s9 + $0x10] sm:$0xff]  ;;  %s6175_s29 = smov 32   ;;  %s6176_s30 = smov 16  }
   0x9   :  { %v368_v6 = vld [vmem:[%s6241_s13] sm:$0xff]  ;;  %v369_v12 = vld [vmem:[%s6241_s13 + $0x8] sm:$0xff]  ;;  %v370_v15 = vld [vmem:[%s6241_s13 + $0x10] sm:$0xff]  ;;  %s6177_s1 = smov 7   ;;  %s6178_s6 = smov 6  }
   0xa   :  { %5801 = vmatpush3.bf16.msra.mxu0 %v5800_v4  ;;  %5804 = vmatpush3.bf16.msra.mxu1 %v5800_v4  ;;  %v6250_v7 = vld [vmem:[%s4684_s17] sm:$0xff]  ;;  %v6252_v8 = vld [vmem:[%s4684_s17 + $0x10] sm:$0xff]  ;;  %v6260_v9 = vld [vmem:[%s4684_s17 + $0x8] sm:$0xff]  ;;  %s4690_s4 = sld [smem:[%s7480_s0 + %s6177_s1]]   ;;  %s6179_s10 = smov 9  }
   0xb   :  { %5805 = vmatprep.subr.bf16.mxu0 %v6160_v0  ;;  %5809 = vmatprep.subr.bf16.mxu1 %v6160_v0  ;;  %v6262_v10 = vld [vmem:[%s4684_s17 + $0x20] sm:$0xff]  ;;  %v6274_v13 = vld [vmem:[%s4684_s17 + $0x18] sm:$0xff]  ;;  %v183_v21 = vld [vmem:[%s4688_s23 + $0x8] sm:$0x3]  ;;  %s6180_s14 = smov 10   ;;  %s6182_s22 = smov 12  }
   0xc   :  { %549 = vrot.lane.b32.xlu0 %v6250_v7, %s6166_s18  ;;  %553 = vrot.lane.b32.xlu1 %v6252_v8, %s6166_s18  ;;  %v260_v16 = vld [vmem:[%s6232_s9 + $0x18] sm:$0xff]  ;;  %v261_v18 = vld [vmem:[%s6232_s9 + $0x20] sm:$0xff]  ;;  %s6529_s9 = sld [smem:[%s7480_s0 + %s6178_s6]]   ;;  %s6184_s7 = smov 14  }
   0xd   :  { %5186 = vmatmul.mubr.msk.f32.vlgmr.msra.gmra.mrb[0].mxu0 %vm262_vm1, %v257_v5  ;;  %5205 = vmatmul.mubr.msk.f32.vlgmr.msra.gmra.mrb[0].mxu1 %vm262_vm1, %v368_v6  ;;  %v371_v17 = vld [vmem:[%s6241_s13 + $0x18] sm:$0xff]  ;;  %v372_v19 = vld [vmem:[%s6241_s13 + $0x20] sm:$0xff]  ;;  %s4692_s13 = sld [smem:[%s7480_s0 + %s6179_s10]]   ;;  %s6185_s11 = smov 13  }
   0xe   :  { %5188 = vmatprep.mubr.msk.f32.mxu0 %vm6162_vm0, %v6163_v1  ;;  %5207 = vmatprep.mubr.msk.f32.mxu1 %vm6162_vm0, %v6163_v1  ;;  %v182_v20 = vld [vmem:[%s4688_s23] sm:$0xff]  ;;  %s4693_s17 = sld [smem:[%s7480_s0 + %s6180_s14]]   ;;  %s6186_s15 = smov 17  }
   0xf   :  { %v5806_v22 = vpack.c.bf16 %v183_v21, %v182_v20  ;;  %s4699_s6 = sld [smem:[%s7480_s0 + %s6176_s30]]   ;;  %s6188_s23 = smov 19  }
  0x10   :  { %551 = vrot.lane.b32.xlu0 %v6260_v9, %s6166_s18  ;;  %557 = vrot.lane.b32.xlu1 %v6262_v10, %s6166_s18  ;;  %s4697_s10 = sld [smem:[%s7480_s0 + %s6184_s7]]   ;;  %s6197_s7 = smov 124  }
  0x11   :  { %5189 = vmatmul.mubr.msk.f32.gmra.mrb[2].mxu0 %vm262_vm1, %v258_v11  ;;  %5208 = vmatmul.mubr.msk.f32.gmra.mrb[2].mxu1 %vm262_vm1, %v369_v12  ;;  %s4696_s14 = sld [smem:[%s7480_s0 + %s6185_s11]]  }
  0x12   :  { %5191 = vmatprep.mubr.msk.f32.mxu0 %vm6162_vm0, %v6163_v1  ;;  %5210 = vmatprep.mubr.msk.f32.mxu1 %vm6162_vm0, %v6163_v1 }
  0x13   :  { %5808 = vmatpush3.bf16.msk.msra.mxu0 %vm6314_vm4, %v5806_v22 }
  0x14   :  { %555 = vrot.lane.b32.xlu0 %v6274_v13, %s6166_s18  ;;  %608 = vrot.lane.b32.xlu1 %v6260_v9, %s6167_s19  ;;  %s6181_s18 = smov 8  }
  0x15   :  { %5192 = vmatmul.mubr.msk.f32.gmra.mrb[4].mxu0 %vm262_vm1, %v259_v14  ;;  %5211 = vmatmul.mubr.msk.f32.gmra.mrb[4].mxu1 %vm262_vm1, %v370_v15  ;;  %s4691_s21 = sld [smem:[%s7480_s0 + %s6181_s18]]  }
  0x16   :  { %5194 = vmatprep.mubr.msk.f32.mxu0 %vm6162_vm0, %v6163_v1  ;;  %5213 = vmatprep.mubr.msk.f32.mxu1 %vm6162_vm0, %v6163_v1  ;;  %s4700_s18 = sld [smem:[%s7480_s0 + %s6186_s15]]  }
  0x17   :  { %5826 = vmatprep.subr.bf16.mxu0 %v6160_v0 }
  0x18   :  { %606 = vrot.lane.b32.xlu0 %v6250_v7, %s6167_s19 }
  0x19   :  { %5195 = vmatmul.mubr.msk.f32.gmra.mrb[6].mxu0 %vm262_vm1, %v260_v16  ;;  %5214 = vmatmul.mubr.msk.f32.gmra.mrb[6].mxu1 %vm262_vm1, %v371_v17 }
  0x1a   :  { %5197 = vmatprep.mubr.msk.f32.mxu0 %vm6162_vm0, %v6163_v1  ;;  %5216 = vmatprep.mubr.msk.f32.mxu1 %vm6162_vm0, %v6163_v1 }
  0x1c   :  { %610 = vrot.lane.b32.xlu0 %v6252_v8, %s6167_s19 }
  0x1d   :  { %5198 = vmatmul.mubr.msk.f32.gmra.mrb[8].mxu0 %vm262_vm1, %v261_v18  ;;  %5217 = vmatmul.mubr.msk.f32.gmra.mrb[8].mxu1 %vm262_vm1, %v372_v19 }
  0x1e   :  { %5223 = vmatprep.mubr.msk.f32.mxu0 %vm6162_vm0, %v6163_v1  ;;  %5272 = vmatprep.mubr.msk.f32.mxu1 %vm6162_vm0, %v6163_v1 }
  0x7e   :  { %v550_v44 = vpop.permute.xlu0 %549  ;;  %v554_v46 = vpop.permute.xlu1 %553 }
  0x82   :  { %v552_v45 = vpop.permute.xlu0 %551  ;;  %v558_v48 = vpop.permute.xlu1 %557 }
  0x86   :  { %v556_v47 = vpop.permute.xlu0 %555  ;;  %v609_v50 = vpop.permute.xlu1 %608 }
  0x8a   :  { %v607_v49 = vpop.permute.xlu0 %606 }
  0x8e   :  { %v611_v51 = vpop.permute.xlu0 %610 }
  0xe0   :  { %v6321_v24 = vpop.f32.mrb[0].mxu0  ;;  %v454_v25 = vpop.f32.mrb[0].mxu1 }
  0xe1   :  { %564 = vrot.lane.b32.xlu1 %v454_v25, %s6170_s24  ;;  %v5206_v26 = vpop.f32.mrb[1].mxu1  ;;  %534 = vrot.lane.b32.xlu0 %v6321_v24, %s6171_s25  ;;  %v5187_v27 = vpop.f32.mrb[1].mxu0 }
  0xe4   :  { %v6326_v28 = vpop.f32.mrb[2].mxu0  ;;  %v459_v29 = vpop.f32.mrb[2].mxu1 }
  0xe5   :  { %591 = vrot.lane.b32.xlu1 %v6321_v24, %s6172_s26  ;;  %593 = vrot.lane.b32.xlu0 %v6326_v28, %s6172_s26  ;;  %v5190_v30 = vpop.f32.mrb[3].mxu0  ;;  %v5209_v31 = vpop.f32.mrb[3].mxu1 }
  0xe8   :  { %v6332_v32 = vpop.f32.mrb[4].mxu0  ;;  %v464_v33 = vpop.f32.mrb[4].mxu1 }
  0xe9   :  { %621 = vrot.lane.b32.xlu1 %v454_v25, %s6167_s19  ;;  %623 = vrot.lane.b32.xlu0 %v459_v29, %s6167_s19  ;;  %v5193_v34 = vpop.f32.mrb[5].mxu0  ;;  %v5212_v35 = vpop.f32.mrb[5].mxu1 }
  0xec   :  { %v6336_v36 = vpop.f32.mrb[6].mxu0  ;;  %v469_v37 = vpop.f32.mrb[6].mxu1 }
  0xed   :  { %536 = vrot.lane.b32.xlu1 %v6326_v28, %s6171_s25  ;;  %538 = vrot.lane.b32.xlu0 %v6332_v32, %s6171_s25  ;;  %v5196_v38 = vpop.f32.mrb[7].mxu0  ;;  %v5215_v39 = vpop.f32.mrb[7].mxu1 }
  0xf0   :  { %v6342_v40 = vpop.f32.mrb[8].mxu0  ;;  %v474_v41 = vpop.f32.mrb[8].mxu1 }
  0xf1   :  { %566 = vrot.lane.b32.xlu1 %v459_v29, %s6170_s24  ;;  %568 = vrot.lane.b32.xlu0 %v464_v33, %s6170_s24  ;;  %v5199_v42 = vpop.f32.mrb[9].mxu0  ;;  %v5218_v43 = vpop.f32.mrb[9].mxu1 }
  0xf5   :  { %595 = vrot.lane.b32.xlu1 %v6332_v32, %s6172_s26  ;;  %597 = vrot.lane.b32.xlu0 %v6336_v36, %s6172_s26 }
  0xf9   :  { %540 = vrot.lane.b32.xlu1 %v6336_v36, %s6171_s25  ;;  %542 = vrot.lane.b32.xlu0 %v6342_v40, %s6171_s25 }
  0xfd   :  { %570 = vrot.lane.b32.xlu1 %v469_v37, %s6170_s24  ;;  %572 = vrot.lane.b32.xlu0 %v474_v41, %s6170_s24 }
 0x101   :  { %625 = vrot.lane.b32.xlu1 %v464_v33, %s6167_s19  ;;  %627 = vrot.lane.b32.xlu0 %v469_v37, %s6167_s19 }
 0x105   :  { %612 = vrot.lane.b32.xlu1 %v6274_v13, %s6167_s19  ;;  %614 = vrot.lane.b32.xlu0 %v6262_v10, %s6167_s19 }
 0x109   :  { %661 = vrot.lane.b32.xlu1 %v6250_v7, %s6171_s25  ;;  %646 = vrot.lane.b32.xlu0 %v6321_v24, %s6173_s27 }
 0x10d   :  { %648 = vrot.lane.b32.xlu1 %v6326_v28, %s6173_s27  ;;  %676 = vrot.lane.b32.xlu0 %v454_v25, %s6174_s28 }
 0x111   :  { %599 = vrot.lane.b32.xlu1 %v6342_v40, %s6172_s26  ;;  %663 = vrot.lane.b32.xlu0 %v6260_v9, %s6171_s25  ;;  %s4695_s26 = sld [smem:[%s7480_s0 + %s6182_s22]]  }
 0x115   :  { %629 = vrot.lane.b32.xlu1 %v474_v41, %s6167_s19  ;;  %650 = vrot.lane.b32.xlu0 %v6332_v32, %s6173_s27  ;;  %s6187_s19 = smov 15  }
 0x116   :  { %s4698_s22 = sld [smem:[%s7480_s0 + %s6187_s19]]   ;;  %s6207_s19 = smov 33  }
 0x119   :  { %678 = vrot.lane.b32.xlu1 %v459_v29, %s6174_s28  ;;  %680 = vrot.lane.b32.xlu0 %v464_v33, %s6174_s28 }
 0x11d   :  { %665 = vrot.lane.b32.xlu1 %v6252_v8, %s6171_s25  ;;  %667 = vrot.lane.b32.xlu0 %v6274_v13, %s6171_s25 }
 0x121   :  { %652 = vrot.lane.b32.xlu1 %v6336_v36, %s6173_s27  ;;  %654 = vrot.lane.b32.xlu0 %v6342_v40, %s6173_s27  ;;  %s6183_s27 = smov 11  }
 0x122   :  { %s4694_s2 = sld [smem:[%s7480_s0 + %s6183_s27]]  }
 0x123   :  { %s4702_s27 = sld [smem:[%s7480_s0 + %s6188_s23]]  }
 0x125   :  { %682 = vrot.lane.b32.xlu1 %v469_v37, %s6174_s28  ;;  %684 = vrot.lane.b32.xlu0 %v474_v41, %s6174_s28  ;;  %s6189_s28 = smov 18  }
 0x126   :  { %s4701_s3 = sld [smem:[%s7480_s0 + %s6189_s28]]   ;;  %s6216_s28 = smov 44  }
 0x129   :  { %669 = vrot.lane.b32.xlu1 %v6262_v10, %s6171_s25  ;;  %503 = vrot.lane.b32.xlu0 %v454_v25, %s6175_s29 }
 0x12d   :  { %483 = vrot.lane.b32.xlu1 %v6250_v7, %s6176_s30  ;;  %505 = vrot.lane.b32.xlu0 %v459_v29, %s6175_s29 }
 0x131   :  { %485 = vrot.lane.b32.xlu1 %v6260_v9, %s6176_s30  ;;  %507 = vrot.lane.b32.xlu0 %v464_v33, %s6175_s29 }
 0x135   :  { %487 = vrot.lane.b32.xlu1 %v6252_v8, %s6176_s30  ;;  %509 = vrot.lane.b32.xlu0 %v469_v37, %s6175_s29 }
 0x139   :  { %489 = vrot.lane.b32.xlu1 %v6274_v13, %s6176_s30  ;;  %511 = vrot.lane.b32.xlu0 %v474_v41, %s6175_s29 }
 0x13d   :  { %491 = vrot.lane.b32.xlu1 %v6262_v10, %s6176_s30 }
 0x153   :  { %v565_v52 = vpop.permute.xlu1 %564  ;;  %v535_v53 = vpop.permute.xlu0 %534 }
 0x154   :  { %v580_v54 = vsel %vm579_vm5, %v535_v53, %v550_v44 }
 0x155   :  { %v586_v55 = vsel %vm585_vm6, %v580_v54, %v565_v52 }
 0x156   :  { %5224 = vmatmul.mubr.msk.f32.vlgmr.msra.gmra.mrb[10].mxu0 %vm701_vm7, %v586_v55 }
 0x157   :  { %v592_v56 = vpop.permute.xlu1 %591  ;;  %v594_v57 = vpop.permute.xlu0 %593  ;;  %5226 = vmatprep.mubr.msk.f32.mxu0 %vm6162_vm0, %v6163_v1 }
 0x158   :  { %v636_v18 = vsel %vm579_vm5, %v592_v56, %v607_v49  ;;  %v637_v22 = vsel %vm579_vm5, %v594_v57, %v609_v50 }
 0x15b   :  { %v622_v58 = vpop.permute.xlu1 %621  ;;  %v624_v59 = vpop.permute.xlu0 %623 }
 0x15c   :  { %v641_v21 = vsel %vm585_vm6, %v636_v18, %v622_v58  ;;  %v642_v27 = vsel %vm585_vm6, %v637_v22, %v624_v59 }
 0x15f   :  { %v537_v60 = vpop.permute.xlu1 %536  ;;  %v539_v61 = vpop.permute.xlu0 %538 }
 0x160   :  { %v581_v62 = vsel %vm579_vm5, %v537_v60, %v552_v45  ;;  %v582_v4 = vsel %vm579_vm5, %v539_v61, %v554_v46 }
 0x163   :  { %v567_v63 = vpop.permute.xlu1 %566  ;;  %v569_v2 = vpop.permute.xlu0 %568 }
 0x164   :  { %v587_v3 = vsel %vm585_vm6, %v581_v62, %v567_v63  ;;  %v588_v7 = vsel %vm585_vm6, %v582_v4, %v569_v2  ;;  %v190_v63 = vld [vmem:[%s4690_s4] sm:$0xff]  ;;  %v191_v2 = vld [vmem:[%s4690_s4 + $0x8] sm:$0x3]  ;;  %s6190_s4 = smov 23  }
 0x165   :  { %5227 = vmatmul.mubr.msk.f32.gmra.mrb[12].mxu0 %vm701_vm7, %v587_v3  ;;  %v5810_v3 = vpack.c.bf16 %v191_v2, %v190_v63  ;;  %v184_v2 = vld [vmem:[%s6529_s9] sm:$0xff]  ;;  %s4706_s8 = sld [smem:[%s7480_s0 + %s6190_s4]]  }
 0x166   :  { %5229 = vmatprep.mubr.msk.f32.mxu0 %vm6162_vm0, %v6163_v1 }
 0x167   :  { %v596_v5 = vpop.permute.xlu1 %595  ;;  %v598_v6 = vpop.permute.xlu0 %597  ;;  %5812 = vmatpush3.bf16.msk.msra.mxu1 %vm6314_vm4, %v5810_v3  ;;  %v185_v3 = vld [vmem:[%s6529_s9 + $0x8] sm:$0xff] }
 0x168   :  { %v638_v29 = vsel %vm579_vm5, %v596_v5, %v611_v51  ;;  %5813 = vmatprep.subr.bf16.mxu1 %v6160_v0 }
 0x169   :  { %5230 = vmatmul.mubr.msk.f32.gmra.mrb[14].mxu0 %vm701_vm7, %v588_v7 }
 0x16a   :  { %5232 = vmatprep.mubr.msk.f32.mxu0 %vm6162_vm0, %v6163_v1 }
 0x16b   :  { %v541_v8 = vpop.permute.xlu1 %540  ;;  %v543_v9 = vpop.permute.xlu0 %542 }
 0x16c   :  { %v583_v10 = vsel %vm579_vm5, %v541_v8, %v556_v47  ;;  %v584_v14 = vsel %vm579_vm5, %v543_v9, %v558_v48 }
 0x16f   :  { %v571_v11 = vpop.permute.xlu1 %570  ;;  %v573_v12 = vpop.permute.xlu0 %572 }
 0x170   :  { %v589_v13 = vsel %vm585_vm6, %v583_v10, %v571_v11  ;;  %v590_v17 = vsel %vm585_vm6, %v584_v14, %v573_v12 }
 0x171   :  { %5233 = vmatmul.mubr.msk.f32.gmra.mrb[16].mxu0 %vm701_vm7, %v589_v13 }
 0x172   :  { %5235 = vmatprep.mubr.msk.f32.mxu0 %vm6162_vm0, %v6163_v1 }
 0x173   :  { %v626_v15 = vpop.permute.xlu1 %625  ;;  %v628_v16 = vpop.permute.xlu0 %627 }
 0x174   :  { %v643_v33 = vsel %vm585_vm6, %v638_v29, %v626_v15 }
 0x175   :  { %5236 = vmatmul.mubr.msk.f32.gmra.mrb[18].mxu0 %vm701_vm7, %v590_v17 }
 0x176   :  { %5238 = vmatprep.mubr.msk.f32.mxu0 %vm6162_vm0, %v6163_v1 }
 0x177   :  { %v613_v19 = vpop.permute.xlu1 %612  ;;  %v615_v20 = vpop.permute.xlu0 %614 }
 0x178   :  { %v639_v34 = vsel %vm579_vm5, %v598_v6, %v613_v19 }
 0x179   :  { %5239 = vmatmul.mubr.msk.f32.gmra.mrb[20].mxu0 %vm701_vm7, %v641_v21  ;;  %v644_v38 = vsel %vm585_vm6, %v639_v34, %v628_v16 }
 0x17a   :  { %5241 = vmatprep.mubr.msk.f32.mxu0 %vm6162_vm0, %v6163_v1 }
 0x17b   :  { %v662_v25 = vpop.permute.xlu1 %661  ;;  %v647_v26 = vpop.permute.xlu0 %646 }
 0x17c   :  { %v691_v44 = vsel %vm579_vm5, %v647_v26, %v662_v25 }
 0x17d   :  { %5242 = vmatmul.mubr.msk.f32.gmra.mrb[22].mxu0 %vm701_vm7, %v642_v27 }
 0x17e   :  { %5244 = vmatprep.mubr.msk.f32.mxu0 %vm6162_vm0, %v6163_v1 }
 0x17f   :  { %v649_v30 = vpop.permute.xlu1 %648  ;;  %v677_v31 = vpop.permute.xlu0 %676 }
 0x180   :  { %v696_v47 = vsel %vm585_vm6, %v691_v44, %v677_v31 }
 0x181   :  { %5245 = vmatmul.mubr.msk.f32.gmra.mrb[24].mxu0 %vm701_vm7, %v643_v33 }
 0x182   :  { %5247 = vmatprep.mubr.msk.f32.mxu0 %vm6162_vm0, %v6163_v1 }
 0x183   :  { %v600_v35 = vpop.permute.xlu1 %599  ;;  %v664_v37 = vpop.permute.xlu0 %663 }
 0x184   :  { %v640_v39 = vsel %vm579_vm5, %v600_v35, %v615_v20  ;;  %v692_v48 = vsel %vm579_vm5, %v649_v30, %v664_v37 }
 0x185   :  { %5248 = vmatmul.mubr.msk.f32.gmra.mrb[26].mxu0 %vm701_vm7, %v644_v38 }
 0x186   :  { %5250 = vmatprep.mubr.msk.f32.mxu0 %vm6162_vm0, %v6163_v1 }
 0x187   :  { %v630_v41 = vpop.permute.xlu1 %629  ;;  %v651_v42 = vpop.permute.xlu0 %650 }
 0x188   :  { %v645_v43 = vsel %vm585_vm6, %v640_v39, %v630_v41 }
 0x189   :  { %5251 = vmatmul.mubr.msk.f32.gmra.mrb[28].mxu0 %vm701_vm7, %v645_v43 }
 0x18a   :  { %5253 = vmatprep.mubr.msk.f32.mxu0 %vm6162_vm0, %v6163_v1 }
 0x18b   :  { %v679_v45 = vpop.permute.xlu1 %678  ;;  %v681_v46 = vpop.permute.xlu0 %680 }
 0x18c   :  { %v697_v50 = vsel %vm585_vm6, %v692_v48, %v679_v45 }
 0x18d   :  { %5254 = vmatmul.mubr.msk.f32.gmra.mrb[30].mxu0 %vm701_vm7, %v696_v47 }
 0x18e   :  { %5256 = vmatprep.mubr.msk.f32.mxu0 %vm6162_vm0, %v6163_v1 }
 0x18f   :  { %v666_v49 = vpop.permute.xlu1 %665  ;;  %v668_v51 = vpop.permute.xlu0 %667 }
 0x190   :  { %v693_v52 = vsel %vm579_vm5, %v651_v42, %v666_v49 }
 0x191   :  { %5257 = vmatmul.mubr.msk.f32.gmra.mrb[32].mxu0 %vm701_vm7, %v697_v50  ;;  %v698_v54 = vsel %vm585_vm6, %v693_v52, %v681_v46 }
 0x192   :  { %5259 = vmatprep.mubr.msk.f32.mxu0 %vm6162_vm0, %v6163_v1 }
 0x193   :  { %v653_v53 = vpop.permute.xlu1 %652  ;;  %v655_v55 = vpop.permute.xlu0 %654 }
 0x194   :  { %v694_v56 = vsel %vm579_vm5, %v653_v53, %v668_v51 }
 0x195   :  { %5260 = vmatmul.mubr.msk.f32.gmra.mrb[34].mxu0 %vm701_vm7, %v698_v54 }
 0x196   :  { %5262 = vmatprep.mubr.msk.f32.mxu0 %vm6162_vm0, %v6163_v1 }
 0x197   :  { %v683_v57 = vpop.permute.xlu1 %682  ;;  %v685_v60 = vpop.permute.xlu0 %684 }
 0x198   :  { %v699_v58 = vsel %vm585_vm6, %v694_v56, %v683_v57 }
 0x199   :  { %5263 = vmatmul.mubr.msk.f32.gmra.mrb[36].mxu0 %vm701_vm7, %v699_v58 }
 0x19a   :  { %5265 = vmatprep.mubr.msk.f32.mxu0 %vm6162_vm0, %v6163_v1 }
 0x19b   :  { %v670_v59 = vpop.permute.xlu1 %669 }
 0x19c   :  { %v695_v61 = vsel %vm579_vm5, %v655_v55, %v670_v59 }
 0x19d   :  { %v700_v62 = vsel %vm585_vm6, %v695_v61, %v685_v60  ;;  %vm523_vm6 = vcmask 261120  }
 0x19e   :  { %5266 = vmatmul.mubr.msk.f32.gmra.mrb[38].mxu0 %vm701_vm7, %v700_v62 }
 0x19f   :  { %5367 = vmatprep.mubr.msk.f32.mxu0 %vm6162_vm0, %v6163_v1 }
 0x229   :  { %v6476_v4 = vpop.f32.mrb[10].mxu0 }
 0x22a   :  { %v5225_v5 = vpop.f32.mrb[11].mxu0  ;;  %v891_v15 = vmul.f32 %v6476_v4, %v6476_v4 }
 0x238   :  { %v6478_v6 = vpop.f32.mrb[12].mxu0 }
 0x239   :  { %v5228_v7 = vpop.f32.mrb[13].mxu0  ;;  %v892_v20 = vmul.f32 %v6478_v6, %v6478_v6 }
 0x23c   :  { %v6480_v8 = vpop.f32.mrb[14].mxu0 }
 0x23d   :  { %v5231_v9 = vpop.f32.mrb[15].mxu0  ;;  %v893_v27 = vmul.f32 %v6480_v8, %v6480_v8 }
 0x244   :  { %v6482_v10 = vpop.f32.mrb[16].mxu0 }
 0x245   :  { %v5234_v11 = vpop.f32.mrb[17].mxu0  ;;  %v894_v34 = vmul.f32 %v6482_v10, %v6482_v10 }
 0x248   :  { %v6484_v12 = vpop.f32.mrb[18].mxu0 }
 0x249   :  { %v5237_v13 = vpop.f32.mrb[19].mxu0  ;;  %v895_v41 = vmul.f32 %v6484_v12, %v6484_v12 }
 0x24c   :  { %v6486_v14 = vpop.f32.mrb[20].mxu0 }
 0x24d   :  { %v896_v16 = vmul.f32 %v6486_v14, %v6486_v14  ;;  %v5240_v17 = vpop.f32.mrb[21].mxu0 }
 0x24e   :  { %v5814_v17 = vpack.c.bf16 %v185_v3, %v184_v2  ;;  %v193_v2 = vld [vmem:[%s4692_s13] sm:$0xff]  ;;  %v194_v3 = vld [vmem:[%s4692_s13 + $0x8] sm:$0x3]  ;;  %s6192_s13 = smov 20  }
 0x24f   :  { %v901_v18 = vadd.f32 %v896_v16, %v891_v15  ;;  %s4703_s16 = sld [smem:[%s7480_s0 + %s6192_s13]]  }
 0x250   :  { %v6492_v19 = vpop.f32.mrb[22].mxu0 }
 0x251   :  { %v897_v21 = vmul.f32 %v6492_v19, %v6492_v19  ;;  %v5243_v22 = vpop.f32.mrb[23].mxu0 }
 0x252   :  { %v187_v22 = vld [vmem:[%s6529_s9 + $0x18] sm:$0xff] }
 0x253   :  { %v902_v25 = vadd.f32 %v897_v21, %v892_v20  ;;  %v186_v21 = vld [vmem:[%s6529_s9 + $0x10] sm:$0xff] }
 0x254   :  { %v6498_v26 = vpop.f32.mrb[24].mxu0 }
 0x255   :  { %v898_v29 = vmul.f32 %v6498_v26, %v6498_v26  ;;  %v5246_v30 = vpop.f32.mrb[25].mxu0 }
 0x257   :  { %v903_v31 = vadd.f32 %v898_v29, %v893_v27 }
 0x258   :  { %v6504_v33 = vpop.f32.mrb[26].mxu0 }
 0x259   :  { %v899_v35 = vmul.f32 %v6504_v33, %v6504_v33  ;;  %v5249_v37 = vpop.f32.mrb[27].mxu0 }
 0x25a   :  { %v188_v37 = vld [vmem:[%s6529_s9 + $0x20] sm:$0xff] }
 0x25b   :  { %v904_v38 = vadd.f32 %v899_v35, %v894_v34  ;;  %v5817_v34 = vpack.c.bf16 %v187_v22, %v186_v21 }
 0x25c   :  { %v6510_v39 = vpop.f32.mrb[28].mxu0 }
 0x25d   :  { %v900_v42 = vmul.f32 %v6510_v39, %v6510_v39  ;;  %v5252_v43 = vpop.f32.mrb[29].mxu0 }
 0x25f   :  { %v905_v44 = vadd.f32 %v900_v42, %v895_v41 }
 0x260   :  { %v6516_v45 = vpop.f32.mrb[30].mxu0 }
 0x261   :  { %v906_v46 = vmul.f32 %v6516_v45, %v6516_v45  ;;  %v5255_v47 = vpop.f32.mrb[31].mxu0 }
 0x262   :  { %v484_v47 = vpop.permute.xlu1 %483 }
 0x263   :  { %v911_v48 = vadd.f32 %v906_v46, %v901_v18 }
 0x264   :  { %v6520_v49 = vpop.f32.mrb[32].mxu0 }
 0x265   :  { %v916_v50 = vmax.f32 %v911_v48, 1e-08  ;;  %v907_v51 = vmul.f32 %v6520_v49, %v6520_v49  ;;  %v5258_v52 = vpop.f32.mrb[33].mxu0 }
 0x267   :  { %5980 = vrsqrt.f32 %v916_v50  ;;  %v912_v53 = vadd.f32 %v907_v51, %v902_v25  ;;  %vm923_vm8 = vcmp.eq.f32.partialorder %v916_v50, inf  ;;  %v926_v16 = vand.u32 2147483648, %v916_v50 }
 0x268   :  { %v6524_v54 = vpop.f32.mrb[34].mxu0  ;;  %vm925_vm9 = vcmp.eq.f32.partialorder %v916_v50, 0.0 }
 0x269   :  { %v917_v55 = vmax.f32 %v912_v53, 1e-08  ;;  %v908_v56 = vmul.f32 %v6524_v54, %v6524_v54  ;;  %v5261_v57 = vpop.f32.mrb[35].mxu0 }
 0x26b   :  { %v913_v58 = vadd.f32 %v908_v56, %v903_v31  ;;  %5982 = vrsqrt.f32 %v917_v55  ;;  %vm930_vm10 = vcmp.eq.f32.partialorder %v917_v55, inf  ;;  %v933_v31 = vand.u32 2147483648, %v917_v55  ;;  %v504_v56 = vpop.permute.xlu0 %503 }
 0x26c   :  { %v6533_v59 = vpop.f32.mrb[36].mxu0  ;;  %vm932_vm11 = vcmp.eq.f32.partialorder %v917_v55, 0.0 }
 0x26d   :  { %v918_v60 = vmax.f32 %v913_v58, 1e-08  ;;  %v909_v61 = vmul.f32 %v6533_v59, %v6533_v59  ;;  %v5264_v62 = vpop.f32.mrb[37].mxu0 }
 0x26f   :  { %v914_v63 = vadd.f32 %v909_v61, %v904_v38  ;;  %5984 = vrsqrt.f32 %v918_v60  ;;  %v189_v38 = vld [vmem:[%s6529_s9 + $0x28] sm:$0xff]  ;;  %vm937_vm12 = vcmp.eq.f32.partialorder %v918_v60, inf  ;;  %vm939_vm13 = vcmp.eq.f32.partialorder %v918_v60, 0.0  ;;  %s6191_s9 = smov 21  }
 0x270   :  { %v5820_v46 = vpack.c.bf16 %v189_v38, %v188_v37  ;;  %s4704_s12 = sld [smem:[%s7480_s0 + %s6191_s9]]   ;;  %s6205_s9 = smov 31  }
 0x271   :  { %v5981_v5 = vpop.eup %5980  ;;  %v919_v7 = vmax.f32 %v914_v63, 1e-08  ;;  %v6539_v9 = vpop.f32.mrb[38].mxu0 }
 0x272   :  { %v910_v11 = vmul.f32 %v6539_v9, %v6539_v9  ;;  %v5267_v13 = vpop.f32.mrb[39].mxu0  ;;  %v922_v15 = vmul.f32 %v5981_v5, %v916_v50 }
 0x273   :  { %5986 = vrsqrt.f32 %v919_v7  ;;  %vm944_vm14 = vcmp.eq.f32.partialorder %v919_v7, inf  ;;  %v947_v53 = vand.u32 2147483648, %v919_v7  ;;  %vm946_vm15 = vcmp.eq.f32.partialorder %v919_v7, 0.0 }
 0x274   :  { %v915_v18 = vadd.f32 %v910_v11, %v905_v44  ;;  %v924_v20 = vsel %vm923_vm8, %v916_v50, %v922_v15  ;;  %v940_v44 = vand.u32 2147483648, %v918_v60  ;;  %v506_v11 = vpop.permute.xlu0 %505  ;;  %vm1064_vm8 = vcmask 392192  }
 0x275   :  { %v5983_v25 = vpop.eup %5982  ;;  %v927_v27 = vsel %vm925_vm9, %v926_v16, %v924_v20  ;;  %v5823_v15 = vpack.c.bf16 %v194_v3, %v193_v2 }
 0x276   :  { %v920_v29 = vmax.f32 %v915_v18, 1e-08  ;;  %5273 = vmatmul.mubr.msk.f32.vlgmr.msra.gmra.mrb[10].mxu1 %vm701_vm7, %v927_v27  ;;  %v929_v30 = vmul.f32 %v5983_v25, %v917_v55 }
 0x277   :  { %5275 = vmatprep.mubr.msk.f32.mxu1 %vm6162_vm0, %v6163_v1  ;;  %5815 = vmatpush3.bf16.msra.mxu1 %v5814_v17 }
 0x278   :  { %v931_v35 = vsel %vm930_vm10, %v917_v55, %v929_v30  ;;  %5816 = vmatprep.subr.bf16.mxu1 %v6160_v0  ;;  %5988 = vrsqrt.f32 %v920_v29  ;;  %vm951_vm2 = vcmp.eq.f32.partialorder %v920_v29, inf  ;;  %v954_v62 = vand.u32 2147483648, %v920_v29 }
 0x279   :  { %v5985_v41 = vpop.eup %5984  ;;  %v934_v42 = vsel %vm932_vm11, %v933_v31, %v931_v35  ;;  %vm953_vm3 = vcmp.eq.f32.partialorder %v920_v29, 0.0 }
 0x27a   :  { %5276 = vmatmul.mubr.msk.f32.gmra.mrb[12].mxu1 %vm701_vm7, %v934_v42  ;;  %v936_v43 = vmul.f32 %v5985_v41, %v918_v60 }
 0x27b   :  { %5278 = vmatprep.mubr.msk.f32.mxu1 %vm6162_vm0, %v6163_v1  ;;  %5818 = vmatpush3.bf16.msra.mxu1 %v5817_v34 }
 0x27c   :  { %v938_v48 = vsel %vm937_vm12, %v918_v60, %v936_v43  ;;  %5819 = vmatprep.subr.bf16.mxu1 %v6160_v0  ;;  %v486_v60 = vpop.permute.xlu1 %485 }
 0x27d   :  { %v5987_v50 = vpop.eup %5986  ;;  %v941_v51 = vsel %vm939_vm13, %v940_v44, %v938_v48  ;;  %v519_v17 = vsel %vm262_vm1, %v6326_v28, %v486_v60 }
 0x27e   :  { %5279 = vmatmul.mubr.msk.f32.gmra.mrb[14].mxu1 %vm701_vm7, %v941_v51  ;;  %v943_v52 = vmul.f32 %v5987_v50, %v919_v7  ;;  %v525_v20 = vsel %vm523_vm6, %v519_v17, %v506_v11 }
 0x27f   :  { %5281 = vmatprep.mubr.msk.f32.mxu1 %vm6162_vm0, %v6163_v1  ;;  %5821 = vmatpush3.bf16.msra.mxu1 %v5820_v46 }
 0x280   :  { %v945_v55 = vsel %vm944_vm14, %v919_v7, %v943_v52  ;;  %5822 = vmatprep.subr.bf16.mxu1 %v6160_v0  ;;  %v518_v7 = vsel %vm262_vm1, %v6321_v24, %v484_v47  ;;  %v488_v13 = vpop.permute.xlu1 %487  ;;  %v508_v24 = vpop.permute.xlu0 %507 }
 0x281   :  { %v948_v57 = vsel %vm946_vm15, %v947_v53, %v945_v55  ;;  %v524_v16 = vsel %vm523_vm6, %v518_v7, %v504_v56  ;;  %v520_v21 = vsel %vm262_vm1, %v6332_v32, %v488_v13 }
 0x282   :  { %v5989_v58 = vpop.eup %5988  ;;  %5282 = vmatmul.mubr.msk.f32.gmra.mrb[16].mxu1 %vm701_vm7, %v948_v57  ;;  %v526_v28 = vsel %vm523_vm6, %v520_v21, %v508_v24 }
 0x283   :  { %5284 = vmatprep.mubr.msk.f32.mxu1 %vm6162_vm0, %v6163_v1  ;;  %v950_v61 = vmul.f32 %v5989_v58, %v920_v29 }
 0x284   :  { %v490_v18 = vpop.permute.xlu1 %489  ;;  %v510_v22 = vpop.permute.xlu0 %509 }
 0x285   :  { %v952_v63 = vsel %vm951_vm2, %v920_v29, %v950_v61  ;;  %v521_v23 = vsel %vm262_vm1, %v6336_v36, %v490_v18  ;;  %v195_v36 = vld [vmem:[%s4693_s17] sm:$0xff] }
 0x286   :  { %v955_v5 = vsel %vm953_vm3, %v954_v62, %v952_v63  ;;  %v527_v27 = vsel %vm523_vm6, %v521_v23, %v510_v22 }
 0x287   :  { %5285 = vmatmul.mubr.msk.f32.gmra.mrb[18].mxu1 %vm701_vm7, %v955_v5 }
 0x288   :  { %5299 = vmatprep.mubr.msk.f32.mxu1 %vm6162_vm0, %v6163_v1  ;;  %v492_v25 = vpop.permute.xlu1 %491  ;;  %v512_v29 = vpop.permute.xlu0 %511 }
 0x289   :  { %v522_v32 = vsel %vm262_vm1, %v6342_v40, %v492_v25  ;;  %v196_v40 = vld [vmem:[%s4693_s17 + $0x8] sm:$0xff]  ;;  %s6193_s17 = smov 24  }
 0x28a   :  { %v528_v30 = vsel %vm523_vm6, %v522_v32, %v512_v29  ;;  %s4707_s20 = sld [smem:[%s7480_s0 + %s6193_s17]]  }
 0x28b   :  { %5300 = vmatmul.mubr.msk.f32.vlgmr.msra.gmra.mrb[20].mxu1 %vm1064_vm8, %v524_v16 }
 0x28c   :  { %5302 = vmatprep.mubr.msk.f32.mxu1 %vm6162_vm0, %v6163_v1  ;;  %5825 = vmatpush3.bf16.msk.msra.mxu1 %vm6314_vm4, %v5823_v15  ;;  %vm1595_vm4 = vcmask 1043456  }
 0x28d   :  { %5429 = vmatprep.subr.mxu1 %v6163_v1 }
 0x28f   :  { %5303 = vmatmul.mubr.msk.f32.gmra.mrb[22].mxu1 %vm1064_vm8, %v525_v20 }
 0x290   :  { %5305 = vmatprep.mubr.msk.f32.mxu1 %vm6162_vm0, %v6163_v1 }
 0x293   :  { %5306 = vmatmul.mubr.msk.f32.gmra.mrb[24].mxu1 %vm1064_vm8, %v526_v28 }
 0x294   :  { %5308 = vmatprep.mubr.msk.f32.mxu1 %vm6162_vm0, %v6163_v1 }
 0x297   :  { %5309 = vmatmul.mubr.msk.f32.gmra.mrb[26].mxu1 %vm1064_vm8, %v527_v27 }
 0x298   :  { %5311 = vmatprep.mubr.msk.f32.mxu1 %vm6162_vm0, %v6163_v1 }
 0x29b   :  { %5312 = vmatmul.mubr.msk.f32.gmra.mrb[28].mxu1 %vm1064_vm8, %v528_v30 }
 0x29c   :  { %5318 = vmatprep.mubr.msk.f32.mxu1 %vm6162_vm0, %v6163_v1 }
 0x29f   :  { %5319 = vmatmul.mubr.msk.f32.vlgmr.msra.gmra.mrb[30].mxu1 %vm701_vm7, %v6476_v4  ;;  %v5827_v4 = vpack.c.bf16 %v196_v40, %v195_v36 }
 0x2a0   :  { %5321 = vmatprep.mubr.msk.f32.mxu1 %vm6162_vm0, %v6163_v1 }
 0x2a1   :  { %5828 = vmatpush3.bf16.msra.mxu0 %v5827_v4 }
 0x2a2   :  { %5382 = vmatprep.subr.mxu0 %v6163_v1 }
 0x2a3   :  { %5322 = vmatmul.mubr.msk.f32.gmra.mrb[32].mxu1 %vm701_vm7, %v6478_v6 }
 0x2a4   :  { %5324 = vmatprep.mubr.msk.f32.mxu1 %vm6162_vm0, %v6163_v1 }
 0x2a7   :  { %5325 = vmatmul.mubr.msk.f32.gmra.mrb[34].mxu1 %vm701_vm7, %v6480_v8 }
 0x2a8   :  { %5327 = vmatprep.mubr.msk.f32.mxu1 %vm6162_vm0, %v6163_v1 }
 0x2ab   :  { %5328 = vmatmul.mubr.msk.f32.gmra.mrb[36].mxu1 %vm701_vm7, %v6482_v10 }
 0x2ac   :  { %5330 = vmatprep.mubr.msk.f32.mxu1 %vm6162_vm0, %v6163_v1 }
 0x2af   :  { %5331 = vmatmul.mubr.msk.f32.gmra.mrb[38].mxu1 %vm701_vm7, %v6484_v12 }
 0x2b0   :  { %5333 = vmatprep.mubr.msk.f32.mxu1 %vm6162_vm0, %v6163_v1 }
 0x2b3   :  { %5334 = vmatmul.mubr.msk.f32.gmra.mrb[40].mxu1 %vm701_vm7, %v6486_v14 }
 0x2b4   :  { %5336 = vmatprep.mubr.msk.f32.mxu1 %vm6162_vm0, %v6163_v1 }
 0x2b7   :  { %5337 = vmatmul.mubr.msk.f32.gmra.mrb[42].mxu1 %vm701_vm7, %v6492_v19 }
 0x2b8   :  { %5339 = vmatprep.mubr.msk.f32.mxu1 %vm6162_vm0, %v6163_v1 }
 0x2bb   :  { %5340 = vmatmul.mubr.msk.f32.gmra.mrb[44].mxu1 %vm701_vm7, %v6498_v26 }
 0x2bc   :  { %5342 = vmatprep.mubr.msk.f32.mxu1 %vm6162_vm0, %v6163_v1 }
 0x2bf   :  { %5343 = vmatmul.mubr.msk.f32.gmra.mrb[46].mxu1 %vm701_vm7, %v6504_v33 }
 0x2c0   :  { %5345 = vmatprep.mubr.msk.f32.mxu1 %vm6162_vm0, %v6163_v1 }
 0x2c3   :  { %5346 = vmatmul.mubr.msk.f32.gmra.mrb[48].mxu1 %vm701_vm7, %v6510_v39 }
 0x2c4   :  { %5348 = vmatprep.mubr.msk.f32.mxu1 %vm6162_vm0, %v6163_v1 }
 0x2c7   :  { %5349 = vmatmul.mubr.msk.f32.gmra.mrb[50].mxu1 %vm701_vm7, %v6516_v45 }
 0x2c8   :  { %5351 = vmatprep.mubr.msk.f32.mxu1 %vm6162_vm0, %v6163_v1 }
 0x2cb   :  { %5352 = vmatmul.mubr.msk.f32.gmra.mrb[52].mxu1 %vm701_vm7, %v6520_v49  ;;  %v4765_v49 = vld [vmem:[%s4691_s21] ss:$0 sm:$0xff]  ;;  %s6194_s21 = smov 22  }
 0x2cc   :  { %5354 = vmatprep.mubr.msk.f32.mxu1 %vm6162_vm0, %v6163_v1  ;;  %s4705_s24 = sld [smem:[%s7480_s0 + %s6194_s21]]  }
 0x2cf   :  { %5355 = vmatmul.mubr.msk.f32.gmra.mrb[54].mxu1 %vm701_vm7, %v6524_v54 }
 0x2d0   :  { %5357 = vmatprep.mubr.msk.f32.mxu1 %vm6162_vm0, %v6163_v1 }
 0x2d3   :  { %5358 = vmatmul.mubr.msk.f32.gmra.mrb[56].mxu1 %vm701_vm7, %v6533_v59 }
 0x2d4   :  { %5360 = vmatprep.mubr.msk.f32.mxu1 %vm6162_vm0, %v6163_v1 }
 0x2d7   :  { %5361 = vmatmul.mubr.msk.f32.gmra.mrb[58].mxu1 %vm701_vm7, %v6539_v9 }
 0x2d8   :  { %5431 = vmatprep.mubr.msk.f32.mxu1 %vm6162_vm0, %v6163_v1 }
 0x349   :  { %v1040_v6 = vpop.f32.mrb[10].mxu1 }
 0x34a   :  { %v5274_v8 = vpop.f32.mrb[11].mxu1 }
 0x34d   :  { %v1045_v10 = vpop.f32.mrb[12].mxu1 }
 0x34e   :  { %v5277_v12 = vpop.f32.mrb[13].mxu1 }
 0x351   :  { %v1050_v14 = vpop.f32.mrb[14].mxu1 }
 0x352   :  { %v5280_v19 = vpop.f32.mrb[15].mxu1 }
 0x355   :  { %v1055_v26 = vpop.f32.mrb[16].mxu1 }
 0x356   :  { %v5283_v33 = vpop.f32.mrb[17].mxu1 }
 0x35a   :  { %v1060_v39 = vpop.f32.mrb[18].mxu1 }
 0x35b   :  { %v5286_v45 = vpop.f32.mrb[19].mxu1 }
 0x35e   :  { %v1146_v54 = vpop.f32.mrb[20].mxu1 }
 0x35f   :  { %v1147_v59 = vadd.f32 %v1146_v54, %v1040_v6  ;;  %v5301_v9 = vpop.f32.mrb[21].mxu1 }
 0x361   :  { %v6668_v31 = vadd.f32 %v4765_v49, %v1147_v59 }
 0x362   :  { %v1151_v34 = vpop.f32.mrb[22].mxu1 }
 0x363   :  { %v1369_v35 = vsub.f32 0.0, %v6668_v31  ;;  %v1152_v37 = vadd.f32 %v1151_v34, %v1045_v10  ;;  %v5304_v38 = vpop.f32.mrb[23].mxu1 }
 0x365   :  { %v1374_v41 = vmul.f32 1.442695, %v1369_v35  ;;  %v6671_v42 = vadd.f32 %v4765_v49, %v1152_v37 }
 0x366   :  { %v1156_v43 = vpop.f32.mrb[24].mxu1 }
 0x367   :  { %5990 = vpow2.f32 %v1374_v41  ;;  %v1370_v44 = vsub.f32 0.0, %v6671_v42  ;;  %v1157_v46 = vadd.f32 %v1156_v43, %v1050_v14  ;;  %v5307_v47 = vpop.f32.mrb[25].mxu1 }
 0x369   :  { %v1376_v48 = vmul.f32 1.442695, %v1370_v44  ;;  %v6674_v50 = vadd.f32 %v4765_v49, %v1157_v46 }
 0x36a   :  { %v1161_v51 = vpop.f32.mrb[26].mxu1 }
 0x36b   :  { %5992 = vpow2.f32 %v1376_v48  ;;  %v1371_v52 = vsub.f32 0.0, %v6674_v50  ;;  %v1162_v53 = vadd.f32 %v1161_v51, %v1055_v26  ;;  %v5310_v55 = vpop.f32.mrb[27].mxu1  ;;  %v198_v51 = vld [vmem:[%s4695_s26] sm:$0xf]  ;;  %s6195_s26 = smov 25  }
 0x36c   :  { %s4708_s1 = sld [smem:[%s7480_s0 + %s6195_s26]]  }
 0x36d   :  { %v1378_v56 = vmul.f32 1.442695, %v1371_v52  ;;  %v6677_v57 = vadd.f32 %v4765_v49, %v1162_v53  ;;  %v4782_v52 = vld [vmem:[%s4694_s2] ss:$0 sm:$0xff]  ;;  %s6196_s2 = smov 4  }
 0x36e   :  { %v1166_v58 = vpop.f32.mrb[28].mxu1 }
 0x36f   :  { %5994 = vpow2.f32 %v1378_v56  ;;  %v1372_v60 = vsub.f32 0.0, %v6677_v57  ;;  %v1167_v61 = vadd.f32 %v1166_v58, %v1060_v39  ;;  %v5313_v62 = vpop.f32.mrb[29].mxu1 }
 0x371   :  { %v5991_v63 = vpop.eup %5990  ;;  %v1380_v2 = vmul.f32 1.442695, %v1372_v60  ;;  %v6680_v3 = vadd.f32 %v4765_v49, %v1167_v61 }
 0x372   :  { %v1384_v5 = vadd.f32 1.0, %v5991_v63  ;;  %v6682_v7 = vpop.f32.mrb[30].mxu1 }
 0x373   :  { %5996 = vpow2.f32 %v1380_v2  ;;  %v1373_v11 = vsub.f32 0.0, %v6680_v3  ;;  %v5320_v13 = vpop.f32.mrb[31].mxu1 }
 0x374   :  { %5998 = vrcp.f32 %v1384_v5 }
 0x375   :  { %v5993_v15 = vpop.eup %5992  ;;  %v1382_v16 = vmul.f32 1.442695, %v1373_v11 }
 0x376   :  { %v1385_v17 = vadd.f32 1.0, %v5993_v15  ;;  %v6685_v24 = vpop.f32.mrb[32].mxu1 }
 0x377   :  { %6000 = vpow2.f32 %v1382_v16  ;;  %v5323_v18 = vpop.f32.mrb[33].mxu1 }
 0x378   :  { %6002 = vrcp.f32 %v1385_v17 }
 0x379   :  { %v5995_v20 = vpop.eup %5994 }
 0x37a   :  { %v1386_v21 = vadd.f32 1.0, %v5995_v20  ;;  %v6687_v28 = vpop.f32.mrb[34].mxu1 }
 0x37b   :  { %v5326_v22 = vpop.f32.mrb[35].mxu1 }
 0x37c   :  { %6004 = vrcp.f32 %v1386_v21 }
 0x37d   :  { %v5997_v23 = vpop.eup %5996 }
 0x37e   :  { %v5999_v25 = vpop.eup %5998  ;;  %v1387_v27 = vadd.f32 1.0, %v5997_v23  ;;  %v6689_v32 = vpop.f32.mrb[36].mxu1 }
 0x37f   :  { %v5329_v29 = vpop.f32.mrb[37].mxu1  ;;  %5368 = vmatmul.mubr.msk.f32.vlgmr.msra.gmra.mrb[40].mxu0 %vm262_vm1, %v5999_v25 }
 0x380   :  { %6006 = vrcp.f32 %v1387_v27  ;;  %5370 = vmatprep.mubr.msk.f32.mxu0 %vm6162_vm0, %v6163_v1  ;;  %5383 = vmatpush3.msk.msra.mxu0 %vm1595_vm4, %v198_v51 }
 0x381   :  { %v6001_v30 = vpop.eup %6000  ;;  %5465 = vmatprep.subr.mxu0 %v6163_v1 }
 0x382   :  { %v6003_v36 = vpop.eup %6002  ;;  %v1388_v40 = vadd.f32 1.0, %v6001_v30  ;;  %v6694_v4 = vpop.f32.mrb[38].mxu1 }
 0x383   :  { %v5332_v6 = vpop.f32.mrb[39].mxu1  ;;  %5371 = vmatmul.mubr.msk.f32.gmra.mrb[42].mxu0 %vm262_vm1, %v6003_v36 }
 0x384   :  { %6008 = vrcp.f32 %v1388_v40  ;;  %5373 = vmatprep.mubr.msk.f32.mxu0 %vm6162_vm0, %v6163_v1 }
 0x386   :  { %v6005_v8 = vpop.eup %6004  ;;  %v6699_v10 = vpop.f32.mrb[40].mxu1 }
 0x387   :  { %v5335_v12 = vpop.f32.mrb[41].mxu1  ;;  %5374 = vmatmul.mubr.msk.f32.gmra.mrb[44].mxu0 %vm262_vm1, %v6005_v8 }
 0x388   :  { %5376 = vmatprep.mubr.msk.f32.mxu0 %vm6162_vm0, %v6163_v1 }
 0x38a   :  { %v6007_v14 = vpop.eup %6006  ;;  %v6704_v19 = vpop.f32.mrb[42].mxu1 }
 0x38b   :  { %v5338_v26 = vpop.f32.mrb[43].mxu1  ;;  %5377 = vmatmul.mubr.msk.f32.gmra.mrb[46].mxu0 %vm262_vm1, %v6007_v14 }
 0x38c   :  { %5379 = vmatprep.mubr.msk.f32.mxu0 %vm6162_vm0, %v6163_v1 }
 0x38e   :  { %v6009_v33 = vpop.eup %6008  ;;  %v6709_v39 = vpop.f32.mrb[44].mxu1 }
 0x38f   :  { %v5341_v45 = vpop.f32.mrb[45].mxu1  ;;  %5380 = vmatmul.mubr.msk.f32.gmra.mrb[48].mxu0 %vm262_vm1, %v6009_v33 }
 0x390   :  { %5384 = vmatprep.mubr.msk.f32.mxu0 %vm6162_vm0, %v6163_v1 }
 0x392   :  { %v6714_v49 = vpop.f32.mrb[46].mxu1 }
 0x393   :  { %v5344_v54 = vpop.f32.mrb[47].mxu1 }
 0x396   :  { %v6716_v59 = vpop.f32.mrb[48].mxu1 }
 0x397   :  { %v5347_v9 = vpop.f32.mrb[49].mxu1 }
 0x39a   :  { %v6718_v34 = vpop.f32.mrb[50].mxu1 }
 0x39b   :  { %v5350_v35 = vpop.f32.mrb[51].mxu1 }
 0x39e   :  { %v6720_v37 = vpop.f32.mrb[52].mxu1 }
 0x39f   :  { %v5353_v38 = vpop.f32.mrb[53].mxu1 }
 0x3a2   :  { %v6722_v41 = vpop.f32.mrb[54].mxu1 }
 0x3a3   :  { %v5356_v43 = vpop.f32.mrb[55].mxu1 }
 0x3a6   :  { %v6724_v44 = vpop.f32.mrb[56].mxu1 }
 0x3a7   :  { %v5359_v46 = vpop.f32.mrb[57].mxu1 }
 0x3aa   :  { %v6726_v47 = vpop.f32.mrb[58].mxu1 }
 0x3ab   :  { %v5362_v48 = vpop.f32.mrb[59].mxu1 }
 0x452   :  { %v1481_v53 = vpop.f32.mrb[40].mxu0 }
 0x453   :  { %v1482_v55 = vadd.f32 %v4782_v52, %v1481_v53  ;;  %v5369_v56 = vpop.f32.mrb[41].mxu0 }
 0x455   :  { %v1505_v58 = vsub.f32 0.0, %v1482_v55 }
 0x456   :  { %v1486_v60 = vpop.f32.mrb[42].mxu0 }
 0x457   :  { %v1510_v61 = vmul.f32 1.442695, %v1505_v58  ;;  %v1487_v62 = vadd.f32 %v4782_v52, %v1486_v60  ;;  %v5372_v63 = vpop.f32.mrb[43].mxu0 }
 0x459   :  { %6010 = vpow2.f32 %v1510_v61  ;;  %v1506_v2 = vsub.f32 0.0, %v1487_v62 }
 0x45a   :  { %v1491_v5 = vpop.f32.mrb[44].mxu0 }
 0x45b   :  { %v1512_v11 = vmul.f32 1.442695, %v1506_v2  ;;  %v1492_v13 = vadd.f32 %v4782_v52, %v1491_v5  ;;  %v5375_v15 = vpop.f32.mrb[45].mxu0 }
 0x45d   :  { %6012 = vpow2.f32 %v1512_v11  ;;  %v1507_v16 = vsub.f32 0.0, %v1492_v13 }
 0x45e   :  { %v1496_v17 = vpop.f32.mrb[46].mxu0 }
 0x45f   :  { %v1514_v18 = vmul.f32 1.442695, %v1507_v16  ;;  %v1497_v20 = vadd.f32 %v4782_v52, %v1496_v17  ;;  %v5378_v21 = vpop.f32.mrb[47].mxu0 }
 0x461   :  { %6014 = vpow2.f32 %v1514_v18  ;;  %v1508_v22 = vsub.f32 0.0, %v1497_v20 }
 0x462   :  { %v1501_v23 = vpop.f32.mrb[48].mxu0 }
 0x463   :  { %v6011_v25 = vpop.eup %6010  ;;  %v1516_v27 = vmul.f32 1.442695, %v1508_v22  ;;  %v1502_v29 = vadd.f32 %v4782_v52, %v1501_v23  ;;  %v5381_v30 = vpop.f32.mrb[49].mxu0 }
 0x464   :  { %v1520_v36 = vadd.f32 1.0, %v6011_v25 }
 0x465   :  { %6016 = vpow2.f32 %v1516_v27  ;;  %v1509_v40 = vsub.f32 0.0, %v1502_v29 }
 0x466   :  { %6018 = vrcp.f32 %v1520_v36 }
 0x467   :  { %v6013_v6 = vpop.eup %6012  ;;  %v1518_v8 = vmul.f32 1.442695, %v1509_v40 }
 0x468   :  { %v1521_v12 = vadd.f32 1.0, %v6013_v6 }
 0x469   :  { %6020 = vpow2.f32 %v1518_v8 }
 0x46a   :  { %6022 = vrcp.f32 %v1521_v12 }
 0x46b   :  { %v6015_v14 = vpop.eup %6014 }
 0x46c   :  { %v1522_v26 = vadd.f32 1.0, %v6015_v14 }
 0x46e   :  { %6024 = vrcp.f32 %v1522_v26 }
 0x46f   :  { %v6017_v33 = vpop.eup %6016 }
 0x470   :  { %v6019_v45 = vpop.eup %6018  ;;  %v1523_v54 = vadd.f32 1.0, %v6017_v33 }
 0x471   :  { %v1530_v9 = vmul.f32 %v6019_v45, %v6682_v7  ;;  %v1535_v35 = vmul.f32 %v6019_v45, %v6699_v10  ;;  %v1540_v38 = vmul.f32 %v6019_v45, %v6718_v34 }
 0x472   :  { %6026 = vrcp.f32 %v1523_v54 }
 0x473   :  { %v6021_v43 = vpop.eup %6020  ;;  %5385 = vmatmul.mubr.msk.f32.vlgmr.msra.gmra.mrb[50].mxu0 %vm579_vm5, %v1530_v9 }
 0x474   :  { %v6023_v46 = vpop.eup %6022  ;;  %v1524_v48 = vadd.f32 1.0, %v6021_v43  ;;  %5387 = vmatprep.mubr.msk.f32.mxu0 %vm6162_vm0, %v6163_v1 }
 0x475   :  { %v1531_v51 = vmul.f32 %v6023_v46, %v6685_v24  ;;  %v1536_v52 = vmul.f32 %v6023_v46, %v6704_v19  ;;  %v1541_v53 = vmul.f32 %v6023_v46, %v6720_v37 }
 0x476   :  { %6028 = vrcp.f32 %v1524_v48 }
 0x477   :  { %5388 = vmatmul.mubr.msk.f32.gmra.mrb[52].mxu0 %vm579_vm5, %v1531_v51 }
 0x478   :  { %v6025_v7 = vpop.eup %6024  ;;  %5390 = vmatprep.mubr.msk.f32.mxu0 %vm6162_vm0, %v6163_v1 }
 0x479   :  { %v1532_v10 = vmul.f32 %v6025_v7, %v6687_v28  ;;  %v1537_v34 = vmul.f32 %v6025_v7, %v6709_v39  ;;  %v1542_v55 = vmul.f32 %v6025_v7, %v6722_v41 }
 0x47b   :  { %5391 = vmatmul.mubr.msk.f32.gmra.mrb[54].mxu0 %vm579_vm5, %v1532_v10 }
 0x47c   :  { %v6027_v24 = vpop.eup %6026  ;;  %5393 = vmatprep.mubr.msk.f32.mxu0 %vm6162_vm0, %v6163_v1 }
 0x47d   :  { %v1533_v19 = vmul.f32 %v6027_v24, %v6689_v32  ;;  %v1538_v37 = vmul.f32 %v6027_v24, %v6714_v49  ;;  %v1543_v56 = vmul.f32 %v6027_v24, %v6724_v44  ;;  %v203_v32 = vld [vmem:[%s4699_s6] sm:$0xf]  ;;  %s7200_s6 = sld [smem:[%s7480_s0 + %s6196_s2]]  }
 0x47e   :  { %5466 = vmatpush3.msk.msra.mxu0 %vm1595_vm4, %v203_v32  ;;  %v200_v32 = vld [vmem:[%s4696_s14 + $0x8] sm:$0xff] }
 0x47f   :  { %5394 = vmatmul.mubr.msk.f32.gmra.mrb[56].mxu0 %vm579_vm5, %v1533_v19  ;;  %5578 = vmatprep.subr.mxu0 %v6163_v1 }
 0x480   :  { %v6029_v58 = vpop.eup %6028  ;;  %5396 = vmatprep.mubr.msk.f32.mxu0 %vm6162_vm0, %v6163_v1 }
 0x481   :  { %v1534_v28 = vmul.f32 %v6029_v58, %v6694_v4  ;;  %v1539_v39 = vmul.f32 %v6029_v58, %v6716_v59  ;;  %v1544_v41 = vmul.f32 %v6029_v58, %v6726_v47  ;;  %v201_v4 = vld [vmem:[%s4697_s10] sm:$0xf] }
 0x482   :  { %5430 = vmatpush3.msk.msra.mxu1 %vm1595_vm4, %v201_v4 }
 0x483   :  { %5397 = vmatmul.mubr.msk.f32.gmra.mrb[58].mxu0 %vm579_vm5, %v1534_v28  ;;  %5829 = vmatprep.subr.bf16.mxu1 %v6160_v0 }
 0x484   :  { %5399 = vmatprep.mubr.msk.f32.mxu0 %vm6162_vm0, %v6163_v1 }
 0x487   :  { %5400 = vmatmul.mubr.msk.f32.gmra.mrb[60].mxu0 %vm579_vm5, %v1535_v35 }
 0x488   :  { %5402 = vmatprep.mubr.msk.f32.mxu0 %vm6162_vm0, %v6163_v1 }
 0x48b   :  { %5403 = vmatmul.mubr.msk.f32.gmra.mrb[62].mxu0 %vm579_vm5, %v1536_v52 }
 0x48c   :  { %5405 = vmatprep.mubr.msk.f32.mxu0 %vm6162_vm0, %v6163_v1 }
 0x48f   :  { %5406 = vmatmul.mubr.msk.f32.gmra.mrb[64].mxu0 %vm579_vm5, %v1537_v34 }
 0x490   :  { %5408 = vmatprep.mubr.msk.f32.mxu0 %vm6162_vm0, %v6163_v1 }
 0x493   :  { %5409 = vmatmul.mubr.msk.f32.gmra.mrb[66].mxu0 %vm579_vm5, %v1538_v37 }
 0x494   :  { %5411 = vmatprep.mubr.msk.f32.mxu0 %vm6162_vm0, %v6163_v1 }
 0x497   :  { %5412 = vmatmul.mubr.msk.f32.gmra.mrb[68].mxu0 %vm579_vm5, %v1539_v39 }
 0x498   :  { %5414 = vmatprep.mubr.msk.f32.mxu0 %vm6162_vm0, %v6163_v1 }
 0x49b   :  { %5415 = vmatmul.mubr.msk.f32.gmra.mrb[70].mxu0 %vm579_vm5, %v1540_v38 }
 0x49c   :  { %5417 = vmatprep.mubr.msk.f32.mxu0 %vm6162_vm0, %v6163_v1 }
 0x49f   :  { %5418 = vmatmul.mubr.msk.f32.gmra.mrb[72].mxu0 %vm579_vm5, %v1541_v53 }
 0x4a0   :  { %5420 = vmatprep.mubr.msk.f32.mxu0 %vm6162_vm0, %v6163_v1 }
 0x4a3   :  { %5421 = vmatmul.mubr.msk.f32.gmra.mrb[74].mxu0 %vm579_vm5, %v1542_v55 }
 0x4a4   :  { %5423 = vmatprep.mubr.msk.f32.mxu0 %vm6162_vm0, %v6163_v1 }
 0x4a7   :  { %5424 = vmatmul.mubr.msk.f32.gmra.mrb[76].mxu0 %vm579_vm5, %v1543_v56 }
 0x4a8   :  { %5426 = vmatprep.mubr.msk.f32.mxu0 %vm6162_vm0, %v6163_v1 }
 0x4ab   :  { %5427 = vmatmul.mubr.msk.f32.gmra.mrb[78].mxu0 %vm579_vm5, %v1544_v41  ;;  %v199_v41 = vld [vmem:[%s4696_s14] sm:$0xff]  ;;  %s6206_s14 = smov 29  }
 0x4ac   :  { %5467 = vmatprep.mubr.msk.f32.mxu0 %vm6162_vm0, %v6163_v1 }
 0x546   :  { %v1665_v49 = vpop.f32.mrb[50].mxu0 }
 0x547   :  { %v5386_v59 = vpop.f32.mrb[51].mxu0  ;;  %5468 = vmatmul.mubr.msk.f32.vlgmr.msra.gmra.mrb[80].mxu0 %vm579_vm5, %v1665_v49  ;;  %v1739_v13 = vmul.f32 %v1665_v49, %v1665_v49 }
 0x548   :  { %5470 = vmatprep.mubr.msk.f32.mxu0 %vm6162_vm0, %v6163_v1 }
 0x54a   :  { %v1670_v44 = vpop.f32.mrb[52].mxu0 }
 0x54b   :  { %v5389_v47 = vpop.f32.mrb[53].mxu0  ;;  %5471 = vmatmul.mubr.msk.f32.gmra.mrb[82].mxu0 %vm579_vm5, %v1670_v44  ;;  %v1740_v20 = vmul.f32 %v1670_v44, %v1670_v44 }
 0x54c   :  { %5473 = vmatprep.mubr.msk.f32.mxu0 %vm6162_vm0, %v6163_v1 }
 0x54e   :  { %v1675_v60 = vpop.f32.mrb[54].mxu0 }
 0x54f   :  { %v5392_v61 = vpop.f32.mrb[55].mxu0  ;;  %5474 = vmatmul.mubr.msk.f32.gmra.mrb[84].mxu0 %vm579_vm5, %v1675_v60  ;;  %v1741_v27 = vmul.f32 %v1675_v60, %v1675_v60 }
 0x550   :  { %5476 = vmatprep.mubr.msk.f32.mxu0 %vm6162_vm0, %v6163_v1  ;;  %v5830_v61 = vpack.c.bf16 %v200_v32, %v199_v41 }
 0x552   :  { %v1680_v62 = vpop.f32.mrb[56].mxu0 }
 0x553   :  { %v5395_v63 = vpop.f32.mrb[57].mxu0  ;;  %5477 = vmatmul.mubr.msk.f32.gmra.mrb[86].mxu0 %vm579_vm5, %v1680_v62  ;;  %v1742_v6 = vmul.f32 %v1680_v62, %v1680_v62 }
 0x554   :  { %5479 = vmatprep.mubr.msk.f32.mxu0 %vm6162_vm0, %v6163_v1 }
 0x556   :  { %v1685_v2 = vpop.f32.mrb[58].mxu0 }
 0x557   :  { %v5398_v5 = vpop.f32.mrb[59].mxu0  ;;  %5480 = vmatmul.mubr.msk.f32.gmra.mrb[88].mxu0 %vm579_vm5, %v1685_v2  ;;  %v1743_v33 = vmul.f32 %v1685_v2, %v1685_v2 }
 0x558   :  { %5482 = vmatprep.mubr.msk.f32.mxu0 %vm6162_vm0, %v6163_v1 }
 0x55a   :  { %v1690_v11 = vpop.f32.mrb[60].mxu0 }
 0x55b   :  { %v1744_v15 = vmul.f32 %v1690_v11, %v1690_v11  ;;  %v5401_v16 = vpop.f32.mrb[61].mxu0  ;;  %5483 = vmatmul.mubr.msk.f32.gmra.mrb[90].mxu0 %vm579_vm5, %v1690_v11 }
 0x55c   :  { %5485 = vmatprep.mubr.msk.f32.mxu0 %vm6162_vm0, %v6163_v1 }
 0x55d   :  { %v1749_v17 = vadd.f32 %v1744_v15, %v1739_v13 }
 0x55e   :  { %v1695_v18 = vpop.f32.mrb[62].mxu0 }
 0x55f   :  { %v1745_v21 = vmul.f32 %v1695_v18, %v1695_v18  ;;  %v5404_v22 = vpop.f32.mrb[63].mxu0  ;;  %5486 = vmatmul.mubr.msk.f32.gmra.mrb[92].mxu0 %vm579_vm5, %v1695_v18 }
 0x560   :  { %5488 = vmatprep.mubr.msk.f32.mxu0 %vm6162_vm0, %v6163_v1 }
 0x561   :  { %v1750_v23 = vadd.f32 %v1745_v21, %v1740_v20 }
 0x562   :  { %v1700_v25 = vpop.f32.mrb[64].mxu0 }
 0x563   :  { %v1746_v29 = vmul.f32 %v1700_v25, %v1700_v25  ;;  %v5407_v30 = vpop.f32.mrb[65].mxu0  ;;  %5489 = vmatmul.mubr.msk.f32.gmra.mrb[94].mxu0 %vm579_vm5, %v1700_v25 }
 0x564   :  { %5491 = vmatprep.mubr.msk.f32.mxu0 %vm6162_vm0, %v6163_v1 }
 0x565   :  { %v1751_v36 = vadd.f32 %v1746_v29, %v1741_v27 }
 0x566   :  { %v1705_v40 = vpop.f32.mrb[66].mxu0 }
 0x567   :  { %v1747_v8 = vmul.f32 %v1705_v40, %v1705_v40  ;;  %v5410_v12 = vpop.f32.mrb[67].mxu0  ;;  %5492 = vmatmul.mubr.msk.f32.gmra.mrb[96].mxu0 %vm579_vm5, %v1705_v40 }
 0x568   :  { %5494 = vmatprep.mubr.msk.f32.mxu0 %vm6162_vm0, %v6163_v1 }
 0x569   :  { %v1752_v14 = vadd.f32 %v1747_v8, %v1742_v6 }
 0x56a   :  { %v1710_v26 = vpop.f32.mrb[68].mxu0 }
 0x56b   :  { %v1748_v45 = vmul.f32 %v1710_v26, %v1710_v26  ;;  %v5413_v54 = vpop.f32.mrb[69].mxu0  ;;  %5495 = vmatmul.mubr.msk.f32.gmra.mrb[98].mxu0 %vm579_vm5, %v1710_v26 }
 0x56c   :  { %5497 = vmatprep.mubr.msk.f32.mxu0 %vm6162_vm0, %v6163_v1  ;;  %v1547_v54 = vmax.f32 %v6674_v50, 0.0  ;;  %v204_v50 = vld [vmem:[%s4700_s18] sm:$0xff] }
 0x56d   :  { %v1753_v9 = vadd.f32 %v1748_v45, %v1743_v33  ;;  %v1545_v33 = vmax.f32 %v6668_v31, 0.0  ;;  %v1546_v45 = vmax.f32 %v6671_v42, 0.0  ;;  %v1548_v31 = vmax.f32 %v6677_v57, 0.0 }
 0x56e   :  { %v1715_v35 = vpop.f32.mrb[70].mxu0  ;;  %v1549_v42 = vmax.f32 %v6680_v3, 0.0 }
 0x56f   :  { %v1754_v38 = vmul.f32 %v1715_v35, %v1715_v35  ;;  %v5416_v43 = vpop.f32.mrb[71].mxu0  ;;  %5498 = vmatmul.mubr.msk.f32.gmra.mrb[100].mxu0 %vm579_vm5, %v1715_v35 }
 0x570   :  { %5500 = vmatprep.mubr.msk.f32.mxu0 %vm6162_vm0, %v6163_v1 }
 0x571   :  { %v1759_v46 = vadd.f32 %v1754_v38, %v1749_v17 }
 0x572   :  { %v1720_v48 = vpop.f32.mrb[72].mxu0 }
 0x573   :  { %v1764_v51 = vmax.f32 %v1759_v46, 1e-08  ;;  %v1755_v52 = vmul.f32 %v1720_v48, %v1720_v48  ;;  %v5419_v53 = vpop.f32.mrb[73].mxu0  ;;  %5501 = vmatmul.mubr.msk.f32.gmra.mrb[102].mxu0 %vm579_vm5, %v1720_v48 }
 0x574   :  { %5503 = vmatprep.mubr.msk.f32.mxu0 %vm6162_vm0, %v6163_v1 }
 0x575   :  { %6030 = vrsqrt.f32 %v1764_v51  ;;  %v1760_v7 = vadd.f32 %v1755_v52, %v1750_v23  ;;  %vm1771_vm7 = vcmp.eq.f32.partialorder %v1764_v51, inf  ;;  %v1774_v63 = vand.u32 2147483648, %v1764_v51 }
 0x576   :  { %v1725_v10 = vpop.f32.mrb[74].mxu0  ;;  %vm1773_vm9 = vcmp.eq.f32.partialorder %v1764_v51, 0.0 }
 0x577   :  { %v1765_v34 = vmax.f32 %v1760_v7, 1e-08  ;;  %v1756_v55 = vmul.f32 %v1725_v10, %v1725_v10  ;;  %v5422_v24 = vpop.f32.mrb[75].mxu0  ;;  %5504 = vmatmul.mubr.msk.f32.gmra.mrb[104].mxu0 %vm579_vm5, %v1725_v10 }
 0x578   :  { %5506 = vmatprep.mubr.msk.f32.mxu0 %vm6162_vm0, %v6163_v1 }
 0x579   :  { %v1761_v19 = vadd.f32 %v1756_v55, %v1751_v36  ;;  %6032 = vrsqrt.f32 %v1765_v34  ;;  %vm1778_vm10 = vcmp.eq.f32.partialorder %v1765_v34, inf  ;;  %v1781_v16 = vand.u32 2147483648, %v1765_v34 }
 0x57a   :  { %v1730_v37 = vpop.f32.mrb[76].mxu0  ;;  %vm1780_vm11 = vcmp.eq.f32.partialorder %v1765_v34, 0.0 }
 0x57b   :  { %v1766_v56 = vmax.f32 %v1761_v19, 1e-08  ;;  %v1757_v58 = vmul.f32 %v1730_v37, %v1730_v37  ;;  %v5425_v28 = vpop.f32.mrb[77].mxu0  ;;  %5507 = vmatmul.mubr.msk.f32.gmra.mrb[106].mxu0 %vm579_vm5, %v1730_v37 }
 0x57c   :  { %5509 = vmatprep.mubr.msk.f32.mxu0 %vm6162_vm0, %v6163_v1 }
 0x57d   :  { %v1762_v39 = vadd.f32 %v1757_v58, %v1752_v14  ;;  %6034 = vrsqrt.f32 %v1766_v56  ;;  %vm1785_vm12 = vcmp.eq.f32.partialorder %v1766_v56, inf  ;;  %v1788_v22 = vand.u32 2147483648, %v1766_v56 }
 0x57e   :  { %v1735_v4 = vpop.f32.mrb[78].mxu0  ;;  %vm1787_vm13 = vcmp.eq.f32.partialorder %v1766_v56, 0.0 }
 0x57f   :  { %v6031_v49 = vpop.eup %6030  ;;  %v1767_v59 = vmax.f32 %v1762_v39, 1e-08  ;;  %v1758_v44 = vmul.f32 %v1735_v4, %v1735_v4  ;;  %v5428_v47 = vpop.f32.mrb[79].mxu0  ;;  %5510 = vmatmul.mubr.msk.f32.gmra.mrb[108].mxu0 %vm579_vm5, %v1735_v4 }
 0x580   :  { %v1770_v60 = vmul.f32 %v6031_v49, %v1764_v51  ;;  %5580 = vmatprep.mubr.msk.f32.mxu0 %vm6162_vm0, %v6163_v1 }
 0x581   :  { %v1763_v62 = vadd.f32 %v1758_v44, %v1753_v9  ;;  %6036 = vrsqrt.f32 %v1767_v59  ;;  %vm1792_vm14 = vcmp.eq.f32.partialorder %v1767_v59, inf  ;;  %v1795_v30 = vand.u32 2147483648, %v1767_v59  ;;  %v205_v9 = vld [vmem:[%s4700_s18 + $0x8] sm:$0xff]  ;;  %s6201_s18 = smov 28  }
 0x582   :  { %v1772_v2 = vsel %vm1771_vm7, %v1764_v51, %v1770_v60  ;;  %vm1794_vm15 = vcmp.eq.f32.partialorder %v1767_v59, 0.0  ;;  %v5833_v57 = vpack.c.bf16 %v205_v9, %v204_v50  ;;  %s4711_s21 = sld [smem:[%s7480_s0 + %s6201_s18]]  }
 0x583   :  { %v6033_v5 = vpop.eup %6032  ;;  %v1768_v11 = vmax.f32 %v1763_v62, 1e-08  ;;  %v1775_v13 = vsel %vm1773_vm9, %v1774_v63, %v1772_v2  ;;  %s4712_s18 = sld [smem:[%s7480_s0 + %s6206_s14]]  }
 0x584   :  { %5432 = vmatmul.mubr.msk.f32.vlgmr.msra.gmra.mrb[60].mxu1 %vm579_vm5, %v1775_v13  ;;  %v1777_v15 = vmul.f32 %v6033_v5, %v1765_v34 }
 0x585   :  { %5434 = vmatprep.mubr.msk.f32.mxu1 %vm6162_vm0, %v6163_v1  ;;  %5831 = vmatpush3.bf16.msra.mxu1 %v5830_v61  ;;  %6038 = vrsqrt.f32 %v1768_v11  ;;  %vm1799_vm2 = vcmp.eq.f32.partialorder %v1768_v11, inf  ;;  %v1802_v12 = vand.u32 2147483648, %v1768_v11  ;;  %vm1801_vm3 = vcmp.eq.f32.partialorder %v1768_v11, 0.0 }
 0x586   :  { %v1779_v17 = vsel %vm1778_vm10, %v1765_v34, %v1777_v15  ;;  %5832 = vmatprep.subr.bf16.mxu1 %v6160_v0 }
 0x587   :  { %v6035_v18 = vpop.eup %6034  ;;  %v1782_v20 = vsel %vm1780_vm11, %v1781_v16, %v1779_v17 }
 0x588   :  { %5435 = vmatmul.mubr.msk.f32.gmra.mrb[62].mxu1 %vm579_vm5, %v1782_v20  ;;  %v1784_v21 = vmul.f32 %v6035_v18, %v1766_v56 }
 0x589   :  { %5437 = vmatprep.mubr.msk.f32.mxu1 %vm6162_vm0, %v6163_v1 }
 0x58a   :  { %v1786_v23 = vsel %vm1785_vm12, %v1766_v56, %v1784_v21  ;;  %v4815_v21 = vld [vmem:[%s4698_s22] ss:$0 sm:$0xff]  ;;  %s6202_s22 = smov 27  }
 0x58b   :  { %v6037_v25 = vpop.eup %6036  ;;  %v1789_v27 = vsel %vm1787_vm13, %v1788_v22, %v1786_v23  ;;  %s4710_s26 = sld [smem:[%s7480_s0 + %s6202_s22]]  }
 0x58c   :  { %5438 = vmatmul.mubr.msk.f32.gmra.mrb[64].mxu1 %vm579_vm5, %v1789_v27  ;;  %v1791_v29 = vmul.f32 %v6037_v25, %v1767_v59  ;;  %s4716_s22 = sld [smem:[%s7480_s0 + %s6207_s19]]  }
 0x58d   :  { %5440 = vmatprep.mubr.msk.f32.mxu1 %vm6162_vm0, %v6163_v1 }
 0x58e   :  { %v1793_v36 = vsel %vm1792_vm14, %v1767_v59, %v1791_v29 }
 0x58f   :  { %v6039_v40 = vpop.eup %6038  ;;  %v1796_v6 = vsel %vm1794_vm15, %v1795_v30, %v1793_v36 }
 0x590   :  { %5441 = vmatmul.mubr.msk.f32.gmra.mrb[66].mxu1 %vm579_vm5, %v1796_v6  ;;  %v1798_v8 = vmul.f32 %v6039_v40, %v1768_v11 }
 0x591   :  { %5443 = vmatprep.mubr.msk.f32.mxu1 %vm6162_vm0, %v6163_v1 }
 0x592   :  { %v1800_v14 = vsel %vm1799_vm2, %v1768_v11, %v1798_v8  ;;  %vm3280_vm2 = vcmask 162816  }
 0x593   :  { %v1803_v26 = vsel %vm1801_vm3, %v1802_v12, %v1800_v14  ;;  %vm3286_vm3 = vcmask 195584  }
 0x594   :  { %5444 = vmatmul.mubr.msk.f32.gmra.mrb[68].mxu1 %vm579_vm5, %v1803_v26 }
 0x595   :  { %5450 = vmatprep.mubr.msk.f32.mxu1 %vm6162_vm0, %v6163_v1 }
 0x598   :  { %5451 = vmatmul.mubr.msk.f32.vlgmr.msra.gmra.mrb[70].mxu1 %vm262_vm1, %v1545_v33 }
 0x599   :  { %5453 = vmatprep.mubr.msk.f32.mxu1 %vm6162_vm0, %v6163_v1  ;;  %5834 = vmatpush3.bf16.msra.mxu1 %v5833_v57 }
 0x59a   :  { %5531 = vmatprep.subr.mxu1 %v6163_v1 }
 0x59c   :  { %5454 = vmatmul.mubr.msk.f32.gmra.mrb[72].mxu1 %vm262_vm1, %v1546_v45 }
 0x59d   :  { %5456 = vmatprep.mubr.msk.f32.mxu1 %vm6162_vm0, %v6163_v1 }
 0x5a0   :  { %5457 = vmatmul.mubr.msk.f32.gmra.mrb[74].mxu1 %vm262_vm1, %v1547_v54 }
 0x5a1   :  { %5459 = vmatprep.mubr.msk.f32.mxu1 %vm6162_vm0, %v6163_v1 }
 0x5a4   :  { %5460 = vmatmul.mubr.msk.f32.gmra.mrb[76].mxu1 %vm262_vm1, %v1548_v31 }
 0x5a5   :  { %5462 = vmatprep.mubr.msk.f32.mxu1 %vm6162_vm0, %v6163_v1 }
 0x5a8   :  { %5463 = vmatmul.mubr.msk.f32.gmra.mrb[78].mxu1 %vm262_vm1, %v1549_v42 }
 0x5a9   :  { %5516 = vmatprep.mubr.msk.f32.mxu1 %vm6162_vm0, %v6163_v1 }
 0x61a   :  { %v6895_v35 = vpop.f32.mrb[80].mxu0 }
 0x61b   :  { %v5469_v38 = vpop.f32.mrb[81].mxu0 }
 0x61e   :  { %v6897_v3 = vpop.f32.mrb[82].mxu0 }
 0x61f   :  { %v5472_v43 = vpop.f32.mrb[83].mxu0 }
 0x622   :  { %v6899_v46 = vpop.f32.mrb[84].mxu0 }
 0x623   :  { %v5475_v48 = vpop.f32.mrb[85].mxu0 }
 0x626   :  { %v6901_v51 = vpop.f32.mrb[86].mxu0 }
 0x627   :  { %v5478_v52 = vpop.f32.mrb[87].mxu0 }
 0x62a   :  { %v6903_v53 = vpop.f32.mrb[88].mxu0 }
 0x62b   :  { %v5481_v7 = vpop.f32.mrb[89].mxu0 }
 0x62e   :  { %v6905_v10 = vpop.f32.mrb[90].mxu0 }
 0x62f   :  { %v5484_v34 = vpop.f32.mrb[91].mxu0 }
 0x632   :  { %v6907_v55 = vpop.f32.mrb[92].mxu0 }
 0x633   :  { %v5487_v24 = vpop.f32.mrb[93].mxu0 }
 0x636   :  { %v6909_v19 = vpop.f32.mrb[94].mxu0 }
 0x637   :  { %v5490_v37 = vpop.f32.mrb[95].mxu0 }
 0x63a   :  { %v6911_v56 = vpop.f32.mrb[96].mxu0 }
 0x63b   :  { %v5493_v58 = vpop.f32.mrb[97].mxu0 }
 0x63e   :  { %v6913_v28 = vpop.f32.mrb[98].mxu0 }
 0x63f   :  { %v5496_v39 = vpop.f32.mrb[99].mxu0 }
 0x642   :  { %v6915_v41 = vpop.f32.mrb[100].mxu0 }
 0x643   :  { %v5499_v32 = vpop.f32.mrb[101].mxu0 }
 0x646   :  { %v6917_v4 = vpop.f32.mrb[102].mxu0 }
 0x647   :  { %v5502_v49 = vpop.f32.mrb[103].mxu0 }
 0x64a   :  { %v6919_v59 = vpop.f32.mrb[104].mxu0 }
 0x64b   :  { %v5505_v44 = vpop.f32.mrb[105].mxu0 }
 0x64e   :  { %v6921_v47 = vpop.f32.mrb[106].mxu0 }
 0x64f   :  { %v5508_v60 = vpop.f32.mrb[107].mxu0 }
 0x652   :  { %v6923_v61 = vpop.f32.mrb[108].mxu0 }
 0x653   :  { %v5511_v62 = vpop.f32.mrb[109].mxu0 }
 0x657   :  { %v1888_v63 = vpop.f32.mrb[60].mxu1 }
 0x658   :  { %v5433_v2 = vpop.f32.mrb[61].mxu1 }
 0x65b   :  { %v1893_v5 = vpop.f32.mrb[62].mxu1 }
 0x65c   :  { %v5436_v11 = vpop.f32.mrb[63].mxu1 }
 0x65f   :  { %v1898_v13 = vpop.f32.mrb[64].mxu1 }
 0x660   :  { %v5439_v15 = vpop.f32.mrb[65].mxu1 }
 0x663   :  { %v1903_v16 = vpop.f32.mrb[66].mxu1 }
 0x664   :  { %v5442_v17 = vpop.f32.mrb[67].mxu1 }
 0x667   :  { %v1908_v18 = vpop.f32.mrb[68].mxu1 }
 0x668   :  { %v5445_v20 = vpop.f32.mrb[69].mxu1 }
 0x669   :  { %v207_v20 = vld [vmem:[%s4702_s27] sm:$0xf]  ;;  %s6203_s27 = smov 40  }
 0x66a   :  { %s4723_s2 = sld [smem:[%s7480_s0 + %s6203_s27]]  }
 0x66b   :  { %v1993_v22 = vpop.f32.mrb[70].mxu1 }
 0x66c   :  { %v1994_v23 = vadd.f32 %v1993_v22, %v1888_v63  ;;  %v5452_v25 = vpop.f32.mrb[71].mxu1 }
 0x66e   :  { %v6928_v27 = vadd.f32 %v4815_v21, %v1994_v23 }
 0x66f   :  { %v1998_v29 = vpop.f32.mrb[72].mxu1 }
 0x670   :  { %v2216_v30 = vsub.f32 0.0, %v6928_v27  ;;  %v1999_v36 = vadd.f32 %v1998_v29, %v1893_v5  ;;  %v5455_v40 = vpop.f32.mrb[73].mxu1 }
 0x672   :  { %v2221_v6 = vmul.f32 1.442695, %v2216_v30  ;;  %v6931_v8 = vadd.f32 %v4815_v21, %v1999_v36 }
 0x673   :  { %v2003_v12 = vpop.f32.mrb[74].mxu1 }
 0x674   :  { %6040 = vpow2.f32 %v2221_v6  ;;  %v2217_v14 = vsub.f32 0.0, %v6931_v8  ;;  %v2004_v26 = vadd.f32 %v2003_v12, %v1898_v13  ;;  %v5458_v33 = vpop.f32.mrb[75].mxu1 }
 0x676   :  { %v2223_v45 = vmul.f32 1.442695, %v2217_v14  ;;  %v6934_v54 = vadd.f32 %v4815_v21, %v2004_v26 }
 0x677   :  { %v2008_v31 = vpop.f32.mrb[76].mxu1 }
 0x678   :  { %6042 = vpow2.f32 %v2223_v45  ;;  %v2218_v42 = vsub.f32 0.0, %v6934_v54  ;;  %v2009_v50 = vadd.f32 %v2008_v31, %v1903_v16  ;;  %v5461_v9 = vpop.f32.mrb[77].mxu1 }
 0x67a   :  { %v2225_v57 = vmul.f32 1.442695, %v2218_v42  ;;  %v6937_v38 = vadd.f32 %v4815_v21, %v2009_v50 }
 0x67b   :  { %v2013_v43 = vpop.f32.mrb[78].mxu1 }
 0x67c   :  { %6044 = vpow2.f32 %v2225_v57  ;;  %v2219_v48 = vsub.f32 0.0, %v6937_v38  ;;  %v2014_v52 = vadd.f32 %v2013_v43, %v1908_v18  ;;  %v5464_v7 = vpop.f32.mrb[79].mxu1 }
 0x67e   :  { %v6041_v34 = vpop.eup %6040  ;;  %v2227_v24 = vmul.f32 1.442695, %v2219_v48  ;;  %v6940_v37 = vadd.f32 %v4815_v21, %v2014_v52  ;;  %v4832_v21 = vld [vmem:[%s4701_s3] ss:$0 sm:$0xff]  ;;  %s6204_s3 = smov 41  }
 0x67f   :  { %v2231_v58 = vadd.f32 1.0, %v6041_v34 }
 0x680   :  { %6046 = vpow2.f32 %v2227_v24  ;;  %v2220_v39 = vsub.f32 0.0, %v6940_v37 }
 0x681   :  { %6048 = vrcp.f32 %v2231_v58 }
 0x682   :  { %v6043_v32 = vpop.eup %6042  ;;  %v2229_v49 = vmul.f32 1.442695, %v2220_v39 }
 0x683   :  { %v2232_v44 = vadd.f32 1.0, %v6043_v32 }
 0x684   :  { %6050 = vpow2.f32 %v2229_v49 }
 0x685   :  { %6052 = vrcp.f32 %v2232_v44 }
 0x686   :  { %v6045_v60 = vpop.eup %6044 }
 0x687   :  { %v2233_v62 = vadd.f32 1.0, %v6045_v60 }
 0x689   :  { %6054 = vrcp.f32 %v2233_v62 }
 0x68a   :  { %v6047_v63 = vpop.eup %6046 }
 0x68b   :  { %v6049_v2 = vpop.eup %6048  ;;  %v2234_v5 = vadd.f32 1.0, %v6047_v63 }
 0x68c   :  { %5517 = vmatmul.mubr.msk.f32.vlgmr.msra.gmra.mrb[80].mxu1 %vm262_vm1, %v6049_v2 }
 0x68d   :  { %6056 = vrcp.f32 %v2234_v5  ;;  %5519 = vmatprep.mubr.msk.f32.mxu1 %vm6162_vm0, %v6163_v1  ;;  %5532 = vmatpush3.msk.msra.mxu1 %vm1595_vm4, %v207_v20 }
 0x68e   :  { %v6051_v11 = vpop.eup %6050  ;;  %5614 = vmatprep.subr.mxu1 %v6163_v1 }
 0x68f   :  { %v6053_v13 = vpop.eup %6052  ;;  %v2235_v15 = vadd.f32 1.0, %v6051_v11 }
 0x690   :  { %5520 = vmatmul.mubr.msk.f32.gmra.mrb[82].mxu1 %vm262_vm1, %v6053_v13 }
 0x691   :  { %6058 = vrcp.f32 %v2235_v15  ;;  %5522 = vmatprep.mubr.msk.f32.mxu1 %vm6162_vm0, %v6163_v1 }
 0x693   :  { %v6055_v16 = vpop.eup %6054 }
 0x694   :  { %5523 = vmatmul.mubr.msk.f32.gmra.mrb[84].mxu1 %vm262_vm1, %v6055_v16 }
 0x695   :  { %5525 = vmatprep.mubr.msk.f32.mxu1 %vm6162_vm0, %v6163_v1 }
 0x697   :  { %v6057_v17 = vpop.eup %6056 }
 0x698   :  { %5526 = vmatmul.mubr.msk.f32.gmra.mrb[86].mxu1 %vm262_vm1, %v6057_v17 }
 0x699   :  { %5528 = vmatprep.mubr.msk.f32.mxu1 %vm6162_vm0, %v6163_v1 }
 0x69b   :  { %v6059_v18 = vpop.eup %6058 }
 0x69c   :  { %5529 = vmatmul.mubr.msk.f32.gmra.mrb[88].mxu1 %vm262_vm1, %v6059_v18 }
 0x69d   :  { %5533 = vmatprep.mubr.msk.f32.mxu1 %vm6162_vm0, %v6163_v1 }
 0x75f   :  { %v2328_v22 = vpop.f32.mrb[80].mxu1 }
 0x760   :  { %v2329_v23 = vadd.f32 %v4832_v21, %v2328_v22  ;;  %v5518_v25 = vpop.f32.mrb[81].mxu1 }
 0x762   :  { %v2352_v29 = vsub.f32 0.0, %v2329_v23 }
 0x763   :  { %v2333_v30 = vpop.f32.mrb[82].mxu1 }
 0x764   :  { %v2357_v36 = vmul.f32 1.442695, %v2352_v29  ;;  %v2334_v40 = vadd.f32 %v4832_v21, %v2333_v30  ;;  %v5521_v6 = vpop.f32.mrb[83].mxu1 }
 0x766   :  { %6060 = vpow2.f32 %v2357_v36  ;;  %v2353_v12 = vsub.f32 0.0, %v2334_v40 }
 0x767   :  { %v2338_v14 = vpop.f32.mrb[84].mxu1 }
 0x768   :  { %v2359_v26 = vmul.f32 1.442695, %v2353_v12  ;;  %v2339_v33 = vadd.f32 %v4832_v21, %v2338_v14  ;;  %v5524_v45 = vpop.f32.mrb[85].mxu1 }
 0x76a   :  { %6062 = vpow2.f32 %v2359_v26  ;;  %v2354_v31 = vsub.f32 0.0, %v2339_v33 }
 0x76b   :  { %v2343_v42 = vpop.f32.mrb[86].mxu1 }
 0x76c   :  { %v2361_v50 = vmul.f32 1.442695, %v2354_v31  ;;  %v2344_v9 = vadd.f32 %v4832_v21, %v2343_v42  ;;  %v5527_v57 = vpop.f32.mrb[87].mxu1 }
 0x76e   :  { %6064 = vpow2.f32 %v2361_v50  ;;  %v2355_v43 = vsub.f32 0.0, %v2344_v9 }
 0x76f   :  { %v2348_v48 = vpop.f32.mrb[88].mxu1 }
 0x770   :  { %v6061_v52 = vpop.eup %6060  ;;  %v2363_v7 = vmul.f32 1.442695, %v2355_v43  ;;  %v2349_v34 = vadd.f32 %v4832_v21, %v2348_v48  ;;  %v5530_v24 = vpop.f32.mrb[89].mxu1 }
 0x771   :  { %v2367_v58 = vadd.f32 1.0, %v6061_v52 }
 0x772   :  { %6066 = vpow2.f32 %v2363_v7  ;;  %v2356_v39 = vsub.f32 0.0, %v2349_v34 }
 0x773   :  { %6068 = vrcp.f32 %v2367_v58 }
 0x774   :  { %v6063_v32 = vpop.eup %6062  ;;  %v2365_v49 = vmul.f32 1.442695, %v2356_v39 }
 0x775   :  { %v2368_v44 = vadd.f32 1.0, %v6063_v32 }
 0x776   :  { %6070 = vpow2.f32 %v2365_v49 }
 0x777   :  { %6072 = vrcp.f32 %v2368_v44 }
 0x778   :  { %v6065_v60 = vpop.eup %6064 }
 0x779   :  { %v2369_v62 = vadd.f32 1.0, %v6065_v60 }
 0x77b   :  { %6074 = vrcp.f32 %v2369_v62 }
 0x77c   :  { %v6067_v63 = vpop.eup %6066 }
 0x77d   :  { %v6069_v2 = vpop.eup %6068  ;;  %v2370_v5 = vadd.f32 1.0, %v6067_v63 }
 0x77e   :  { %v2377_v11 = vmul.f32 %v6069_v2, %v6895_v35  ;;  %v2382_v13 = vmul.f32 %v6069_v2, %v6905_v10  ;;  %v2387_v15 = vmul.f32 %v6069_v2, %v6915_v41 }
 0x77f   :  { %6076 = vrcp.f32 %v2370_v5 }
 0x780   :  { %v6071_v16 = vpop.eup %6070  ;;  %5534 = vmatmul.mubr.msk.f32.vlgmr.msra.gmra.mrb[90].mxu1 %vm579_vm5, %v2377_v11 }
 0x781   :  { %v6073_v17 = vpop.eup %6072  ;;  %v2371_v18 = vadd.f32 1.0, %v6071_v16  ;;  %5536 = vmatprep.mubr.msk.f32.mxu1 %vm6162_vm0, %v6163_v1 }
 0x782   :  { %v2378_v20 = vmul.f32 %v6073_v17, %v6897_v3  ;;  %v2383_v21 = vmul.f32 %v6073_v17, %v6907_v55  ;;  %v2388_v22 = vmul.f32 %v6073_v17, %v6917_v4 }
 0x783   :  { %6078 = vrcp.f32 %v2371_v18 }
 0x784   :  { %5537 = vmatmul.mubr.msk.f32.gmra.mrb[92].mxu1 %vm579_vm5, %v2378_v20 }
 0x785   :  { %v6075_v35 = vpop.eup %6074  ;;  %5539 = vmatprep.mubr.msk.f32.mxu1 %vm6162_vm0, %v6163_v1 }
 0x786   :  { %v2379_v10 = vmul.f32 %v6075_v35, %v6899_v46  ;;  %v2384_v41 = vmul.f32 %v6075_v35, %v6909_v19  ;;  %v2389_v23 = vmul.f32 %v6075_v35, %v6919_v59 }
 0x788   :  { %5540 = vmatmul.mubr.msk.f32.gmra.mrb[94].mxu1 %vm579_vm5, %v2379_v10 }
 0x789   :  { %v6077_v3 = vpop.eup %6076  ;;  %5542 = vmatprep.mubr.msk.f32.mxu1 %vm6162_vm0, %v6163_v1 }
 0x78a   :  { %v2380_v55 = vmul.f32 %v6077_v3, %v6901_v51  ;;  %v2385_v4 = vmul.f32 %v6077_v3, %v6911_v56  ;;  %v2390_v25 = vmul.f32 %v6077_v3, %v6921_v47  ;;  %v212_v51 = vld [vmem:[%s4706_s8] sm:$0xf]  ;;  %s6198_s8 = smov 120  }
 0x78b   :  { %5615 = vmatpush3.msk.msra.mxu1 %vm1595_vm4, %v212_v51  ;;  %v209_v51 = vld [vmem:[%s4703_s16 + $0x8] sm:$0xff] }
 0x78c   :  { %5543 = vmatmul.mubr.msk.f32.gmra.mrb[96].mxu1 %vm579_vm5, %v2380_v55 }
 0x78d   :  { %v6079_v29 = vpop.eup %6078  ;;  %5545 = vmatprep.mubr.msk.f32.mxu1 %vm6162_vm0, %v6163_v1 }
 0x78e   :  { %v2381_v46 = vmul.f32 %v6079_v29, %v6903_v53  ;;  %v2386_v19 = vmul.f32 %v6079_v29, %v6913_v28  ;;  %v2391_v59 = vmul.f32 %v6079_v29, %v6923_v61  ;;  %v210_v53 = vld [vmem:[%s4704_s12] sm:$0xf]  ;;  %s6200_s12 = smov 30  }
 0x78f   :  { %5579 = vmatpush3.msk.msra.mxu0 %vm1595_vm4, %v210_v53 }
 0x790   :  { %5546 = vmatmul.mubr.msk.f32.gmra.mrb[98].mxu1 %vm579_vm5, %v2381_v46  ;;  %5835 = vmatprep.subr.bf16.mxu0 %v6160_v0 }
 0x791   :  { %5548 = vmatprep.mubr.msk.f32.mxu1 %vm6162_vm0, %v6163_v1 }
 0x794   :  { %5549 = vmatmul.mubr.msk.f32.gmra.mrb[100].mxu1 %vm579_vm5, %v2382_v13 }
 0x795   :  { %5551 = vmatprep.mubr.msk.f32.mxu1 %vm6162_vm0, %v6163_v1 }
 0x798   :  { %5552 = vmatmul.mubr.msk.f32.gmra.mrb[102].mxu1 %vm579_vm5, %v2383_v21 }
 0x799   :  { %5554 = vmatprep.mubr.msk.f32.mxu1 %vm6162_vm0, %v6163_v1 }
 0x79c   :  { %5555 = vmatmul.mubr.msk.f32.gmra.mrb[104].mxu1 %vm579_vm5, %v2384_v41 }
 0x79d   :  { %5557 = vmatprep.mubr.msk.f32.mxu1 %vm6162_vm0, %v6163_v1 }
 0x7a0   :  { %5558 = vmatmul.mubr.msk.f32.gmra.mrb[106].mxu1 %vm579_vm5, %v2385_v4 }
 0x7a1   :  { %5560 = vmatprep.mubr.msk.f32.mxu1 %vm6162_vm0, %v6163_v1 }
 0x7a4   :  { %5561 = vmatmul.mubr.msk.f32.gmra.mrb[108].mxu1 %vm579_vm5, %v2386_v19 }
 0x7a5   :  { %5563 = vmatprep.mubr.msk.f32.mxu1 %vm6162_vm0, %v6163_v1 }
 0x7a8   :  { %5564 = vmatmul.mubr.msk.f32.gmra.mrb[110].mxu1 %vm579_vm5, %v2387_v15 }
 0x7a9   :  { %5566 = vmatprep.mubr.msk.f32.mxu1 %vm6162_vm0, %v6163_v1 }
 0x7ac   :  { %5567 = vmatmul.mubr.msk.f32.gmra.mrb[112].mxu1 %vm579_vm5, %v2388_v22 }
 0x7ad   :  { %5569 = vmatprep.mubr.msk.f32.mxu1 %vm6162_vm0, %v6163_v1 }
 0x7b0   :  { %5570 = vmatmul.mubr.msk.f32.gmra.mrb[114].mxu1 %vm579_vm5, %v2389_v23 }
 0x7b1   :  { %5572 = vmatprep.mubr.msk.f32.mxu1 %vm6162_vm0, %v6163_v1 }
 0x7b4   :  { %5573 = vmatmul.mubr.msk.f32.gmra.mrb[116].mxu1 %vm579_vm5, %v2390_v25 }
 0x7b5   :  { %5575 = vmatprep.mubr.msk.f32.mxu1 %vm6162_vm0, %v6163_v1 }
 0x7b8   :  { %5576 = vmatmul.mubr.msk.f32.gmra.mrb[118].mxu1 %vm579_vm5, %v2391_v59  ;;  %v208_v59 = vld [vmem:[%s4703_s16] sm:$0xff]  ;;  %s4713_s16 = sld [smem:[%s7480_s0 + %s6200_s12]]  }
 0x7b9   :  { %5616 = vmatprep.mubr.msk.f32.mxu1 %vm6162_vm0, %v6163_v1  ;;  %s4714_s12 = sld [smem:[%s7480_s0 + %s6205_s9]]  }
 0x853   :  { %v2511_v56 = vpop.f32.mrb[90].mxu1 }
 0x854   :  { %v5535_v28 = vpop.f32.mrb[91].mxu1  ;;  %5617 = vmatmul.mubr.msk.f32.vlgmr.msra.gmra.mrb[120].mxu1 %vm579_vm5, %v2511_v56  ;;  %v2585_v33 = vmul.f32 %v2511_v56, %v2511_v56 }
 0x855   :  { %5619 = vmatprep.mubr.msk.f32.mxu1 %vm6162_vm0, %v6163_v1 }
 0x857   :  { %v2516_v47 = vpop.f32.mrb[92].mxu1 }
 0x858   :  { %v5538_v61 = vpop.f32.mrb[93].mxu1  ;;  %5620 = vmatmul.mubr.msk.f32.gmra.mrb[122].mxu1 %vm579_vm5, %v2516_v47  ;;  %v2586_v9 = vmul.f32 %v2516_v47, %v2516_v47 }
 0x859   :  { %5622 = vmatprep.mubr.msk.f32.mxu1 %vm6162_vm0, %v6163_v1 }
 0x85b   :  { %v2521_v30 = vpop.f32.mrb[94].mxu1 }
 0x85c   :  { %v5541_v36 = vpop.f32.mrb[95].mxu1  ;;  %5623 = vmatmul.mubr.msk.f32.gmra.mrb[124].mxu1 %vm579_vm5, %v2521_v30  ;;  %v2587_v7 = vmul.f32 %v2521_v30, %v2521_v30 }
 0x85d   :  { %5625 = vmatprep.mubr.msk.f32.mxu1 %vm6162_vm0, %v6163_v1  ;;  %v5836_v36 = vpack.c.bf16 %v209_v51, %v208_v59 }
 0x85f   :  { %v2526_v40 = vpop.f32.mrb[96].mxu1 }
 0x860   :  { %v5544_v6 = vpop.f32.mrb[97].mxu1  ;;  %5626 = vmatmul.mubr.msk.f32.gmra.mrb[126].mxu1 %vm579_vm5, %v2526_v40  ;;  %v2588_v32 = vmul.f32 %v2526_v40, %v2526_v40 }
 0x861   :  { %5628 = vmatprep.mubr.msk.f32.mxu1 %vm6162_vm0, %v6163_v1 }
 0x863   :  { %v2531_v12 = vpop.f32.mrb[98].mxu1 }
 0x864   :  { %v5547_v14 = vpop.f32.mrb[99].mxu1  ;;  %5629 = vmatmul.mubr.msk.f32.gmra.mrb[128].mxu1 %vm579_vm5, %v2531_v12  ;;  %v2589_v63 = vmul.f32 %v2531_v12, %v2531_v12 }
 0x865   :  { %5631 = vmatprep.mubr.msk.f32.mxu1 %vm6162_vm0, %v6163_v1 }
 0x867   :  { %v2536_v26 = vpop.f32.mrb[100].mxu1 }
 0x868   :  { %v2590_v45 = vmul.f32 %v2536_v26, %v2536_v26  ;;  %v5550_v31 = vpop.f32.mrb[101].mxu1  ;;  %5632 = vmatmul.mubr.msk.f32.gmra.mrb[130].mxu1 %vm579_vm5, %v2536_v26 }
 0x869   :  { %5634 = vmatprep.mubr.msk.f32.mxu1 %vm6162_vm0, %v6163_v1 }
 0x86a   :  { %v2595_v42 = vadd.f32 %v2590_v45, %v2585_v33 }
 0x86b   :  { %v2541_v50 = vpop.f32.mrb[102].mxu1 }
 0x86c   :  { %v2591_v57 = vmul.f32 %v2541_v50, %v2541_v50  ;;  %v5553_v43 = vpop.f32.mrb[103].mxu1  ;;  %5635 = vmatmul.mubr.msk.f32.gmra.mrb[132].mxu1 %vm579_vm5, %v2541_v50 }
 0x86d   :  { %5637 = vmatprep.mubr.msk.f32.mxu1 %vm6162_vm0, %v6163_v1 }
 0x86e   :  { %v2596_v48 = vadd.f32 %v2591_v57, %v2586_v9 }
 0x86f   :  { %v2546_v52 = vpop.f32.mrb[104].mxu1 }
 0x870   :  { %v2592_v34 = vmul.f32 %v2546_v52, %v2546_v52  ;;  %v5556_v24 = vpop.f32.mrb[105].mxu1  ;;  %5638 = vmatmul.mubr.msk.f32.gmra.mrb[134].mxu1 %vm579_vm5, %v2546_v52 }
 0x871   :  { %5640 = vmatprep.mubr.msk.f32.mxu1 %vm6162_vm0, %v6163_v1 }
 0x872   :  { %v2597_v58 = vadd.f32 %v2592_v34, %v2587_v7 }
 0x873   :  { %v2551_v39 = vpop.f32.mrb[106].mxu1 }
 0x874   :  { %v2593_v49 = vmul.f32 %v2551_v39, %v2551_v39  ;;  %v5559_v44 = vpop.f32.mrb[107].mxu1  ;;  %5641 = vmatmul.mubr.msk.f32.gmra.mrb[136].mxu1 %vm579_vm5, %v2551_v39 }
 0x875   :  { %5643 = vmatprep.mubr.msk.f32.mxu1 %vm6162_vm0, %v6163_v1 }
 0x876   :  { %v2598_v60 = vadd.f32 %v2593_v49, %v2588_v32 }
 0x877   :  { %v2556_v62 = vpop.f32.mrb[108].mxu1 }
 0x878   :  { %v2594_v2 = vmul.f32 %v2556_v62, %v2556_v62  ;;  %v5562_v5 = vpop.f32.mrb[109].mxu1  ;;  %5644 = vmatmul.mubr.msk.f32.gmra.mrb[138].mxu1 %vm579_vm5, %v2556_v62  ;;  %v2392_v62 = vmax.f32 %v6928_v27, 0.0  ;;  %v2395_v27 = vmax.f32 %v6937_v38, 0.0  ;;  %v214_v38 = vld [vmem:[%s4707_s20 + $0x8] sm:$0xff] }
 0x879   :  { %5646 = vmatprep.mubr.msk.f32.mxu1 %vm6162_vm0, %v6163_v1 }
 0x87a   :  { %v2599_v11 = vadd.f32 %v2594_v2, %v2589_v63  ;;  %v2393_v63 = vmax.f32 %v6931_v8, 0.0  ;;  %v2394_v2 = vmax.f32 %v6934_v54, 0.0  ;;  %v2396_v8 = vmax.f32 %v6940_v37, 0.0  ;;  %v213_v54 = vld [vmem:[%s4707_s20] sm:$0xff] }
 0x87b   :  { %v2561_v13 = vpop.f32.mrb[110].mxu1  ;;  %v5839_v5 = vpack.c.bf16 %v214_v38, %v213_v54  ;;  %v4882_v38 = vld [vmem:[%s4708_s1] ss:$0 sm:$0xff] }
 0x87c   :  { %v2600_v15 = vmul.f32 %v2561_v13, %v2561_v13  ;;  %v5565_v16 = vpop.f32.mrb[111].mxu1  ;;  %5647 = vmatmul.mubr.msk.f32.gmra.mrb[140].mxu1 %vm579_vm5, %v2561_v13 }
 0x87d   :  { %5649 = vmatprep.mubr.msk.f32.mxu1 %vm6162_vm0, %v6163_v1 }
 0x87e   :  { %v2605_v17 = vadd.f32 %v2600_v15, %v2595_v42 }
 0x87f   :  { %v2566_v18 = vpop.f32.mrb[112].mxu1 }
 0x880   :  { %v2610_v20 = vmax.f32 %v2605_v17, 1e-08  ;;  %v2601_v21 = vmul.f32 %v2566_v18, %v2566_v18  ;;  %v5568_v22 = vpop.f32.mrb[113].mxu1  ;;  %5650 = vmatmul.mubr.msk.f32.gmra.mrb[142].mxu1 %vm579_vm5, %v2566_v18 }
 0x881   :  { %5652 = vmatprep.mubr.msk.f32.mxu1 %vm6162_vm0, %v6163_v1 }
 0x882   :  { %6080 = vrsqrt.f32 %v2610_v20  ;;  %v2606_v35 = vadd.f32 %v2601_v21, %v2596_v48  ;;  %vm2617_vm6 = vcmp.eq.f32.partialorder %v2610_v20, inf  ;;  %v2620_v6 = vand.u32 2147483648, %v2610_v20 }
 0x883   :  { %v2571_v10 = vpop.f32.mrb[114].mxu1  ;;  %vm2619_vm8 = vcmp.eq.f32.partialorder %v2610_v20, 0.0 }
 0x884   :  { %v2611_v41 = vmax.f32 %v2606_v35, 1e-08  ;;  %v2602_v23 = vmul.f32 %v2571_v10, %v2571_v10  ;;  %v5571_v3 = vpop.f32.mrb[115].mxu1  ;;  %5653 = vmatmul.mubr.msk.f32.gmra.mrb[144].mxu1 %vm579_vm5, %v2571_v10 }
 0x885   :  { %5655 = vmatprep.mubr.msk.f32.mxu1 %vm6162_vm0, %v6163_v1 }
 0x886   :  { %v2607_v55 = vadd.f32 %v2602_v23, %v2597_v58  ;;  %6082 = vrsqrt.f32 %v2611_v41  ;;  %vm2624_vm7 = vcmp.eq.f32.partialorder %v2611_v41, inf  ;;  %v2627_v31 = vand.u32 2147483648, %v2611_v41 }
 0x887   :  { %v2576_v4 = vpop.f32.mrb[116].mxu1  ;;  %vm2626_vm9 = vcmp.eq.f32.partialorder %v2611_v41, 0.0 }
 0x888   :  { %v2612_v25 = vmax.f32 %v2607_v55, 1e-08  ;;  %v2603_v29 = vmul.f32 %v2576_v4, %v2576_v4  ;;  %v5574_v46 = vpop.f32.mrb[117].mxu1  ;;  %5656 = vmatmul.mubr.msk.f32.gmra.mrb[146].mxu1 %vm579_vm5, %v2576_v4 }
 0x889   :  { %5658 = vmatprep.mubr.msk.f32.mxu1 %vm6162_vm0, %v6163_v1 }
 0x88a   :  { %v2608_v19 = vadd.f32 %v2603_v29, %v2598_v60  ;;  %6084 = vrsqrt.f32 %v2612_v25  ;;  %vm2631_vm10 = vcmp.eq.f32.partialorder %v2612_v25, inf  ;;  %v2634_v43 = vand.u32 2147483648, %v2612_v25 }
 0x88b   :  { %v2581_v53 = vpop.f32.mrb[118].mxu1  ;;  %vm2633_vm11 = vcmp.eq.f32.partialorder %v2612_v25, 0.0 }
 0x88c   :  { %v6081_v56 = vpop.eup %6080  ;;  %v2613_v28 = vmax.f32 %v2608_v19, 1e-08  ;;  %v2604_v47 = vmul.f32 %v2581_v53, %v2581_v53  ;;  %v5577_v61 = vpop.f32.mrb[119].mxu1  ;;  %5659 = vmatmul.mubr.msk.f32.gmra.mrb[148].mxu1 %vm579_vm5, %v2581_v53 }
 0x88d   :  { %v2616_v30 = vmul.f32 %v6081_v56, %v2610_v20 }
 0x88e   :  { %v2609_v40 = vadd.f32 %v2604_v47, %v2599_v11  ;;  %6086 = vrsqrt.f32 %v2613_v28  ;;  %vm2638_vm12 = vcmp.eq.f32.partialorder %v2613_v28, inf  ;;  %vm2640_vm13 = vcmp.eq.f32.partialorder %v2613_v28, 0.0 }
 0x88f   :  { %v2618_v12 = vsel %vm2617_vm6, %v2610_v20, %v2616_v30 }
 0x890   :  { %v6083_v14 = vpop.eup %6082  ;;  %v2614_v26 = vmax.f32 %v2609_v40, 1e-08  ;;  %v2621_v33 = vsel %vm2619_vm8, %v2620_v6, %v2618_v12 }
 0x891   :  { %5581 = vmatmul.mubr.msk.f32.vlgmr.msra.gmra.mrb[110].mxu0 %vm579_vm5, %v2621_v33  ;;  %v2623_v45 = vmul.f32 %v6083_v14, %v2611_v41 }
 0x892   :  { %5583 = vmatprep.mubr.msk.f32.mxu0 %vm6162_vm0, %v6163_v1  ;;  %5837 = vmatpush3.bf16.msra.mxu0 %v5836_v36  ;;  %6088 = vrsqrt.f32 %v2614_v26  ;;  %vm2645_vm14 = vcmp.eq.f32.partialorder %v2614_v26, inf  ;;  %v2648_v49 = vand.u32 2147483648, %v2614_v26  ;;  %vm2647_vm15 = vcmp.eq.f32.partialorder %v2614_v26, 0.0 }
 0x893   :  { %v2625_v42 = vsel %vm2624_vm7, %v2611_v41, %v2623_v45  ;;  %5838 = vmatprep.subr.bf16.mxu0 %v6160_v0  ;;  %v2641_v0 = vand.u32 2147483648, %v2613_v28 }
 0x894   :  { %v6085_v50 = vpop.eup %6084  ;;  %v2628_v9 = vsel %vm2626_vm9, %v2627_v31, %v2625_v42 }
 0x895   :  { %5584 = vmatmul.mubr.msk.f32.gmra.mrb[112].mxu0 %vm579_vm5, %v2628_v9  ;;  %v2630_v57 = vmul.f32 %v6085_v50, %v2612_v25  ;;  %v4865_v9 = vld [vmem:[%s4705_s24] ss:$0 sm:$0xff] }
 0x896   :  { %5586 = vmatprep.mubr.msk.f32.mxu0 %vm6162_vm0, %v6163_v1 }
 0x897   :  { %v2632_v48 = vsel %vm2631_vm10, %v2612_v25, %v2630_v57  ;;  %vm3920_vm10 = vcmask 523264  }
 0x898   :  { %v6087_v52 = vpop.eup %6086  ;;  %v2635_v7 = vsel %vm2633_vm11, %v2634_v43, %v2632_v48 }
 0x899   :  { %5587 = vmatmul.mubr.msk.f32.gmra.mrb[114].mxu0 %vm579_vm5, %v2635_v7  ;;  %v2637_v34 = vmul.f32 %v6087_v52, %v2613_v28 }
 0x89a   :  { %5589 = vmatprep.mubr.msk.f32.mxu0 %vm6162_vm0, %v6163_v1 }
 0x89b   :  { %v2639_v24 = vsel %vm2638_vm12, %v2613_v28, %v2637_v34 }
 0x89c   :  { %v6089_v58 = vpop.eup %6088  ;;  %v2642_v39 = vsel %vm2640_vm13, %v2641_v0, %v2639_v24 }
 0x89d   :  { %5590 = vmatmul.mubr.msk.f32.gmra.mrb[116].mxu0 %vm579_vm5, %v2642_v39  ;;  %v2644_v32 = vmul.f32 %v6089_v58, %v2614_v26 }
 0x89e   :  { %5592 = vmatprep.mubr.msk.f32.mxu0 %vm6162_vm0, %v6163_v1 }
 0x89f   :  { %v2646_v44 = vsel %vm2645_vm14, %v2614_v26, %v2644_v32 }
 0x8a0   :  { %v2649_v60 = vsel %vm2647_vm15, %v2648_v49, %v2646_v44 }
 0x8a1   :  { %5593 = vmatmul.mubr.msk.f32.gmra.mrb[118].mxu0 %vm579_vm5, %v2649_v60 }
 0x8a2   :  { %5599 = vmatprep.mubr.msk.f32.mxu0 %vm6162_vm0, %v6163_v1 }
 0x8a5   :  { %5600 = vmatmul.mubr.msk.f32.vlgmr.msra.gmra.mrb[120].mxu0 %vm262_vm1, %v2392_v62 }
 0x8a6   :  { %5602 = vmatprep.mubr.msk.f32.mxu0 %vm6162_vm0, %v6163_v1  ;;  %5840 = vmatpush3.bf16.msra.mxu0 %v5839_v5 }
 0x8a9   :  { %5603 = vmatmul.mubr.msk.f32.gmra.mrb[122].mxu0 %vm262_vm1, %v2393_v63 }
 0x8aa   :  { %5605 = vmatprep.mubr.msk.f32.mxu0 %vm6162_vm0, %v6163_v1 }
 0x8ad   :  { %5606 = vmatmul.mubr.msk.f32.gmra.mrb[124].mxu0 %vm262_vm1, %v2394_v2 }
 0x8ae   :  { %5608 = vmatprep.mubr.msk.f32.mxu0 %vm6162_vm0, %v6163_v1 }
 0x8b1   :  { %5609 = vmatmul.mubr.msk.f32.gmra.mrb[126].mxu0 %vm262_vm1, %v2395_v27 }
 0x8b2   :  { %5611 = vmatprep.mubr.msk.f32.mxu0 %vm6162_vm0, %v6163_v1 }
 0x8b5   :  { %5612 = vmatmul.mubr.msk.f32.gmra.mrb[128].mxu0 %vm262_vm1, %v2396_v8 }
 0x8b6   :  { %5665 = vmatprep.mubr.msk.f32.mxu0 %vm6162_vm0, %v6163_v1 }
 0x927   :  { %v7122_v11 = vpop.f32.mrb[120].mxu1 }
 0x928   :  { %v5618_v13 = vpop.f32.mrb[121].mxu1 }
 0x92b   :  { %v7124_v15 = vpop.f32.mrb[122].mxu1 }
 0x92c   :  { %v5621_v37 = vpop.f32.mrb[123].mxu1 }
 0x92f   :  { %v7126_v16 = vpop.f32.mrb[124].mxu1 }
 0x930   :  { %v5624_v17 = vpop.f32.mrb[125].mxu1 }
 0x933   :  { %v7128_v18 = vpop.f32.mrb[126].mxu1 }
 0x934   :  { %v5627_v20 = vpop.f32.mrb[127].mxu1 }
 0x937   :  { %v7130_v21 = vpop.f32.mrb[128].mxu1 }
 0x938   :  { %v5630_v22 = vpop.f32.mrb[129].mxu1 }
 0x93b   :  { %v7132_v35 = vpop.f32.mrb[130].mxu1 }
 0x93c   :  { %v5633_v10 = vpop.f32.mrb[131].mxu1 }
 0x93f   :  { %v7134_v41 = vpop.f32.mrb[132].mxu1 }
 0x940   :  { %v5636_v23 = vpop.f32.mrb[133].mxu1 }
 0x943   :  { %v7136_v3 = vpop.f32.mrb[134].mxu1 }
 0x944   :  { %v5639_v55 = vpop.f32.mrb[135].mxu1 }
 0x947   :  { %v7138_v4 = vpop.f32.mrb[136].mxu1 }
 0x948   :  { %v5642_v25 = vpop.f32.mrb[137].mxu1 }
 0x94b   :  { %v7140_v29 = vpop.f32.mrb[138].mxu1 }
 0x94c   :  { %v5645_v46 = vpop.f32.mrb[139].mxu1 }
 0x94f   :  { %v7142_v19 = vpop.f32.mrb[140].mxu1 }
 0x950   :  { %v5648_v59 = vpop.f32.mrb[141].mxu1 }
 0x953   :  { %v7144_v51 = vpop.f32.mrb[142].mxu1 }
 0x954   :  { %v5651_v53 = vpop.f32.mrb[143].mxu1 }
 0x957   :  { %v7146_v56 = vpop.f32.mrb[144].mxu1 }
 0x958   :  { %v5654_v28 = vpop.f32.mrb[145].mxu1 }
 0x95b   :  { %v7148_v47 = vpop.f32.mrb[146].mxu1 }
 0x95c   :  { %v5657_v61 = vpop.f32.mrb[147].mxu1 }
 0x95f   :  { %v7150_v30 = vpop.f32.mrb[148].mxu1 }
 0x960   :  { %v5660_v36 = vpop.f32.mrb[149].mxu1 }
 0x964   :  { %v2734_v40 = vpop.f32.mrb[110].mxu0 }
 0x965   :  { %v5582_v6 = vpop.f32.mrb[111].mxu0 }
 0x968   :  { %v2739_v12 = vpop.f32.mrb[112].mxu0 }
 0x969   :  { %v5585_v14 = vpop.f32.mrb[113].mxu0 }
 0x96c   :  { %v2744_v26 = vpop.f32.mrb[114].mxu0 }
 0x96d   :  { %v5588_v33 = vpop.f32.mrb[115].mxu0 }
 0x970   :  { %v2749_v45 = vpop.f32.mrb[116].mxu0 }
 0x971   :  { %v5591_v31 = vpop.f32.mrb[117].mxu0 }
 0x974   :  { %v2754_v42 = vpop.f32.mrb[118].mxu0 }
 0x975   :  { %v5594_v50 = vpop.f32.mrb[119].mxu0 }
 0x978   :  { %v2839_v57 = vpop.f32.mrb[120].mxu0 }
 0x979   :  { %v2840_v43 = vadd.f32 %v2839_v57, %v2734_v40  ;;  %v5601_v48 = vpop.f32.mrb[121].mxu0 }
 0x97b   :  { %v7155_v52 = vadd.f32 %v4865_v9, %v2840_v43 }
 0x97c   :  { %v2844_v7 = vpop.f32.mrb[122].mxu0 }
 0x97d   :  { %v2845_v34 = vadd.f32 %v2844_v7, %v2739_v12  ;;  %v5604_v0 = vpop.f32.mrb[123].mxu0  ;;  %5666 = vmatmul.mubr.msk.f32.vlgmr.msra.gmra.mrb[130].mxu0 %vm262_vm1, %v7155_v52 }
 0x97e   :  { %5668 = vmatprep.mubr.msk.f32.mxu0 %vm6162_vm0, %v6163_v1 }
 0x97f   :  { %v7161_v24 = vadd.f32 %v4865_v9, %v2845_v34 }
 0x980   :  { %v2849_v58 = vpop.f32.mrb[124].mxu0 }
 0x981   :  { %v2850_v39 = vadd.f32 %v2849_v58, %v2744_v26  ;;  %v5607_v32 = vpop.f32.mrb[125].mxu0  ;;  %5669 = vmatmul.mubr.msk.f32.gmra.mrb[132].mxu0 %vm262_vm1, %v7161_v24 }
 0x982   :  { %5671 = vmatprep.mubr.msk.f32.mxu0 %vm6162_vm0, %v6163_v1 }
 0x983   :  { %v7167_v49 = vadd.f32 %v4865_v9, %v2850_v39 }
 0x984   :  { %v2854_v44 = vpop.f32.mrb[126].mxu0 }
 0x985   :  { %v2855_v60 = vadd.f32 %v2854_v44, %v2749_v45  ;;  %v5610_v62 = vpop.f32.mrb[127].mxu0  ;;  %5672 = vmatmul.mubr.msk.f32.gmra.mrb[134].mxu0 %vm262_vm1, %v7167_v49 }
 0x986   :  { %5674 = vmatprep.mubr.msk.f32.mxu0 %vm6162_vm0, %v6163_v1 }
 0x987   :  { %v7173_v63 = vadd.f32 %v4865_v9, %v2855_v60 }
 0x988   :  { %v2859_v2 = vpop.f32.mrb[128].mxu0 }
 0x989   :  { %v2860_v27 = vadd.f32 %v2859_v2, %v2754_v42  ;;  %v5613_v8 = vpop.f32.mrb[129].mxu0  ;;  %5675 = vmatmul.mubr.msk.f32.gmra.mrb[136].mxu0 %vm262_vm1, %v7173_v63 }
 0x98a   :  { %5677 = vmatprep.mubr.msk.f32.mxu0 %vm6162_vm0, %v6163_v1  ;;  %vm3292_vm0 = vcmask 326656  }
 0x98b   :  { %v7179_v54 = vadd.f32 %v4865_v9, %v2860_v27 }
 0x98d   :  { %5678 = vmatmul.mubr.msk.f32.gmra.mrb[138].mxu0 %vm262_vm1, %v7179_v54 }
 0xa50   :  { %v3149_v5 = vpop.f32.mrb[130].mxu0 }
 0xa51   :  { %v3150_v13 = vadd.f32 %v4882_v38, %v3149_v5  ;;  %v5667_v37 = vpop.f32.mrb[131].mxu0 }
 0xa53   :  { %v3173_v17 = vsub.f32 0.0, %v3150_v13 }
 0xa54   :  { %v3154_v20 = vpop.f32.mrb[132].mxu0 }
 0xa55   :  { %v3178_v22 = vmul.f32 1.442695, %v3173_v17  ;;  %v3155_v10 = vadd.f32 %v4882_v38, %v3154_v20  ;;  %v5670_v23 = vpop.f32.mrb[133].mxu0 }
 0xa57   :  { %6090 = vpow2.f32 %v3178_v22  ;;  %v3174_v1 = vsub.f32 0.0, %v3155_v10 }
 0xa58   :  { %v3159_v55 = vpop.f32.mrb[134].mxu0 }
 0xa59   :  { %v3180_v25 = vmul.f32 1.442695, %v3174_v1  ;;  %v3160_v46 = vadd.f32 %v4882_v38, %v3159_v55  ;;  %v5673_v59 = vpop.f32.mrb[135].mxu0  ;;  %v3213_v1 = vld [vmem:[%s7200_s6] sm:$0xff] }
 0xa5a   :  { %5690 = vmatprep.mubr.msk.f32.mxu0 %vm3292_vm0, %v3213_v1 }
 0xa5b   :  { %6092 = vpow2.f32 %v3180_v25  ;;  %v3175_v53 = vsub.f32 0.0, %v3160_v46 }
 0xa5c   :  { %v3164_v28 = vpop.f32.mrb[136].mxu0 }
 0xa5d   :  { %v3182_v61 = vmul.f32 1.442695, %v3175_v53  ;;  %v3165_v36 = vadd.f32 %v4882_v38, %v3164_v28  ;;  %v5676_v40 = vpop.f32.mrb[137].mxu0 }
 0xa5f   :  { %6094 = vpow2.f32 %v3182_v61  ;;  %v3176_v6 = vsub.f32 0.0, %v3165_v36 }
 0xa60   :  { %v3169_v12 = vpop.f32.mrb[138].mxu0 }
 0xa61   :  { %v6091_v14 = vpop.eup %6090  ;;  %v3184_v26 = vmul.f32 1.442695, %v3176_v6  ;;  %v3170_v33 = vadd.f32 %v4882_v38, %v3169_v12  ;;  %v5679_v45 = vpop.f32.mrb[139].mxu0 }
 0xa62   :  { %v3188_v31 = vadd.f32 1.0, %v6091_v14 }
 0xa63   :  { %6096 = vpow2.f32 %v3184_v26  ;;  %v3177_v42 = vsub.f32 0.0, %v3170_v33 }
 0xa64   :  { %6098 = vrcp.f32 %v3188_v31 }
 0xa65   :  { %v6093_v50 = vpop.eup %6092  ;;  %v3186_v9 = vmul.f32 1.442695, %v3177_v42 }
 0xa66   :  { %v3189_v57 = vadd.f32 1.0, %v6093_v50 }
 0xa67   :  { %6100 = vpow2.f32 %v3186_v9 }
 0xa68   :  { %6102 = vrcp.f32 %v3189_v57 }
 0xa69   :  { %v6095_v43 = vpop.eup %6094 }
 0xa6a   :  { %v3190_v48 = vadd.f32 1.0, %v6095_v43 }
 0xa6c   :  { %6104 = vrcp.f32 %v3190_v48 }
 0xa6d   :  { %v6097_v7 = vpop.eup %6096 }
 0xa6e   :  { %v6099_v34 = vpop.eup %6098  ;;  %v3191_v0 = vadd.f32 1.0, %v6097_v7 }
 0xa6f   :  { %v3203_v58 = vmul.f32 %v6099_v34, %v7132_v35  ;;  %v3198_v39 = vmul.f32 %v6099_v34, %v7122_v11  ;;  %v3208_v32 = vmul.f32 %v6099_v34, %v7142_v19 }
 0xa70   :  { %6106 = vrcp.f32 %v3191_v0 }
 0xa71   :  { %v6101_v44 = vpop.eup %6100 }
 0xa72   :  { %v6103_v60 = vpop.eup %6102  ;;  %v3192_v62 = vadd.f32 1.0, %v6101_v44  ;;  %v3214_v44 = vld [vmem:[%s7200_s6 + $0x8] sm:$0xff] }
 0xa73   :  { %v3204_v2 = vmul.f32 %v6103_v60, %v7134_v41  ;;  %v3199_v27 = vmul.f32 %v6103_v60, %v7124_v15  ;;  %v3209_v8 = vmul.f32 %v6103_v60, %v7144_v51 }
 0xa74   :  { %6108 = vrcp.f32 %v3192_v62  ;;  %v6158_v62 = vld [vmem:[%s6227_s5 + $0x8] sm:$0xff] }
 0xa75   :  { %v5955_v38 = vpack.i.bf16 %v3204_v2, %v3203_v58  ;;  %v5950_v5 = vpack.i.bf16 %v3199_v27, %v3198_v39  ;;  %v5960_v13 = vpack.i.bf16 %v3209_v8, %v3208_v32  ;;  %v6159_v27 = vld [vmem:[%s6227_s5] sm:$0xff]  ;;  %s6199_s5 = smov 26  }
 0xa76   :  { %v6105_v37 = vpop.eup %6104  ;;  %s4709_s11 = sld [smem:[%s7480_s0 + %s6199_s5]]  }
 0xa77   :  { %5956 = vrot.lane.b32.xlu0 %v5955_v38, %s6192_s13  ;;  %5951 = vrot.lane.b32.xlu1 %v5950_v5, %s6176_s30  ;;  %v3205_v11 = vmul.f32 %v6105_v37, %v7136_v3  ;;  %v3200_v35 = vmul.f32 %v6105_v37, %v7126_v16  ;;  %v3210_v19 = vmul.f32 %v6105_v37, %v7146_v56  ;;  %s4724_s5 = sld [smem:[%s7480_s0 + %s6204_s3]]  }
 0xa78   :  { %s4727_s3 = sld [smem:[%s7480_s0 + %s6216_s28]]  }
 0xa7a   :  { %v6107_v41 = vpop.eup %6106 }
 0xa7b   :  { %5961 = vrot.lane.b32.xlu1 %v5960_v13, %s6193_s17  ;;  %v3206_v15 = vmul.f32 %v6107_v41, %v7138_v4  ;;  %v3201_v51 = vmul.f32 %v6107_v41, %v7128_v18  ;;  %v3211_v3 = vmul.f32 %v6107_v41, %v7148_v47 }
 0xa7d   :  { %v5970_v17 = vpack.i.bf16 %v3206_v15, %v3205_v11  ;;  %v5965_v16 = vpack.i.bf16 %v3201_v51, %v3200_v35  ;;  %v5975_v20 = vpack.i.bf16 %v3211_v3, %v3210_v19 }
 0xa7e   :  { %v6109_v56 = vpop.eup %6108 }
 0xa7f   :  { %5971 = vrot.lane.b32.xlu1 %v5970_v17, %s6192_s13  ;;  %5966 = vrot.lane.b32.xlu0 %v5965_v16, %s6176_s30  ;;  %v3202_v22 = vmul.f32 %v6109_v56, %v7130_v21  ;;  %v3207_v10 = vmul.f32 %v6109_v56, %v7140_v29  ;;  %v3212_v23 = vmul.f32 %v6109_v56, %v7150_v30 }
 0xa83   :  { %5976 = vrot.lane.b32.xlu0 %v5975_v20, %s6193_s17  ;;  %3228 = vrot.lane.b32.xlu1 %v3202_v22, %s6176_s30 }
 0xa87   :  { %3248 = vrot.lane.b32.xlu0 %v3207_v10, %s6192_s13  ;;  %3268 = vrot.lane.b32.xlu1 %v3212_v23, %s6193_s17 }
 0xae9   :  { %v5957_v18 = vpop.permute.xlu0 %5956  ;;  %v5952_v4 = vpop.permute.xlu1 %5951 }
 0xaea   :  { %v5954_v47 = vunpack.i.h.bf16 %v5952_v4  ;;  %v5953_v21 = vunpack.i.l.bf16 %v5952_v4  ;;  %v5959_v55 = vunpack.i.h.bf16 %v5957_v18  ;;  %v5958_v29 = vunpack.i.l.bf16 %v5957_v18  ;;  %v216_v4 = vld [vmem:[%s4709_s11] sm:$0xf] }
 0xaec   :  { %v3276_v30 = vsel %vm262_vm1, %v7161_v24, %v5954_v47  ;;  %v3275_v25 = vsel %vm262_vm1, %v7155_v52, %v5953_v21 }
 0xaed   :  { %v5962_v46 = vpop.permute.xlu1 %5961  ;;  %v3281_v28 = vsel %vm3280_vm2, %v3275_v25, %v5958_v29  ;;  %v3282_v61 = vsel %vm3280_vm2, %v3276_v30, %v5959_v55 }
 0xaee   :  { %v5964_v59 = vunpack.i.h.bf16 %v5962_v46  ;;  %v5963_v53 = vunpack.i.l.bf16 %v5962_v46 }
 0xaf0   :  { %v3287_v36 = vsel %vm3286_vm3, %v3281_v28, %v5963_v53  ;;  %v3288_v40 = vsel %vm3286_vm3, %v3282_v61, %v5964_v59 }
 0xaf1   :  { %v5972_v6 = vpop.permute.xlu1 %5971  ;;  %v5967_v12 = vpop.permute.xlu0 %5966  ;;  %v5841_v14 = vpack.c.bf16 %v3288_v40, %v3287_v36  ;;  %v221_v40 = vld [vmem:[%s4713_s16] sm:$0xff] }
 0xaf2   :  { %v5969_v24 = vunpack.i.h.bf16 %v5967_v12  ;;  %v5968_v26 = vunpack.i.l.bf16 %v5967_v12  ;;  %v5974_v33 = vunpack.i.h.bf16 %v5972_v6  ;;  %v5973_v52 = vunpack.i.l.bf16 %v5972_v6  ;;  %5716 = vmatprep.subr.mxu1 %v221_v40 }
 0xaf3   :  { %5842 = vmatprep.subr.bf16.mxu0 %v5841_v14  ;;  %5717 = vmatpush3.msra.mxu1 %v221_v40 }
 0xaf4   :  { %v3278_v45 = vsel %vm262_vm1, %v7173_v63, %v5969_v24  ;;  %v3277_v31 = vsel %vm262_vm1, %v7167_v49, %v5968_v26  ;;  %5844 = vmatpush3.bf16.msra.mxu0 %v5841_v14 }
 0xaf5   :  { %v5977_v42 = vpop.permute.xlu0 %5976  ;;  %v3229_v50 = vpop.permute.xlu1 %3228  ;;  %v3283_v43 = vsel %vm3280_vm2, %v3277_v31, %v5973_v52  ;;  %v3284_v48 = vsel %vm3280_vm2, %v3278_v45, %v5974_v33 }
 0xaf6   :  { %v5979_v9 = vunpack.i.h.bf16 %v5977_v42  ;;  %v5978_v57 = vunpack.i.l.bf16 %v5977_v42  ;;  %v3279_v63 = vsel %vm262_vm1, %v7179_v54, %v3229_v50 }
 0xaf8   :  { %v3289_v7 = vsel %vm3286_vm3, %v3283_v43, %v5978_v57  ;;  %v3290_v34 = vsel %vm3286_vm3, %v3284_v48, %v5979_v9 }
 0xaf9   :  { %v3249_v49 = vpop.permute.xlu0 %3248  ;;  %v3269_v0 = vpop.permute.xlu1 %3268  ;;  %v5845_v58 = vpack.c.bf16 %v3290_v34, %v3289_v7  ;;  %v219_v34 = vld [vmem:[%s4711_s21] sm:$0xff] }
 0xafa   :  { %v3285_v39 = vsel %vm3280_vm2, %v3279_v63, %v3249_v49  ;;  %v217_v63 = vld [vmem:[%s4710_s26] sm:$0xff]  ;;  %v218_v49 = vld [vmem:[%s4710_s26 + $0x8] sm:$0xff]  ;;  %s4715_s26 = sld [smem:[%s7480_s0 + %s6175_s29]]   ;;  %s6208_s29 = smov 37  }
 0xafb   :  { %5846 = vmatprep.subr.bf16.mxu0 %v5845_v58  ;;  %v3291_v32 = vsel %vm3286_vm3, %v3285_v39, %v3269_v0  ;;  %v5849_v0 = vpack.c.bf16 %v218_v49, %v217_v63  ;;  %v4903_v49 = vld [vmem:[%s4712_s18] ss:$0 sm:$0xff]  ;;  %s4720_s1 = sld [smem:[%s7480_s0 + %s6208_s29]]   ;;  %s6212_s18 = smov 36  }
 0xafc   :  { %5848 = vmatpush3.bf16.msra.mxu0 %v5845_v58  ;;  %s4719_s21 = sld [smem:[%s7480_s0 + %s6212_s18]]  }
 0xafd   :  { %5688 = vmatprep.subr.mxu0 %v3291_v32 }
 0xb00   :  { %5689 = vmatpush3.msra.mxu0 %v3291_v32 }
 0xb01   :  { %5691 = vmatmul.mubr.msk.f32.vlgmr.msra.gmra.mrb[140].mxu0 %vm3292_vm0, %v3214_v44  ;;  %5693 = vmatprep.subr.msk.mxu0 %vm1595_vm4, %v216_v4 }
 0xb02   :  { %5694 = vmatpush3.msk.msra.mxu0 %vm1595_vm4, %v216_v4  ;;  %vm3620_vm4 = vcmask 64512  }
 0xb03   :  { %5704 = vmatprep.subr.mxu0 %v219_v34 }
 0xbd4   :  { %v5692_v60 = vpop.f32.mrb[140].mxu0 }
 0xbd5   :  { %v7240_v2 = vadd.f32 %v6158_v62, %v5692_v60  ;;  %v3365_v54 = vpop.f32.mrb[141].mxu0 }
 0xbd6   :  { %v7243_v8 = vadd.f32 %v6159_v27, %v3365_v54 }
 0xbd7   :  { %v3420_v38 = vmul.f32 %v7240_v2, %v7240_v2  ;;  %v3379_v36 = vsel %vm262_vm1, %v7240_v2, 0.0 }
 0xbd8   :  { %v3419_v5 = vmul.f32 %v7243_v8, %v7243_v8  ;;  %v3376_v61 = vsel %vm262_vm1, %v7243_v8, 0.0 }
 0xbd9   :  { %3425 = vrot.lane.b32.xlu1 %v3420_v38, %s6197_s7 }
 0xbda   :  { %3423 = vrot.lane.b32.xlu0 %v3419_v5, %s6197_s7 }
 0xbdd   :  { %3433 = vrot.lane.b32.xlu1 %v3420_v38, %s6198_s8 }
 0xbde   :  { %3431 = vrot.lane.b32.xlu0 %v3419_v5, %s6198_s8 }
 0xc4b   :  { %v3426_v13 = vpop.permute.xlu1 %3425 }
 0xc4c   :  { %v3424_v37 = vpop.permute.xlu0 %3423  ;;  %v3430_v11 = vadd.f32 %v3426_v13, %v3420_v38 }
 0xc4d   :  { %v3429_v35 = vadd.f32 %v3424_v37, %v3419_v5 }
 0xc4f   :  { %v3434_v19 = vpop.permute.xlu1 %3433 }
 0xc50   :  { %v3438_v41 = vadd.f32 %v3434_v19, %v3430_v11  ;;  %v3432_v15 = vpop.permute.xlu0 %3431 }
 0xc51   :  { %v3437_v51 = vadd.f32 %v3432_v15, %v3429_v35 }
 0xc52   :  { %v3440_v3 = vmax.f32 %v3438_v41, 1e-08 }
 0xc53   :  { %v3439_v17 = vmax.f32 %v3437_v51, 1e-08 }
 0xc54   :  { %3445 = vrot.lane.b32.xlu1 %v3440_v3, %s6171_s25 }
 0xc55   :  { %3443 = vrot.lane.b32.xlu0 %v3439_v17, %s6171_s25 }
 0xcc6   :  { %v3446_v16 = vpop.permute.xlu1 %3445 }
 0xcc7   :  { %v3444_v20 = vpop.permute.xlu0 %3443  ;;  %v3452_v56 = vsel %vm579_vm5, %v3446_v16, 0.0 }
 0xcc8   :  { %3453 = vadd.xlane.f32.xlu1 %v3452_v56  ;;  %v3449_v22 = vsel %vm579_vm5, %v3444_v20, 0.0  ;;  %v4890_v56 = vld [vmem:[%s4723_s2] ss:$0 sm:$0xff]  ;;  %s6209_s2 = smov 35  }
 0xcc9   :  { %3450 = vadd.xlane.f32.xlu0 %v3449_v22  ;;  %s4718_s6 = sld [smem:[%s7480_s0 + %s6209_s2]]  }
 0xd55   :  { %v3454_v10 = vpop.xlane.xlu1 %3453 }
 0xd56   :  { %v3457_v23 = vmul.f32 0.25, %v3454_v10  ;;  %v3451_v1 = vpop.xlane.xlu0 %3450 }
 0xd57   :  { %v3456_v18 = vmul.f32 0.25, %v3451_v1 }
 0xd58   :  { %6110 = vrsqrt.f32 %v3457_v23 }
 0xd59   :  { %6112 = vrsqrt.f32 %v3456_v18 }
 0xd62   :  { %v6111_v47 = vpop.eup %6110 }
 0xd63   :  { %v6113_v21 = vpop.eup %6112  ;;  %v7263_v55 = vmul.f32 %v6111_v47, %v7240_v2 }
 0xd64   :  { %v7266_v29 = vmul.f32 %v6113_v21, %v7243_v8 }
 0xd65   :  { %3466 = vrot.lane.b32.xlu1 %v7263_v55, %s6197_s7 }
 0xd66   :  { %3464 = vrot.lane.b32.xlu0 %v7266_v29, %s6197_s7 }
 0xd69   :  { %3470 = vrot.lane.b32.xlu1 %v7263_v55, %s6198_s8 }
 0xd6a   :  { %3468 = vrot.lane.b32.xlu0 %v7266_v29, %s6198_s8 }
 0xd6d   :  { %3474 = vrot.lane.b32.xlu1 %v7263_v55, %s6171_s25 }
 0xd6e   :  { %3472 = vrot.lane.b32.xlu0 %v7266_v29, %s6171_s25 }
 0xdd7   :  { %v3467_v30 = vpop.permute.xlu1 %3466 }
 0xdd8   :  { %3478 = vrot.lane.b32.xlu1 %v3467_v30, %s6171_s25  ;;  %v3465_v25 = vpop.permute.xlu0 %3464  ;;  %v4891_v30 = vld [vmem:[%s4724_s5] ss:$0 sm:$0xff]  ;;  %s6210_s5 = smov 34  }
 0xdd9   :  { %3476 = vrot.lane.b32.xlu0 %v3465_v25, %s6171_s25  ;;  %s7376_s11 = sld [smem:[%s7480_s0 + %s6210_s5]]  }
 0xddb   :  { %v3471_v46 = vpop.permute.xlu1 %3470 }
 0xddc   :  { %3482 = vrot.lane.b32.xlu1 %v3471_v46, %s6171_s25  ;;  %v3469_v59 = vpop.permute.xlu0 %3468 }
 0xddd   :  { %3480 = vrot.lane.b32.xlu0 %v3469_v59, %s6171_s25 }
 0xddf   :  { %v3475_v28 = vpop.permute.xlu1 %3474 }
 0xde0   :  { %v3473_v53 = vpop.permute.xlu0 %3472 }
 0xde1   :  { %5695 = vmatprep.mubr.msk.f32.mxu0 %vm579_vm5, %v3473_v53 }
 0xde2   :  { %5696 = vmatmul.mubr.msk.f32.vlgmr.msra.gmra.mrb[142].mxu0 %vm579_vm5, %v3475_v28 }
 0xde3   :  { %5705 = vmatpush3.msra.mxu0 %v219_v34 }
 0xde4   :  { %5850 = vmatprep.subr.bf16.mxu0 %v5849_v0 }
 0xdfc   :  { %3377 = vadd.xlane.f32.xlu0 %v3376_v61 }
 0xe00   :  { %3380 = vadd.xlane.f32.xlu1 %v3379_v36 }
 0xe4a   :  { %v3479_v6 = vpop.permute.xlu1 %3478 }
 0xe4b   :  { %v3477_v12 = vpop.permute.xlu0 %3476 }
 0xe4c   :  { %5698 = vmatprep.mubr.msk.f32.mxu0 %vm579_vm5, %v3477_v12 }
 0xe4d   :  { %5699 = vmatmul.mubr.msk.f32.gmra.mrb[144].mxu0 %vm579_vm5, %v3479_v6 }
 0xe4e   :  { %v3483_v24 = vpop.permute.xlu1 %3482 }
 0xe4f   :  { %v3481_v14 = vpop.permute.xlu0 %3480 }
 0xe50   :  { %5701 = vmatprep.mubr.msk.f32.mxu0 %vm579_vm5, %v3481_v14  ;;  %v222_v14 = vld [vmem:[%s4714_s12] sm:$0xff] }
 0xe51   :  { %5702 = vmatmul.mubr.msk.f32.gmra.mrb[146].mxu0 %vm579_vm5, %v3483_v24  ;;  %v223_v24 = vld [vmem:[%s4714_s12 + $0x8] sm:$0xff] }
 0xe89   :  { %v3378_v26 = vpop.xlane.xlu0 %3377 }
 0xe8a   :  { %v3383_v33 = vmul.f32 0.0625, %v3378_v26  ;;  %v5853_v26 = vpack.c.bf16 %v223_v24, %v222_v14 }
 0xe8c   :  { %v3385_v52 = vsub.f32 %v7243_v8, %v3383_v33  ;;  %v224_v33 = vld [vmem:[%s4714_s12 + $0x10] sm:$0xff] }
 0xe8d   :  { %v3381_v45 = vpop.xlane.xlu1 %3380 }
 0xe8e   :  { %v3384_v31 = vmul.f32 0.0625, %v3381_v45  ;;  %v3387_v42 = vmul.f32 %v3385_v52, %v3385_v52 }
 0xe90   :  { %v7299_v50 = vsub.f32 %v7240_v2, %v3384_v31  ;;  %v3389_v9 = vsel %vm262_vm1, %v3387_v42, 0.0  ;;  %v226_v31 = vld [vmem:[%s4714_s12 + $0x20] sm:$0xff]  ;;  %v227_v42 = vld [vmem:[%s4714_s12 + $0x28] sm:$0xff] }
 0xe91   :  { %3390 = vadd.xlane.f32.xlu0 %v3389_v9  ;;  %v5861_v9 = vpack.c.bf16 %v227_v42, %v226_v31 }
 0xe92   :  { %v3388_v57 = vmul.f32 %v7299_v50, %v7299_v50 }
 0xe94   :  { %v3392_v43 = vsel %vm262_vm1, %v3388_v57, 0.0  ;;  %v229_v57 = vld [vmem:[%s4714_s12 + $0x38] sm:$0xff] }
 0xe95   :  { %3393 = vadd.xlane.f32.xlu0 %v3392_v43 }
 0xeb5   :  { %v5697_v48 = vpop.f32.mrb[142].mxu0 }
 0xeb6   :  { %v3565_v7 = vpop.f32.mrb[143].mxu0  ;;  %v3595_v44 = vmul.f32 %v5697_v48, %v5697_v48 }
 0xeb7   :  { %5718 = vmatprep.mubr.msk.f32.mxu1 %vm3620_vm4, %v3565_v7  ;;  %v3594_v2 = vmul.f32 %v3565_v7, %v3565_v7 }
 0xeb8   :  { %5719 = vmatmul.mubr.msk.f32.vlgmr.msra.gmra.mrb[150].mxu1 %vm3620_vm4, %v5697_v48 }
 0xf1e   :  { %v3391_v58 = vpop.xlane.xlu0 %3390 }
 0xf1f   :  { %v3395_v39 = vmul.f32 0.0625, %v3391_v58 }
 0xf20   :  { %v5700_v32 = vpop.f32.mrb[144].mxu0 }
 0xf21   :  { %v3597_v60 = vmul.f32 %v5700_v32, %v5700_v32  ;;  %v3575_v62 = vpop.f32.mrb[145].mxu0  ;;  %v3397_v54 = vadd.f32 1e-05, %v3395_v39 }
 0xf22   :  { %v3596_v27 = vmul.f32 %v3575_v62, %v3575_v62  ;;  %5721 = vmatprep.mubr.msk.f32.mxu1 %vm3620_vm4, %v3575_v62  ;;  %v3394_v8 = vpop.xlane.xlu0 %3393 }
 0xf23   :  { %v3599_v38 = vadd.f32 %v3597_v60, %v3595_v44  ;;  %5722 = vmatmul.mubr.msk.f32.gmra.mrb[152].mxu1 %vm3620_vm4, %v5700_v32  ;;  %v3396_v37 = vmul.f32 0.0625, %v3394_v8  ;;  %6114 = vrsqrt.f32 %v3397_v54 }
 0xf24   :  { %v3598_v5 = vadd.f32 %v3596_v27, %v3594_v2  ;;  %v5703_v13 = vpop.f32.mrb[146].mxu0 }
 0xf25   :  { %v3601_v11 = vmul.f32 %v5703_v13, %v5703_v13  ;;  %v3585_v35 = vpop.f32.mrb[147].mxu0  ;;  %v3398_v51 = vadd.f32 1e-05, %v3396_v37  ;;  %v231_v37 = vld [vmem:[%s4716_s22] sm:$0xff]  ;;  %s6213_s22 = smov 39  }
 0xf26   :  { %v3600_v19 = vmul.f32 %v3585_v35, %v3585_v35  ;;  %5724 = vmatprep.mubr.msk.f32.mxu1 %vm3620_vm4, %v3585_v35  ;;  %5746 = vmatprep.subr.mxu1 %v231_v37 }
 0xf27   :  { %v3603_v41 = vadd.f32 %v3601_v11, %v3599_v38  ;;  %5725 = vmatmul.mubr.msk.f32.gmra.mrb[154].mxu1 %vm3620_vm4, %v5703_v13  ;;  %v4910_v11 = vld [vmem:[%s4715_s26] ss:$0 sm:$0xff]  ;;  %s4722_s26 = sld [smem:[%s7480_s0 + %s6213_s22]]  }
 0xf28   :  { %v3602_v15 = vadd.f32 %v3600_v19, %v3598_v5  ;;  %5747 = vmatpush3.msra.mxu1 %v231_v37 }
 0xf29   :  { %v3605_v3 = vmax.f32 %v3603_v41, 1e-08 }
 0xf2a   :  { %v3604_v17 = vmax.f32 %v3602_v15, 1e-08 }
 0xf2b   :  { %6116 = vrsqrt.f32 %v3605_v3  ;;  %vm3615_vm6 = vcmp.eq.f32.partialorder %v3605_v3, inf  ;;  %v3618_v46 = vand.u32 2147483648, %v3605_v3  ;;  %vm3617_vm9 = vcmp.eq.f32.partialorder %v3605_v3, 0.0 }
 0xf2c   :  { %6118 = vrsqrt.f32 %v3604_v17  ;;  %vm3608_vm8 = vcmp.eq.f32.partialorder %v3604_v17, inf  ;;  %v3611_v47 = vand.u32 2147483648, %v3604_v17  ;;  %vm3610_vm7 = vcmp.eq.f32.partialorder %v3604_v17, 0.0 }
 0xf2d   :  { %6120 = vrsqrt.f32 %v3398_v51  ;;  %v6115_v16 = vpop.eup %6114 }
 0xf2e   :  { %v3401_v20 = vmul.f32 %v6115_v16, %v3385_v52  ;;  %v225_v52 = vld [vmem:[%s4714_s12 + $0x18] sm:$0xff] }
 0xf2f   :  { %v5857_v45 = vpack.c.bf16 %v225_v52, %v224_v33 }
 0xf30   :  { %v3409_v4 = vmul.f32 %v4890_v56, %v3401_v20 }
 0xf32   :  { %v7325_v61 = vadd.f32 %v4891_v30, %v3409_v4 }
 0xf35   :  { %v6117_v22 = vpop.eup %6116 }
 0xf36   :  { %v6119_v10 = vpop.eup %6118  ;;  %v3614_v23 = vmul.f32 %v6117_v22, %v3605_v3 }
 0xf37   :  { %v6121_v1 = vpop.eup %6120  ;;  %v3607_v18 = vmul.f32 %v6119_v10, %v3604_v17 }
 0xf38   :  { %v3616_v21 = vsel %vm3615_vm6, %v3605_v3, %v3614_v23  ;;  %v3402_v59 = vmul.f32 %v6121_v1, %v7299_v50  ;;  %v228_v50 = vld [vmem:[%s4714_s12 + $0x30] sm:$0xff]  ;;  %s6211_s12 = smov 38  }
 0xf39   :  { %v3609_v25 = vsel %vm3608_vm8, %v3604_v17, %v3607_v18  ;;  %v3619_v28 = vsel %vm3617_vm9, %v3618_v46, %v3616_v21  ;;  %v5865_v43 = vpack.c.bf16 %v229_v57, %v228_v50  ;;  %v242_v46 = vld [vmem:[%s4720_s1] sm:$0xff]  ;;  %s4721_s16 = sld [smem:[%s7480_s0 + %s6211_s12]]  }
 0xf3a   :  { %v3612_v53 = vsel %vm3610_vm7, %v3611_v47, %v3609_v25  ;;  %v3410_v36 = vmul.f32 %v4890_v56, %v3402_v59  ;;  %5781 = vmatprep.subr.mxu1 %v242_v46  ;;  %v240_v59 = vld [vmem:[%s4718_s6] sm:$0xff] }
 0xf3b   :  { %5706 = vmatprep.mubr.msk.f32.mxu0 %vm3620_vm4, %v3612_v53  ;;  %v232_v53 = vld [vmem:[%s7376_s11] sm:$0xff] }
 0xf3c   :  { %5707 = vmatmul.mubr.msk.f32.vlgmr.msra.gmra.mrb[148].mxu0 %vm3620_vm4, %v3619_v28  ;;  %v7330_v40 = vadd.f32 %v4891_v30, %v3410_v36  ;;  %v233_v28 = vld [vmem:[%s7376_s11 + $0x8] sm:$0xff] }
 0xf3d   :  { %5713 = vmatprep.mubr.msk.f32.mxu0 %vm262_vm1, %v7325_v61  ;;  %5852 = vmatpush3.bf16.msra.mxu0 %v5849_v0  ;;  %v5869_v36 = vpack.c.bf16 %v233_v28, %v232_v53 }
 0xf3e   :  { %5854 = vmatprep.subr.bf16.mxu0 %v5853_v26 }
 0xf44   :  { %5714 = vmatmul.mubr.msk.f32.vlgmr.msra.gmra.mrb[148].mxu0 %vm262_vm1, %v7330_v40 }
 0xf45   :  { %5856 = vmatpush3.bf16.msra.mxu0 %v5853_v26 }
 0xf46   :  { %5858 = vmatprep.subr.bf16.mxu0 %v5857_v45 }
 0xf49   :  { %5860 = vmatpush3.bf16.msra.mxu0 %v5857_v45 }
 0xf4a   :  { %5862 = vmatprep.subr.bf16.mxu0 %v5861_v9 }
 0xf4d   :  { %5864 = vmatpush3.bf16.msra.mxu0 %v5861_v9 }
 0xf4e   :  { %5866 = vmatprep.subr.bf16.mxu0 %v5865_v43 }
 0xf51   :  { %5868 = vmatpush3.bf16.msra.mxu0 %v5865_v43 }
 0xf52   :  { %5757 = vmatprep.subr.mxu0 %v240_v59 }
 0xf8b   :  { %v7334_v6 = vpop.f32.mrb[150].mxu1 }
 0xf8c   :  { %v7336_v12 = vpop.f32.mrb[151].mxu1 }
 0xff6   :  { %v5723_v48 = vpop.f32.mrb[152].mxu1 }
 0xff7   :  { %v3885_v7 = vpop.f32.mrb[153].mxu1 }
 0xffa   :  { %v5726_v34 = vpop.f32.mrb[154].mxu1 }
 0xffb   :  { %v3895_v63 = vpop.f32.mrb[155].mxu1 }
0x1017   :  { %v5715_v0 = vpop.f32.mrb[148].mxu0 }
0x1018   :  { %v7344_v58 = vadd.f32 %v5715_v0, %v4903_v49  ;;  %v3774_v39 = vpop.f32.mrb[149].mxu0 }
0x1019   :  { %v7346_v32 = vadd.f32 %v4903_v49, %v3774_v39 }
0x101a   :  { %v3905_v44 = vsub.f32 0.0, %v7344_v58 }
0x101b   :  { %v3904_v60 = vsub.f32 0.0, %v7346_v32 }
0x101c   :  { %v3908_v62 = vmul.f32 1.442695, %v3905_v44 }
0x101d   :  { %v3906_v2 = vmul.f32 1.442695, %v3904_v60  ;;  %v234_v60 = vld [vmem:[%s7376_s11 + $0x10] sm:$0xff] }
0x101e   :  { %6122 = vpow2.f32 %v3908_v62  ;;  %v235_v62 = vld [vmem:[%s7376_s11 + $0x18] sm:$0xff] }
0x101f   :  { %6124 = vpow2.f32 %v3906_v2 }
0x1028   :  { %v6123_v54 = vpop.eup %6122 }
0x1029   :  { %v6125_v27 = vpop.eup %6124  ;;  %v3911_v8 = vadd.f32 1.0, %v6123_v54 }
0x102a   :  { %v3910_v38 = vadd.f32 1.0, %v6125_v27 }
0x102c   :  { %6126 = vrcp.f32 %v3910_v38 }
0x102d   :  { %6128 = vrcp.f32 %v3911_v8 }
0x1036   :  { %v6127_v5 = vpop.eup %6126 }
0x1037   :  { %v6129_v13 = vpop.eup %6128  ;;  %5743 = vmatprep.mubr.msk.f32.mxu0 %vm3920_vm10, %v6127_v5  ;;  %v5873_v5 = vpack.c.bf16 %v235_v62, %v234_v60 }
0x1038   :  { %5744 = vmatmul.mubr.msk.f32.vlgmr.msra.gmra.mrb[150].mxu0 %vm3920_vm10, %v6129_v13  ;;  %v4018_v13 = vmax.f32 %v7346_v32, 0.0  ;;  %v4019_v32 = vmax.f32 %v7344_v58, 0.0  ;;  %v4923_v58 = vld [vmem:[%s4719_s21] ss:$0 sm:$0xff] }
0x1039   :  { %5758 = vmatpush3.msra.mxu0 %v240_v59 }
0x103a   :  { %5870 = vmatprep.subr.bf16.mxu0 %v5869_v36 }
0x110b   :  { %v5745_v35 = vpop.f32.mrb[150].mxu0 }
0x110c   :  { %v3999_v19 = vadd.f32 %v5745_v35, %v4910_v11  ;;  %v3993_v41 = vpop.f32.mrb[151].mxu0  ;;  %v237_v35 = vld [vmem:[%s7376_s11 + $0x28] sm:$0xff] }
0x110d   :  { %v3994_v15 = vadd.f32 %v4910_v11, %v3993_v41  ;;  %v236_v11 = vld [vmem:[%s7376_s11 + $0x20] sm:$0xff]  ;;  %v238_v41 = vld [vmem:[%s7376_s11 + $0x30] sm:$0xff] }
0x110e   :  { %v4003_v51 = vsub.f32 0.0, %v3999_v19  ;;  %v5877_v19 = vpack.c.bf16 %v237_v35, %v236_v11 }
0x110f   :  { %v4002_v3 = vsub.f32 0.0, %v3994_v15  ;;  %v239_v15 = vld [vmem:[%s7376_s11 + $0x38] sm:$0xff] }
0x1110   :  { %v4006_v17 = vmul.f32 1.442695, %v4003_v51  ;;  %v5881_v51 = vpack.c.bf16 %v239_v15, %v238_v41 }
0x1111   :  { %v4004_v16 = vmul.f32 1.442695, %v4002_v3  ;;  %v243_v3 = vld [vmem:[%s4721_s16] sm:$0xff] }
0x1112   :  { %6130 = vpow2.f32 %v4006_v17  ;;  %v244_v17 = vld [vmem:[%s4721_s16 + $0x8] sm:$0xff] }
0x1113   :  { %6132 = vpow2.f32 %v4004_v16  ;;  %v5885_v16 = vpack.c.bf16 %v244_v17, %v243_v3 }
0x111c   :  { %v6131_v20 = vpop.eup %6130 }
0x111d   :  { %v6133_v56 = vpop.eup %6132  ;;  %v4009_v22 = vadd.f32 1.0, %v6131_v20 }
0x111e   :  { %v4008_v10 = vadd.f32 1.0, %v6133_v56 }
0x111f   :  { %6134 = vrcp.f32 %v4009_v22 }
0x1120   :  { %6136 = vrcp.f32 %v4008_v10 }
0x1129   :  { %v6135_v23 = vpop.eup %6134 }
0x112a   :  { %v6137_v1 = vpop.eup %6136  ;;  %v4013_v18 = vmul.f32 %v6135_v23, %v7334_v6  ;;  %v4015_v4 = vmul.f32 %v6135_v23, %v5723_v48  ;;  %v4017_v47 = vmul.f32 %v6135_v23, %v5726_v34 }
0x112b   :  { %v4012_v21 = vmul.f32 %v6137_v1, %v7336_v12  ;;  %v4014_v30 = vmul.f32 %v6137_v1, %v3885_v7  ;;  %v4016_v25 = vmul.f32 %v6137_v1, %v3895_v63 }
0x112d   :  { %5748 = vmatprep.mubr.msk.f32.mxu1 %vm3620_vm4, %v4012_v21 }
0x112e   :  { %5749 = vmatmul.mubr.msk.f32.vlgmr.msra.gmra.mrb[156].mxu1 %vm3620_vm4, %v4013_v18 }
0x112f   :  { %5751 = vmatprep.mubr.msk.f32.mxu1 %vm3620_vm4, %v4014_v30  ;;  %5782 = vmatpush3.msra.mxu1 %v242_v46  ;;  %v4930_v30 = vld [vmem:[%s4722_s26] ss:$0 sm:$0xff] }
0x1130   :  { %5886 = vmatprep.subr.bf16.mxu1 %v5885_v16 }
0x1132   :  { %5752 = vmatmul.mubr.msk.f32.gmra.mrb[158].mxu1 %vm3620_vm4, %v4015_v4 }
0x1133   :  { %5754 = vmatprep.mubr.msk.f32.mxu1 %vm3620_vm4, %v4016_v25 }
0x1136   :  { %5755 = vmatmul.mubr.msk.f32.gmra.mrb[160].mxu1 %vm3620_vm4, %v4017_v47 }
0x1201   :  { %v5750_v6 = vpop.f32.mrb[156].mxu1 }
0x1202   :  { %v4104_v12 = vpop.f32.mrb[157].mxu1  ;;  %v4134_v24 = vmul.f32 %v5750_v6, %v5750_v6 }
0x1203   :  { %5783 = vmatprep.mubr.msk.f32.mxu1 %vm3620_vm4, %v4104_v12  ;;  %v4133_v52 = vmul.f32 %v4104_v12, %v4104_v12 }
0x1204   :  { %5784 = vmatmul.mubr.msk.f32.vlgmr.msra.gmra.mrb[162].mxu1 %vm3620_vm4, %v5750_v6 }
0x1205   :  { %v5753_v14 = vpop.f32.mrb[158].mxu1  ;;  %5888 = vmatpush3.bf16.msra.mxu1 %v5885_v16 }
0x1206   :  { %v4136_v26 = vmul.f32 %v5753_v14, %v5753_v14  ;;  %v4114_v33 = vpop.f32.mrb[159].mxu1 }
0x1207   :  { %v4135_v45 = vmul.f32 %v4114_v33, %v4114_v33  ;;  %5786 = vmatprep.mubr.msk.f32.mxu1 %vm3620_vm4, %v4114_v33 }
0x1208   :  { %v4138_v31 = vadd.f32 %v4136_v26, %v4134_v24  ;;  %5787 = vmatmul.mubr.msk.f32.gmra.mrb[164].mxu1 %vm3620_vm4, %v5753_v14 }
0x1209   :  { %v4137_v42 = vadd.f32 %v4135_v45, %v4133_v52  ;;  %v5756_v50 = vpop.f32.mrb[160].mxu1 }
0x120a   :  { %v4140_v9 = vmul.f32 %v5756_v50, %v5756_v50  ;;  %v4124_v57 = vpop.f32.mrb[161].mxu1 }
0x120b   :  { %v4139_v43 = vmul.f32 %v4124_v57, %v4124_v57  ;;  %5789 = vmatprep.mubr.msk.f32.mxu1 %vm3620_vm4, %v4124_v57 }
0x120c   :  { %v4142_v48 = vadd.f32 %v4140_v9, %v4138_v31  ;;  %5790 = vmatmul.mubr.msk.f32.gmra.mrb[166].mxu1 %vm3620_vm4, %v5756_v50 }
0x120d   :  { %v4141_v7 = vadd.f32 %v4139_v43, %v4137_v42 }
0x120e   :  { %v4144_v34 = vmax.f32 %v4142_v48, 1e-08 }
0x120f   :  { %v4143_v63 = vmax.f32 %v4141_v7, 1e-08 }
0x1210   :  { %6138 = vrsqrt.f32 %v4144_v34  ;;  %vm4154_vm11 = vcmp.eq.f32.partialorder %v4144_v34, inf  ;;  %v4157_v8 = vand.u32 2147483648, %v4144_v34  ;;  %vm4156_vm14 = vcmp.eq.f32.partialorder %v4144_v34, 0.0 }
0x1211   :  { %6140 = vrsqrt.f32 %v4143_v63  ;;  %vm4147_vm12 = vcmp.eq.f32.partialorder %v4143_v63, inf  ;;  %v4150_v2 = vand.u32 2147483648, %v4143_v63  ;;  %vm4149_vm13 = vcmp.eq.f32.partialorder %v4143_v63, 0.0 }
0x121a   :  { %v6139_v49 = vpop.eup %6138 }
0x121b   :  { %v6141_v0 = vpop.eup %6140  ;;  %v4153_v39 = vmul.f32 %v6139_v49, %v4144_v34 }
0x121c   :  { %v4146_v44 = vmul.f32 %v6141_v0, %v4143_v63 }
0x121d   :  { %v4155_v54 = vsel %vm4154_vm11, %v4144_v34, %v4153_v39 }
0x121e   :  { %v4148_v27 = vsel %vm4147_vm12, %v4143_v63, %v4146_v44  ;;  %v4158_v37 = vsel %vm4156_vm14, %v4157_v8, %v4155_v54 }
0x121f   :  { %v4151_v38 = vsel %vm4149_vm13, %v4150_v2, %v4148_v27 }
0x1220   :  { %5759 = vmatprep.mubr.msk.f32.mxu0 %vm3620_vm4, %v4151_v38 }
0x1221   :  { %5760 = vmatmul.mubr.msk.f32.vlgmr.msra.gmra.mrb[152].mxu0 %vm3620_vm4, %v4158_v37 }
0x1222   :  { %5872 = vmatpush3.bf16.msra.mxu0 %v5869_v36  ;;  %5778 = vmatprep.mubr.msk.f32.mxu0 %vm3920_vm10, %v4018_v13 }
0x1223   :  { %5874 = vmatprep.subr.bf16.mxu0 %v5873_v5 }
0x1226   :  { %5876 = vmatpush3.bf16.msra.mxu0 %v5873_v5 }
0x1227   :  { %5878 = vmatprep.subr.bf16.mxu0 %v5877_v19 }
0x122a   :  { %5880 = vmatpush3.bf16.msra.mxu0 %v5877_v19 }
0x122b   :  { %5882 = vmatprep.subr.bf16.mxu0 %v5881_v51 }
0x122e   :  { %5884 = vmatpush3.bf16.msra.mxu0 %v5881_v51 }
0x1231   :  { %5779 = vmatmul.mubr.msk.f32.vlgmr.msra.gmra.mrb[152].mxu0 %vm3920_vm10, %v4019_v32 }
0x12d7   :  { %v5785_v20 = vpop.f32.mrb[162].mxu1 }
0x12d8   :  { %v4413_v56 = vpop.f32.mrb[163].mxu1 }
0x12db   :  { %v5788_v22 = vpop.f32.mrb[164].mxu1 }
0x12dc   :  { %v4423_v10 = vpop.f32.mrb[165].mxu1 }
0x12df   :  { %v5791_v23 = vpop.f32.mrb[166].mxu1 }
0x12e0   :  { %v4433_v1 = vpop.f32.mrb[167].mxu1 }
0x1304   :  { %v5780_v18 = vpop.f32.mrb[152].mxu0 }
0x1305   :  { %v4312_v4 = vpop.f32.mrb[153].mxu0  ;;  %v4328_v21 = vadd.f32 %v5780_v18, %v4923_v58 }
0x1306   :  { %v4327_v47 = vadd.f32 %v4923_v58, %v4312_v4 }
0x1307   :  { %v4546_v38 = vadd.f32 %v4328_v21, %v7330_v40 }
0x1308   :  { %5796 = vmatprep.mubr.msk.f32.mxu1 %vm262_vm1, %v4327_v47  ;;  %v4545_v27 = vadd.f32 %v4327_v47, %v7325_v61 }
0x1309   :  { %5797 = vmatmul.mubr.msk.f32.vlgmr.msra.gmra.mrb[168].mxu1 %vm262_vm1, %v4328_v21  ;;  %v4580_v5 = vsel %vm262_vm1, %v4546_v38, 0.0 }
0x130a   :  { %v4577_v8 = vsel %vm262_vm1, %v4545_v27, 0.0 }
0x13dc   :  { %v5798_v25 = vpop.f32.mrb[168].mxu1 }
0x13dd   :  { %v4526_v46 = vadd.f32 %v5798_v25, %v4930_v30  ;;  %v4520_v59 = vpop.f32.mrb[169].mxu1 }
0x13de   :  { %v4521_v53 = vadd.f32 %v4930_v30, %v4520_v59 }
0x13df   :  { %v4530_v28 = vsub.f32 0.0, %v4526_v46 }
0x13e0   :  { %v4529_v36 = vsub.f32 0.0, %v4521_v53 }
0x13e1   :  { %v4533_v6 = vmul.f32 1.442695, %v4530_v28 }
0x13e2   :  { %v4531_v12 = vmul.f32 1.442695, %v4529_v36 }
0x13e3   :  { %6142 = vpow2.f32 %v4533_v6 }
0x13e4   :  { %6144 = vpow2.f32 %v4531_v12 }
0x13ed   :  { %v6143_v14 = vpop.eup %6142 }
0x13ee   :  { %v6145_v24 = vpop.eup %6144  ;;  %v4536_v26 = vadd.f32 1.0, %v6143_v14 }
0x13ef   :  { %v4535_v33 = vadd.f32 1.0, %v6145_v24 }
0x13f0   :  { %6146 = vrcp.f32 %v4536_v26 }
0x13f1   :  { %6148 = vrcp.f32 %v4535_v33 }
0x13fa   :  { %v6147_v52 = vpop.eup %6146 }
0x13fb   :  { %v6149_v45 = vpop.eup %6148  ;;  %v4542_v31 = vmul.f32 %v6147_v52, %v5788_v22  ;;  %v4544_v42 = vmul.f32 %v6147_v52, %v5791_v23  ;;  %v4540_v50 = vmul.f32 %v6147_v52, %v5785_v20 }
0x13fc   :  { %v4541_v9 = vmul.f32 %v6149_v45, %v4423_v10  ;;  %v4539_v57 = vmul.f32 %v6149_v45, %v4413_v56  ;;  %v4543_v43 = vmul.f32 %v6149_v45, %v4433_v1 }
0x13fd   :  { %4561 = vrot.lane.b32.xlu0 %v4542_v31, %s6192_s13 }
0x13fe   :  { %4559 = vrot.lane.b32.xlu1 %v4541_v9, %s6192_s13 }
0x1401   :  { %4549 = vrot.lane.b32.xlu0 %v4539_v57, %s6176_s30 }
0x1402   :  { %4569 = vrot.lane.b32.xlu1 %v4543_v43, %s6193_s17 }
0x1406   :  { %4571 = vrot.lane.b32.xlu1 %v4544_v42, %s6193_s17 }
0x140a   :  { %4551 = vrot.lane.b32.xlu1 %v4540_v50, %s6176_s30 }
0x146f   :  { %v4562_v48 = vpop.permute.xlu0 %4561 }
0x1470   :  { %v7416_v7 = vadd.f32 %v4562_v48, %v7263_v55  ;;  %v4560_v34 = vpop.permute.xlu1 %4559 }
0x1471   :  { %v7419_v63 = vadd.f32 %v4560_v34, %v7266_v29 }
0x1472   :  { %v4622_v49 = vmul.f32 %v7416_v7, %v7416_v7 }
0x1473   :  { %v4621_v0 = vmul.f32 %v7419_v63, %v7419_v63  ;;  %v4550_v13 = vpop.permute.xlu0 %4549 }
0x1474   :  { %4627 = vrot.lane.b32.xlu1 %v4622_v49, %s6197_s7  ;;  %v4570_v39 = vpop.permute.xlu1 %4569  ;;  %v7444_v37 = vadd.f32 %v4550_v13, %v7266_v29 }
0x1475   :  { %v7427_v44 = vadd.f32 %v4570_v39, %v7266_v29  ;;  %4625 = vrot.lane.b32.xlu0 %v4621_v0, %s6197_s7  ;;  %s6215_s7 = smov 43  }
0x1476   :  { %v4619_v61 = vmul.f32 %v7444_v37, %v7444_v37  ;;  %s4726_s27 = sld [smem:[%s7480_s0 + %s6215_s7]]  }
0x1477   :  { %v4633_v60 = vmul.f32 %v7427_v44, %v7427_v44 }
0x1478   :  { %v4572_v62 = vpop.permute.xlu1 %4571 }
0x1479   :  { %v7433_v2 = vadd.f32 %v4572_v62, %v7263_v55  ;;  %4637 = vrot.lane.b32.xlu0 %v4633_v60, %s6198_s8 }
0x147b   :  { %v4634_v54 = vmul.f32 %v7433_v2, %v7433_v2 }
0x147c   :  { %v4552_v11 = vpop.permute.xlu1 %4551  ;;  %v4934_v57 = vld [vmem:[%s4726_s27] ss:$0 sm:$0xff] }
0x147d   :  { %4639 = vrot.lane.b32.xlu1 %v4634_v54, %s6198_s8  ;;  %v7447_v19 = vadd.f32 %v4552_v11, %v7263_v55 }
0x147f   :  { %v4620_v40 = vmul.f32 %v7447_v19, %v7447_v19 }
0x1498   :  { %4578 = vadd.xlane.f32.xlu0 %v4577_v8 }
0x14a1   :  { %4581 = vadd.xlane.f32.xlu1 %v4580_v5 }
0x14e6   :  { %v4628_v15 = vpop.permute.xlu1 %4627 }
0x14e7   :  { %v4626_v35 = vpop.permute.xlu0 %4625  ;;  %v4632_v3 = vadd.f32 %v4628_v15, %v4620_v40 }
0x14e8   :  { %v4631_v41 = vadd.f32 %v4626_v35, %v4619_v61 }
0x14eb   :  { %v4638_v51 = vpop.permute.xlu0 %4637 }
0x14ec   :  { %v4643_v32 = vadd.f32 %v4638_v51, %v4631_v41 }
0x14ee   :  { %v4645_v17 = vmax.f32 %v4643_v32, 1e-08 }
0x14ef   :  { %v4640_v16 = vpop.permute.xlu1 %4639 }
0x14f0   :  { %v4644_v29 = vadd.f32 %v4640_v16, %v4632_v3  ;;  %4649 = vrot.lane.b32.xlu0 %v4645_v17, %s6171_s25 }
0x14f2   :  { %v4646_v20 = vmax.f32 %v4644_v29, 1e-08 }
0x14f4   :  { %4651 = vrot.lane.b32.xlu1 %v4646_v20, %s6171_s25  ;;  %s6214_s25 = smov 42  }
0x14f5   :  { %s4725_s17 = sld [smem:[%s7480_s0 + %s6214_s25]]  }
0x14fb   :  { %v4933_v42 = vld [vmem:[%s4725_s17] ss:$0 sm:$0xff] }
0x1525   :  { %v4579_v55 = vpop.xlane.xlu0 %4578 }
0x1526   :  { %v4583_v56 = vmul.f32 0.0625, %v4579_v55 }
0x1528   :  { %v4585_v22 = vsub.f32 %v4545_v27, %v4583_v56 }
0x152a   :  { %v4587_v10 = vmul.f32 %v4585_v22, %v4585_v22 }
0x152c   :  { %v4589_v23 = vsel %vm262_vm1, %v4587_v10, 0.0 }
0x152d   :  { %4590 = vadd.xlane.f32.xlu0 %v4589_v23 }
0x152e   :  { %v4582_v1 = vpop.xlane.xlu1 %4581 }
0x152f   :  { %v4584_v58 = vmul.f32 0.0625, %v4582_v1 }
0x1531   :  { %v4586_v18 = vsub.f32 %v4546_v38, %v4584_v58 }
0x1533   :  { %v4588_v4 = vmul.f32 %v4586_v18, %v4586_v18 }
0x1535   :  { %v4592_v47 = vsel %vm262_vm1, %v4588_v4, 0.0 }
0x1536   :  { %4593 = vadd.xlane.f32.xlu1 %v4592_v47 }
0x1562   :  { %v4650_v21 = vpop.permute.xlu0 %4649 }
0x1563   :  { %v4655_v30 = vsel %vm579_vm5, %v4650_v21, 0.0 }
0x1564   :  { %4656 = vadd.xlane.f32.xlu0 %v4655_v30 }
0x1566   :  { %v4652_v25 = vpop.permute.xlu1 %4651 }
0x1567   :  { %v4658_v46 = vsel %vm579_vm5, %v4652_v25, 0.0  ;;  %vm4677_vm5 = vcmask 228352  }
0x1568   :  { %4659 = vadd.xlane.f32.xlu0 %v4658_v46 }
0x15ba   :  { %v4591_v59 = vpop.xlane.xlu0 %4590 }
0x15bb   :  { %v4595_v53 = vmul.f32 0.0625, %v4591_v59 }
0x15bd   :  { %v4597_v36 = vadd.f32 1e-05, %v4595_v53 }
0x15bf   :  { %6150 = vrsqrt.f32 %v4597_v36 }
0x15c3   :  { %v4594_v28 = vpop.xlane.xlu1 %4593 }
0x15c4   :  { %v4596_v6 = vmul.f32 0.0625, %v4594_v28 }
0x15c6   :  { %v4598_v12 = vadd.f32 1e-05, %v4596_v6 }
0x15c8   :  { %6152 = vrsqrt.f32 %v4598_v12 }
0x15c9   :  { %v6151_v26 = vpop.eup %6150 }
0x15ca   :  { %v4601_v45 = vmul.f32 %v6151_v26, %v4585_v22 }
0x15cc   :  { %v4609_v50 = vmul.f32 %v4933_v42, %v4601_v45 }
0x15ce   :  { %v4617_v48 = vadd.f32 %v4934_v57, %v4609_v50 }
0x15d2   :  { %v6153_v31 = vpop.eup %6152 }
0x15d3   :  { %v4602_v9 = vmul.f32 %v6153_v31, %v4586_v18 }
0x15d5   :  { %v4610_v34 = vmul.f32 %v4933_v42, %v4602_v9 }
0x15d7   :  { %v4618_v27 = vadd.f32 %v4934_v57, %v4610_v34 }
0x15f1   :  { %v4657_v14 = vpop.xlane.xlu0 %4656 }
0x15f2   :  { %v4661_v24 = vmul.f32 0.25, %v4657_v14 }
0x15f4   :  { %6154 = vrsqrt.f32 %v4661_v24 }
0x15f5   :  { %v4660_v33 = vpop.xlane.xlu0 %4659 }
0x15f6   :  { %v4662_v52 = vmul.f32 0.25, %v4660_v33 }
0x15f8   :  { %6156 = vrsqrt.f32 %v4662_v52 }
0x15fe   :  { %v6155_v43 = vpop.eup %6154 }
0x15ff   :  { %v4665_v49 = vmul.f32 %v6155_v43, %v7444_v37  ;;  %v4667_v0 = vmul.f32 %v6155_v43, %v7419_v63  ;;  %v4669_v39 = vmul.f32 %v6155_v43, %v7427_v44 }
0x1601   :  { %v4671_v60 = vsel %vm262_vm1, %v4617_v48, %v4665_v49 }
0x1602   :  { %v6157_v62 = vpop.eup %6156  ;;  %v4673_v54 = vsel %vm3280_vm2, %v4671_v60, %v4667_v0 }
0x1603   :  { %v4675_v8 = vsel %vm3286_vm3, %v4673_v54, %v4669_v39  ;;  %v4666_v38 = vmul.f32 %v6157_v62, %v7447_v19  ;;  %v4668_v5 = vmul.f32 %v6157_v62, %v7416_v7  ;;  %v4670_v13 = vmul.f32 %v6157_v62, %v7433_v2 }
0x1604   :  { %4678 = vst.msk [vmem:[%s4727_s3] sm:$0xff] %vm4677_vm5, %v4675_v8 }
0x1605   :  { %v4672_v63 = vsel %vm262_vm1, %v4618_v27, %v4666_v38 }
0x1606   :  { %v4674_v37 = vsel %vm3280_vm2, %v4672_v63, %v4668_v5 }
0x1607   :  { %v4676_v44 = vsel %vm3286_vm3, %v4674_v37, %v4670_v13 }
0x1608   :  { %4679 = vst.msk [vmem:[%s4727_s3 + $0x8] sm:$0xff] %vm4677_vm5, %v4676_v44 }

</bundles_post_ra>
